<compile_context>
chip_gen: v7x
topology: tpu7x:2x2x1
jax: 0.10.0
libtpu: 0.0.40
codegen_flags: <defaults>
</compile_context>

<pallas_src>
import math
import random
from functools import partial

import jax
import jax.numpy as jnp
from jax.experimental import pallas as pl
from jax.experimental.pallas import tpu as pltpu

WEIGHT_DTYPE = jnp.bfloat16            # matmul weights; activations stay f32
_VMEM_LIMIT = 64 * 1024 * 1024


# ----------------------------------------------------------------------------
# Shared LSTM cell math (runs inside the Pallas kernels)
# ----------------------------------------------------------------------------
def _lstm_cell_compute(x, h, c, w, b, hidden_dim):
    """One LSTM cell (PyTorch gate order i, f, g, o) with one fused matmul:
    [x, h] @ [W_ih; W_hh]."""
    xh = jnp.concatenate([x, h], axis=-1).astype(w.dtype)
    gates = jnp.dot(xh, w, preferred_element_type=jnp.float32) + b
    hd = hidden_dim
    i = jax.nn.sigmoid(gates[:, 0 * hd:1 * hd])
    f = jax.nn.sigmoid(gates[:, 1 * hd:2 * hd])
    g = jnp.tanh(gates[:, 2 * hd:3 * hd])
    o = jax.nn.sigmoid(gates[:, 3 * hd:4 * hd])
    c_new = f * c + i * g
    h_new = o * jnp.tanh(c_new)
    return h_new, c_new


# ----------------------------------------------------------------------------
# Fused stacked-LSTM sequence kernel (encoder path)
# grid = (batch_blocks, T); weights VMEM-resident; h/c carried in scratch.
# ----------------------------------------------------------------------------
def _make_lstm_seq_kernel(n_layers, hidden_dim):
    def kernel(x_ref, *rest):
        w_refs = rest[:2 * n_layers]
        h_out_ref, c_out_ref, h_sc, c_sc = rest[2 * n_layers:]
        t = pl.program_id(1)

        @pl.when(t == 0)
        def _init():
            h_sc[...] = jnp.zeros_like(h_sc)
            c_sc[...] = jnp.zeros_like(c_sc)

        inp = x_ref[0]                                   # (BB, Din)
        for l in range(n_layers):
            w = w_refs[2 * l][...]
            b = w_refs[2 * l + 1][...]
            h_new, c_new = _lstm_cell_compute(inp, h_sc[l], c_sc[l], w, b,
                                              hidden_dim)
            h_sc[l] = h_new
            c_sc[l] = c_new
            inp = h_new

        @pl.when(t == pl.num_programs(1) - 1)
        def _finalize():
            h_out_ref[...] = h_sc[...]
            c_out_ref[...] = c_sc[...]

    return kernel


def _pick_block_b(b):
    """Split the independent batch axis into 2 blocks when possible so the
    "parallel" grid axis can shard across v7x's two TensorCores."""
    if b % 16 == 0:
        return b // 2
    return b


def lstm_sequence(x_tbe, layer_params, hidden_dim, *, block_b=None):
    """Run a stacked LSTM over a full sequence in one pallas_call.

    x_tbe: (T, B, Din) time-major input.
    layer_params: list of (W (Din_l + H, 4H), b (1, 4H)) per layer.
    Returns final (h, c), each (n_layers, B, H) float32.
    """
    T, B, E = x_tbe.shape
    L = len(layer_params)
    H = hidden_dim
    if block_b is None:
        block_b = B
    assert B % block_b == 0 and (block_b == B or block_b % 8 == 0)
    nb = B // block_b

    in_specs = [pl.BlockSpec((1, block_b, E), lambda b, t: (t, b, 0))]
    flat_w = []
    for (w, bias) in layer_params:
        in_specs.append(pl.BlockSpec(w.shape, lambda b, t: (0, 0)))
        in_specs.append(pl.BlockSpec(bias.shape, lambda b, t: (0, 0)))
        flat_w += [w, bias]
    out_specs = (pl.BlockSpec((L, block_b, H), lambda b, t: (0, b, 0)),
                 pl.BlockSpec((L, block_b, H), lambda b, t: (0, b, 0)))

    h, c = pl.pallas_call(
        _make_lstm_seq_kernel(L, H),
        out_shape=(jax.ShapeDtypeStruct((L, B, H), jnp.float32),
                   jax.ShapeDtypeStruct((L, B, H), jnp.float32)),
        grid_spec=pltpu.PrefetchScalarGridSpec(
            num_scalar_prefetch=0,
            grid=(nb, T),
            in_specs=in_specs,
            out_specs=out_specs,
            scratch_shapes=[pltpu.VMEM((L, block_b, H), jnp.float32),
                            pltpu.VMEM((L, block_b, H), jnp.float32)]),
        compiler_params=pltpu.CompilerParams(
            dimension_semantics=("parallel", "arbitrary"),
            vmem_limit_bytes=_VMEM_LIMIT),
    )(x_tbe, *flat_w)
    return h, c


# ----------------------------------------------------------------------------
# Fused greedy-decode kernel (decoder path)
# grid = (max_len - 1,); LSTM stack + vocab projection + argmax feedback fused.
# ----------------------------------------------------------------------------
def _make_decoder_seq_kernel(n_layers, hidden_dim, vocab_size):
    def kernel(use_trg_ref, forced_emb_ref, h0_ref, c0_ref,
               emb_tbl_ref, fc_w_ref, fc_b_ref, *rest):
        w_refs = rest[:2 * n_layers]
        logits_ref = rest[2 * n_layers]
        h_sc, c_sc, pred_emb_sc = rest[2 * n_layers + 1:]
        j = pl.program_id(0)

        @pl.when(j == 0)
        def _init():
            h_sc[...] = h0_ref[...]
            c_sc[...] = c0_ref[...]
            pred_emb_sc[...] = jnp.zeros_like(pred_emb_sc)

        # Input embedding: teacher-forced target embedding or previous
        # greedy prediction's embedding (scalar blend; schedule in SMEM).
        m = (use_trg_ref[j] != 0).astype(jnp.float32)
        x = m * forced_emb_ref[0] + (1.0 - m) * pred_emb_sc[...]
        # TODO(synk): nn.Dropout on the embedding omitted (eval-mode).

        inp = x
        for l in range(n_layers):
            w = w_refs[2 * l][...]
            b = w_refs[2 * l + 1][...]
            h_new, c_new = _lstm_cell_compute(inp, h_sc[l], c_sc[l], w, b,
                                              hidden_dim)
            h_sc[l] = h_new
            c_sc[l] = c_new
            inp = h_new

        # Vocab projection (fused; fc_w stays VMEM-resident).
        # TODO(synk): for production-size V, tile fc_w over a V grid axis.
        logits = (jnp.dot(inp.astype(fc_w_ref.dtype), fc_w_ref[...],
                          preferred_element_type=jnp.float32)
                  + fc_b_ref[...])
        logits_ref[0] = logits

        # Greedy argmax -> one-hot -> next-step embedding, all in VMEM
        # (avoids an HBM round-trip of the logits every decode step).
        col = jax.lax.broadcasted_iota(jnp.int32, logits.shape, 1)
        colf = col.astype(jnp.float32)
        mx = jnp.max(logits, axis=-1, keepdims=True)
        first_max = jnp.min(jnp.where(logits >= mx, colf, float(vocab_size)),
                            axis=-1, keepdims=True)
        onehot = (colf == first_max).astype(jnp.float32)
        pred_emb_sc[...] = jnp.dot(onehot, emb_tbl_ref[...],
                                   preferred_element_type=jnp.float32)

    return kernel


def decoder_decode(params, forced_emb_tbe, use_trg, h0, c0, hidden_dim):
    """forced_emb_tbe: (Tdec, B, E); use_trg: (Tdec,) int32 schedule;
    h0/c0: (L, B, H) encoder context. Returns logits (Tdec, B, V) f32."""
    Tdec, B, E = forced_emb_tbe.shape
    L = len(params["dec_rnn"])
    H = hidden_dim
    V = params["fc_w"].shape[1]

    in_specs = [
        pl.BlockSpec((1, B, E), lambda j, tf: (j, 0, 0)),
        pl.BlockSpec((L, B, H), lambda j, tf: (0, 0, 0)),
        pl.BlockSpec((L, B, H), lambda j, tf: (0, 0, 0)),
        pl.BlockSpec(params["dec_emb"].shape, lambda j, tf: (0, 0)),
        pl.BlockSpec(params["fc_w"].shape, lambda j, tf: (0, 0)),
        pl.BlockSpec(params["fc_b"].shape, lambda j, tf: (0, 0)),
    ]
    flat_w = []
    for (w, bias) in params["dec_rnn"]:
        in_specs.append(pl.BlockSpec(w.shape, lambda j, tf: (0, 0)))
        in_specs.append(pl.BlockSpec(bias.shape, lambda j, tf: (0, 0)))
        flat_w += [w, bias]
    out_spec = pl.BlockSpec((1, B, V), lambda j, tf: (j, 0, 0))

    logits = pl.pallas_call(
        _make_decoder_seq_kernel(L, H, V),
        out_shape=jax.ShapeDtypeStruct((Tdec, B, V), jnp.float32),
        grid_spec=pltpu.PrefetchScalarGridSpec(
            num_scalar_prefetch=1,
            grid=(Tdec,),
            in_specs=in_specs,
            out_specs=out_spec,
            scratch_shapes=[pltpu.VMEM((L, B, H), jnp.float32),
                            pltpu.VMEM((L, B, H), jnp.float32),
                            pltpu.VMEM((B, E), jnp.float32)]),
        compiler_params=pltpu.CompilerParams(
            dimension_semantics=("arbitrary",),
            vmem_limit_bytes=_VMEM_LIMIT),
    )(use_trg, forced_emb_tbe, h0, c0, params["dec_emb"],
      params["fc_w"], params["fc_b"], *flat_w)
    return logits


# ----------------------------------------------------------------------------
# Parameter construction (deterministic, PyTorch-like uniform init)
# ----------------------------------------------------------------------------
def _uniform(key, shape, bound):
    return jax.random.uniform(key, shape, jnp.float32, -bound, bound)


def make_lstm_params(key, input_dim, hidden_dim, n_layers):
    layers = []
    bound = 1.0 / math.sqrt(hidden_dim)
    for l in range(n_layers):
        din = input_dim if l == 0 else hidden_dim
        key, k1, k2, k3, k4 = jax.random.split(key, 5)
        wih = _uniform(k1, (din, 4 * hidden_dim), bound)          # W_ih^T
        whh = _uniform(k2, (hidden_dim, 4 * hidden_dim), bound)   # W_hh^T
        # b = b_ih + b_hh (two independent uniform draws, as in nn.LSTM)
        b = (_uniform(k3, (1, 4 * hidden_dim), bound)
             + _uniform(k4, (1, 4 * hidden_dim), bound))
        w = jnp.concatenate([wih, whh], axis=0).astype(WEIGHT_DTYPE)
        layers.append((w, b))
    return layers, key


def make_params(key, vocab_size, emb_dim, hidden_dim, n_layers):
    params = {}
    key, k = jax.random.split(key)
    params["enc_emb"] = jax.random.normal(k, (vocab_size, emb_dim), jnp.float32)
    params["enc_seq_rnn"], key = make_lstm_params(key, emb_dim, hidden_dim,
                                                  n_layers)
    params["enc_ctx_rnn"], key = make_lstm_params(key, hidden_dim, hidden_dim,
                                                  n_layers)
    key, k = jax.random.split(key)
    params["dec_emb"] = jax.random.normal(k, (vocab_size, emb_dim), jnp.float32)
    params["dec_rnn"], key = make_lstm_params(key, emb_dim, hidden_dim,
                                              n_layers)
    bound = 1.0 / math.sqrt(hidden_dim)
    key, k1, k2 = jax.random.split(key, 3)
    params["fc_w"] = _uniform(k1, (hidden_dim, vocab_size),
                              bound).astype(WEIGHT_DTYPE)
    params["fc_b"] = _uniform(k2, (1, vocab_size), bound)
    return params


# ----------------------------------------------------------------------------
# Model forward
# ----------------------------------------------------------------------------
def encoder_forward(params, src, hidden_dim):
    """src: (B, seq_num, seq_len) int32 -> context hiddens (L, B, H) x 2."""
    B, seq_num, seq_len = src.shape
    E = params["enc_emb"].shape[1]
    # TODO(synk): nn.Dropout layers omitted (eval-mode semantics).
    emb = jnp.take(params["enc_emb"], src, axis=0)        # (B, Sn, Sl, E)
    emb = emb.reshape(B * seq_num, seq_len, E)
    emb = jnp.transpose(emb, (1, 0, 2))                   # (Sl, B*Sn, E)
    h_seq, _ = lstm_sequence(emb, params["enc_seq_rnn"], hidden_dim,
                             block_b=_pick_block_b(B * seq_num))
    seq_last = h_seq[-1]                                  # top-layer final h
    seq_last = seq_last.reshape(B, seq_num, hidden_dim)
    seq_last = jnp.transpose(seq_last, (1, 0, 2))         # (Sn, B, H)
    h_ctx, c_ctx = lstm_sequence(seq_last, params["enc_ctx_rnn"], hidden_dim,
                                 block_b=_pick_block_b(B))
    return h_ctx, c_ctx


@partial(jax.jit, static_argnums=(4,))
def _hier_forward_jit(params, src, trg, use_trg, hidden_dim):
    h_ctx, c_ctx = encoder_forward(params, src, hidden_dim)
    Tdec = trg.shape[1] - 1
    forced_tokens = trg[:, :Tdec]                          # (B, Tdec)
    forced_emb = jnp.take(params["dec_emb"], forced_tokens, axis=0)
    forced_emb = jnp.transpose(forced_emb, (1, 0, 2)).astype(jnp.float32)
    logits_tbv = decoder_decode(params, forced_emb, use_trg, h_ctx, c_ctx,
                                hidden_dim)
    # torch: outputs (max_len, B, V) -> permute(1,0,2) -> drop step 0
    return jnp.transpose(logits_tbv, (1, 0, 2))            # (B, max_len-1, V)


def hier_model_forward(params, src, trg, hidden_dim, teacher_forcing_ratio=0.5,
                       rng=None):
    """Mirrors HierModel.forward. Returns (B, max_len - 1, vocab)."""
    if rng is None:
        rng = random.Random(0)
    max_len = trg.shape[1]
    Tdec = max_len - 1
    # TODO(synk): teacher forcing uses Python random at trace time, so the
    # force/no-force schedule is fixed per compiled call (unlike PyTorch's
    # per-call stochastic behaviour); draw count matches the reference loop.
    decisions = [rng.random() < teacher_forcing_ratio for _ in range(Tdec)]
    use_trg = jnp.asarray([1] + [int(d) for d in decisions[:Tdec - 1]],
                          dtype=jnp.int32)                 # (Tdec,)
    return _hier_forward_jit(params, src, trg, use_trg, hidden_dim)


# ----------------------------------------------------------------------------
# Demo
# ----------------------------------------------------------------------------
if __name__ == "__main__":
    # Small but tile-aligned config (H = E = 128 lanes, B multiple of 8).
    vocab_size = 256
    emb_dim = 128
    hidden_dim = 128
    n_layers = 2
    batch = 8
    seq_num = 4
    seq_len = 6
    max_len = 8

    key = jax.random.PRNGKey(0)
    key, k_src, k_trg, k_par = jax.random.split(key, 4)
    src = jax.random.randint(k_src, (batch, seq_num, seq_len), 0, vocab_size,
                             dtype=jnp.int32)
    trg = jax.random.randint(k_trg, (batch, max_len), 0, vocab_size,
                             dtype=jnp.int32)
    params = make_params(k_par, vocab_size, emb_dim, hidden_dim, n_layers)

    out = hier_model_forward(params, src, trg, hidden_dim,
                             teacher_forcing_ratio=0.5, rng=random.Random(0))
    out = jax.block_until_ready(out)
    assert out.shape == (batch, max_len - 1, vocab_size), out.shape
    assert out.dtype == jnp.float32
    assert bool(jnp.all(jnp.isfinite(out)))
    print("KERNEL_OK")
</pallas_src>

<mosaic_0001>
module attributes {stable_mosaic.version = 11 : i64} {
  func.func @kernel(%arg0: i32, %arg1: i32, %arg2: memref<1x16x128xf32, #tpu.memory_space<vmem>>, %arg3: memref<256x512xbf16, #tpu.memory_space<vmem>>, %arg4: memref<1x512xf32, #tpu.memory_space<vmem>>, %arg5: memref<256x512xbf16, #tpu.memory_space<vmem>>, %arg6: memref<1x512xf32, #tpu.memory_space<vmem>>, %arg7: memref<2x16x128xf32, #tpu.memory_space<vmem>>, %arg8: memref<2x16x128xf32, #tpu.memory_space<vmem>>, %arg9: memref<2x16x128xf32, #tpu.memory_space<vmem>>, %arg10: memref<2x16x128xf32, #tpu.memory_space<vmem>>) attributes {dimension_semantics = [#tpu.dimension_semantics<parallel>, #tpu.dimension_semantics<arbitrary>], iteration_bounds = array<i64: 2, 6>, scalar_prefetch = 0 : i64, scratch_operands = 2 : i64, tpu.core_type = #tpu.core_type<tc>, window_params = [{transform_indices = @transform_0, window_bounds = array<i64: 1, 16, 128>}, {pipeline_mode = #tpu.pipeline_mode<synchronous>, transform_indices = @transform_1, window_bounds = array<i64: 256, 512>}, {pipeline_mode = #tpu.pipeline_mode<synchronous>, transform_indices = @transform_2, window_bounds = array<i64: 1, 512>}, {pipeline_mode = #tpu.pipeline_mode<synchronous>, transform_indices = @transform_3, window_bounds = array<i64: 256, 512>}, {pipeline_mode = #tpu.pipeline_mode<synchronous>, transform_indices = @transform_4, window_bounds = array<i64: 1, 512>}, {transform_indices = @transform_5, window_bounds = array<i64: 2, 16, 128>}, {transform_indices = @transform_6, window_bounds = array<i64: 2, 16, 128>}]} {
    %c0_i32 = arith.constant 0 : i32
    %0 = arith.cmpi eq, %arg1, %c0_i32 : i32
    %1 = arith.extui %0 : i1 to i32
    %c0_i32_0 = arith.constant 0 : i32
    %2 = arith.cmpi ne, %1, %c0_i32_0 : i32
    scf.if %2 {
      %cst_42 = arith.constant 0.000000e+00 : f32
      %92 = vector.broadcast %cst_42 : f32 to vector<2x16x128xf32>
      %c0_43 = arith.constant 0 : index
      %c0_44 = arith.constant 0 : index
      %c0_45 = arith.constant 0 : index
      %93 = vector.load %arg9[%c0_43, %c0_44, %c0_45] : memref<2x16x128xf32, #tpu.memory_space<vmem>>, vector<2x16x128xf32>
      tpu.vector_store %arg9[%c0_43, %c0_44, %c0_45], %92 {strides = array<i32>} : memref<2x16x128xf32, #tpu.memory_space<vmem>>, vector<2x16x128xf32>,
      %cst_46 = arith.constant 0.000000e+00 : f32
      %94 = vector.broadcast %cst_46 : f32 to vector<2x16x128xf32>
      %c0_47 = arith.constant 0 : index
      %c0_48 = arith.constant 0 : index
      %c0_49 = arith.constant 0 : index
      %95 = vector.load %arg10[%c0_47, %c0_48, %c0_49] : memref<2x16x128xf32, #tpu.memory_space<vmem>>, vector<2x16x128xf32>
      tpu.vector_store %arg10[%c0_47, %c0_48, %c0_49], %94 {strides = array<i32>} : memref<2x16x128xf32, #tpu.memory_space<vmem>>, vector<2x16x128xf32>,
    } else {
    }
    %c0 = arith.constant 0 : index
    %c0_1 = arith.constant 0 : index
    %c0_2 = arith.constant 0 : index
    %3 = vector.load %arg2[%c0, %c0_1, %c0_2] : memref<1x16x128xf32, #tpu.memory_space<vmem>>, vector<1x16x128xf32>
    %4 = vector.shape_cast %3 : vector<1x16x128xf32> to vector<16x128xf32>
    %c0_3 = arith.constant 0 : index
    %c0_4 = arith.constant 0 : index
    %5 = vector.load %arg3[%c0_3, %c0_4] : memref<256x512xbf16, #tpu.memory_space<vmem>>, vector<256x512xbf16>
    %c0_5 = arith.constant 0 : index
    %c0_6 = arith.constant 0 : index
    %6 = vector.load %arg4[%c0_5, %c0_6] : memref<1x512xf32, #tpu.memory_space<vmem>>, vector<1x512xf32>
    %c0_7 = arith.constant 0 : index
    %c0_8 = arith.constant 0 : index
    %c0_9 = arith.constant 0 : index
    %7 = vector.load %arg9[%c0_7, %c0_8, %c0_9] : memref<2x16x128xf32, #tpu.memory_space<vmem>>, vector<1x16x128xf32>
    %8 = vector.shape_cast %7 : vector<1x16x128xf32> to vector<16x128xf32>
    %c0_10 = arith.constant 0 : index
    %c0_11 = arith.constant 0 : index
    %c0_12 = arith.constant 0 : index
    %9 = vector.load %arg10[%c0_10, %c0_11, %c0_12] : memref<2x16x128xf32, #tpu.memory_space<vmem>>, vector<1x16x128xf32>
    %10 = vector.shape_cast %9 : vector<1x16x128xf32> to vector<16x128xf32>
    %11 = tpu.concatenate %4, %8 in 1 : vector<16x128xf32>, vector<16x128xf32> -> vector<16x256xf32>
    %12 = arith.truncf %11 : vector<16x256xf32> to vector<16x256xbf16>
    %cst = arith.constant dense<0.000000e+00> : vector<16x512xf32>
    %13 = tpu.matmul %12, %5, %cst {dimension_numbers = #tpu.dot_dimension_numbers<[1], [0], [0], [1], [0, 0, 1, 1], [], []>} : vector<16x256xbf16>, vector<256x512xbf16>, vector<16x512xf32> -> vector<16x512xf32>
    %14 = vector.broadcast %6 : vector<1x512xf32> to vector<16x512xf32>
    %15 = arith.addf %13, %14 : vector<16x512xf32>
    %16 = vector.extract_strided_slice %15 {offsets = [0, 0], sizes = [16, 128], strides = [1, 1]} : vector<16x512xf32> to vector<16x128xf32>
    %17 = arith.negf %16 : vector<16x128xf32>
    %18 = math.exp %17 : vector<16x128xf32>
    %cst_13 = arith.constant 1.000000e+00 : f32
    %19 = vector.broadcast %cst_13 : f32 to vector<16x128xf32>
    %20 = arith.addf %19, %18 : vector<16x128xf32>
    %21 = arith.divf %19, %20 : vector<16x128xf32>
    %22 = vector.extract_strided_slice %15 {offsets = [0, 128], sizes = [16, 128], strides = [1, 1]} : vector<16x512xf32> to vector<16x128xf32>
    %23 = arith.negf %22 : vector<16x128xf32>
    %24 = math.exp %23 : vector<16x128xf32>
    %cst_14 = arith.constant 1.000000e+00 : f32
    %25 = vector.broadcast %cst_14 : f32 to vector<16x128xf32>
    %26 = arith.addf %25, %24 : vector<16x128xf32>
    %27 = arith.divf %25, %26 : vector<16x128xf32>
    %28 = vector.extract_strided_slice %15 {offsets = [0, 256], sizes = [16, 128], strides = [1, 1]} : vector<16x512xf32> to vector<16x128xf32>
    %29 = math.tanh %28 : vector<16x128xf32>
    %30 = vector.extract_strided_slice %15 {offsets = [0, 384], sizes = [16, 128], strides = [1, 1]} : vector<16x512xf32> to vector<16x128xf32>
    %31 = arith.negf %30 : vector<16x128xf32>
    %32 = math.exp %31 : vector<16x128xf32>
    %cst_15 = arith.constant 1.000000e+00 : f32
    %33 = vector.broadcast %cst_15 : f32 to vector<16x128xf32>
    %34 = arith.addf %33, %32 : vector<16x128xf32>
    %35 = arith.divf %33, %34 : vector<16x128xf32>
    %36 = arith.mulf %27, %10 : vector<16x128xf32>
    %37 = arith.mulf %21, %29 : vector<16x128xf32>
    %38 = arith.addf %36, %37 : vector<16x128xf32>
    %39 = math.tanh %38 : vector<16x128xf32>
    %40 = arith.mulf %35, %39 : vector<16x128xf32>
    %c0_16 = arith.constant 0 : index
    %c0_17 = arith.constant 0 : index
    %c0_18 = arith.constant 0 : index
    %41 = vector.load %arg9[%c0_16, %c0_17, %c0_18] : memref<2x16x128xf32, #tpu.memory_space<vmem>>, vector<1x16x128xf32>
    %42 = vector.shape_cast %41 : vector<1x16x128xf32> to vector<16x128xf32>
    %43 = vector.shape_cast %40 : vector<16x128xf32> to vector<1x16x128xf32>
    tpu.vector_store %arg9[%c0_16, %c0_17, %c0_18], %43 {strides = array<i32>} : memref<2x16x128xf32, #tpu.memory_space<vmem>>, vector<1x16x128xf32>,
    %c0_19 = arith.constant 0 : index
    %c0_20 = arith.constant 0 : index
    %c0_21 = arith.constant 0 : index
    %44 = vector.load %arg10[%c0_19, %c0_20, %c0_21] : memref<2x16x128xf32, #tpu.memory_space<vmem>>, vector<1x16x128xf32>
    %45 = vector.shape_cast %44 : vector<1x16x128xf32> to vector<16x128xf32>
    %46 = vector.shape_cast %38 : vector<16x128xf32> to vector<1x16x128xf32>
    tpu.vector_store %arg10[%c0_19, %c0_20, %c0_21], %46 {strides = array<i32>} : memref<2x16x128xf32, #tpu.memory_space<vmem>>, vector<1x16x128xf32>,
    %c0_22 = arith.constant 0 : index
    %c0_23 = arith.constant 0 : index
    %47 = vector.load %arg5[%c0_22, %c0_23] : memref<256x512xbf16, #tpu.memory_space<vmem>>, vector<256x512xbf16>
    %c0_24 = arith.constant 0 : index
    %c0_25 = arith.constant 0 : index
    %48 = vector.load %arg6[%c0_24, %c0_25] : memref<1x512xf32, #tpu.memory_space<vmem>>, vector<1x512xf32>
    %c1 = arith.constant 1 : index
    %c0_26 = arith.constant 0 : index
    %c0_27 = arith.constant 0 : index
    %49 = vector.load %arg9[%c1, %c0_26, %c0_27] : memref<2x16x128xf32, #tpu.memory_space<vmem>>, vector<1x16x128xf32>
    %50 = vector.shape_cast %49 : vector<1x16x128xf32> to vector<16x128xf32>
    %c1_28 = arith.constant 1 : index
    %c0_29 = arith.constant 0 : index
    %c0_30 = arith.constant 0 : index
    %51 = vector.load %arg10[%c1_28, %c0_29, %c0_30] : memref<2x16x128xf32, #tpu.memory_space<vmem>>, vector<1x16x128xf32>
    %52 = vector.shape_cast %51 : vector<1x16x128xf32> to vector<16x128xf32>
    %53 = tpu.concatenate %40, %50 in 1 : vector<16x128xf32>, vector<16x128xf32> -> vector<16x256xf32>
    %54 = arith.truncf %53 : vector<16x256xf32> to vector<16x256xbf16>
    %cst_31 = arith.constant dense<0.000000e+00> : vector<16x512xf32>
    %55 = tpu.matmul %54, %47, %cst_31 {dimension_numbers = #tpu.dot_dimension_numbers<[1], [0], [0], [1], [0, 0, 1, 1], [], []>} : vector<16x256xbf16>, vector<256x512xbf16>, vector<16x512xf32> -> vector<16x512xf32>
    %56 = vector.broadcast %48 : vector<1x512xf32> to vector<16x512xf32>
    %57 = arith.addf %55, %56 : vector<16x512xf32>
    %58 = vector.extract_strided_slice %57 {offsets = [0, 0], sizes = [16, 128], strides = [1, 1]} : vector<16x512xf32> to vector<16x128xf32>
    %59 = arith.negf %58 : vector<16x128xf32>
    %60 = math.exp %59 : vector<16x128xf32>
    %cst_32 = arith.constant 1.000000e+00 : f32
    %61 = vector.broadcast %cst_32 : f32 to vector<16x128xf32>
    %62 = arith.addf %61, %60 : vector<16x128xf32>
    %63 = arith.divf %61, %62 : vector<16x128xf32>
    %64 = vector.extract_strided_slice %57 {offsets = [0, 128], sizes = [16, 128], strides = [1, 1]} : vector<16x512xf32> to vector<16x128xf32>
    %65 = arith.negf %64 : vector<16x128xf32>
    %66 = math.exp %65 : vector<16x128xf32>
    %cst_33 = arith.constant 1.000000e+00 : f32
    %67 = vector.broadcast %cst_33 : f32 to vector<16x128xf32>
    %68 = arith.addf %67, %66 : vector<16x128xf32>
    %69 = arith.divf %67, %68 : vector<16x128xf32>
    %70 = vector.extract_strided_slice %57 {offsets = [0, 256], sizes = [16, 128], strides = [1, 1]} : vector<16x512xf32> to vector<16x128xf32>
    %71 = math.tanh %70 : vector<16x128xf32>
    %72 = vector.extract_strided_slice %57 {offsets = [0, 384], sizes = [16, 128], strides = [1, 1]} : vector<16x512xf32> to vector<16x128xf32>
    %73 = arith.negf %72 : vector<16x128xf32>
    %74 = math.exp %73 : vector<16x128xf32>
    %cst_34 = arith.constant 1.000000e+00 : f32
    %75 = vector.broadcast %cst_34 : f32 to vector<16x128xf32>
    %76 = arith.addf %75, %74 : vector<16x128xf32>
    %77 = arith.divf %75, %76 : vector<16x128xf32>
    %78 = arith.mulf %69, %52 : vector<16x128xf32>
    %79 = arith.mulf %63, %71 : vector<16x128xf32>
    %80 = arith.addf %78, %79 : vector<16x128xf32>
    %81 = math.tanh %80 : vector<16x128xf32>
    %82 = arith.mulf %77, %81 : vector<16x128xf32>
    %c1_35 = arith.constant 1 : index
    %c0_36 = arith.constant 0 : index
    %c0_37 = arith.constant 0 : index
    %83 = vector.load %arg9[%c1_35, %c0_36, %c0_37] : memref<2x16x128xf32, #tpu.memory_space<vmem>>, vector<1x16x128xf32>
    %84 = vector.shape_cast %83 : vector<1x16x128xf32> to vector<16x128xf32>
    %85 = vector.shape_cast %82 : vector<16x128xf32> to vector<1x16x128xf32>
    tpu.vector_store %arg9[%c1_35, %c0_36, %c0_37], %85 {strides = array<i32>} : memref<2x16x128xf32, #tpu.memory_space<vmem>>, vector<1x16x128xf32>,
    %c1_38 = arith.constant 1 : index
    %c0_39 = arith.constant 0 : index
    %c0_40 = arith.constant 0 : index
    %86 = vector.load %arg10[%c1_38, %c0_39, %c0_40] : memref<2x16x128xf32, #tpu.memory_space<vmem>>, vector<1x16x128xf32>
    %87 = vector.shape_cast %86 : vector<1x16x128xf32> to vector<16x128xf32>
    %88 = vector.shape_cast %80 : vector<16x128xf32> to vector<1x16x128xf32>
    tpu.vector_store %arg10[%c1_38, %c0_39, %c0_40], %88 {strides = array<i32>} : memref<2x16x128xf32, #tpu.memory_space<vmem>>, vector<1x16x128xf32>,
    %c5_i32 = arith.constant 5 : i32
    %89 = arith.cmpi eq, %arg1, %c5_i32 : i32
    %90 = arith.extui %89 : i1 to i32
    %c0_i32_41 = arith.constant 0 : i32
    %91 = arith.cmpi ne, %90, %c0_i32_41 : i32
    scf.if %91 {
      %c0_42 = arith.constant 0 : index
      %c0_43 = arith.constant 0 : index
      %c0_44 = arith.constant 0 : index
      %92 = vector.load %arg9[%c0_42, %c0_43, %c0_44] : memref<2x16x128xf32, #tpu.memory_space<vmem>>, vector<2x16x128xf32>
      %c0_45 = arith.constant 0 : index
      %c0_46 = arith.constant 0 : index
      %c0_47 = arith.constant 0 : index
      %93 = vector.load %arg7[%c0_45, %c0_46, %c0_47] : memref<2x16x128xf32, #tpu.memory_space<vmem>>, vector<2x16x128xf32>
      tpu.vector_store %arg7[%c0_45, %c0_46, %c0_47], %92 {strides = array<i32>} : memref<2x16x128xf32, #tpu.memory_space<vmem>>, vector<2x16x128xf32>,
      %c0_48 = arith.constant 0 : index
      %c0_49 = arith.constant 0 : index
      %c0_50 = arith.constant 0 : index
      %94 = vector.load %arg10[%c0_48, %c0_49, %c0_50] : memref<2x16x128xf32, #tpu.memory_space<vmem>>, vector<2x16x128xf32>
      %c0_51 = arith.constant 0 : index
      %c0_52 = arith.constant 0 : index
      %c0_53 = arith.constant 0 : index
      %95 = vector.load %arg8[%c0_51, %c0_52, %c0_53] : memref<2x16x128xf32, #tpu.memory_space<vmem>>, vector<2x16x128xf32>
      tpu.vector_store %arg8[%c0_51, %c0_52, %c0_53], %94 {strides = array<i32>} : memref<2x16x128xf32, #tpu.memory_space<vmem>>, vector<2x16x128xf32>,
    } else {
    }
    return
  }
  func.func @transform_0(%arg0: i32, %arg1: i32) -> (i32, i32, i32) {
    %c0_i32 = arith.constant 0 : i32
    %c0_i32_0 = arith.constant 0 : i32
    return %arg1, %arg0, %c0_i32 : i32, i32, i32
  }
  func.func @transform_1(%arg0: i32, %arg1: i32) -> (i32, i32) {
    %c0_i32 = arith.constant 0 : i32
    %c0_i32_0 = arith.constant 0 : i32
    %c0_i32_1 = arith.constant 0 : i32
    return %c0_i32, %c0_i32_0 : i32, i32
  }
  func.func @transform_2(%arg0: i32, %arg1: i32) -> (i32, i32) {
    %c0_i32 = arith.constant 0 : i32
    %c0_i32_0 = arith.constant 0 : i32
    %c0_i32_1 = arith.constant 0 : i32
    return %c0_i32, %c0_i32_0 : i32, i32
  }
  func.func @transform_3(%arg0: i32, %arg1: i32) -> (i32, i32) {
    %c0_i32 = arith.constant 0 : i32
    %c0_i32_0 = arith.constant 0 : i32
    %c0_i32_1 = arith.constant 0 : i32
    return %c0_i32, %c0_i32_0 : i32, i32
  }
  func.func @transform_4(%arg0: i32, %arg1: i32) -> (i32, i32) {
    %c0_i32 = arith.constant 0 : i32
    %c0_i32_0 = arith.constant 0 : i32
    %c0_i32_1 = arith.constant 0 : i32
    return %c0_i32, %c0_i32_0 : i32, i32
  }
  func.func @transform_5(%arg0: i32, %arg1: i32) -> (i32, i32, i32) {
    %c0_i32 = arith.constant 0 : i32
    %c0_i32_0 = arith.constant 0 : i32
    %c0_i32_1 = arith.constant 0 : i32
    return %c0_i32, %arg0, %c0_i32_0 : i32, i32, i32
  }
  func.func @transform_6(%arg0: i32, %arg1: i32) -> (i32, i32, i32) {
    %c0_i32 = arith.constant 0 : i32
    %c0_i32_0 = arith.constant 0 : i32
    %c0_i32_1 = arith.constant 0 : i32
    return %c0_i32, %arg0, %c0_i32_0 : i32, i32, i32
  }
}

module attributes {stable_mosaic.version = 11 : i64} {
  func.func @kernel(%arg0: i32, %arg1: i32, %arg2: memref<1x8x128xf32, #tpu.memory_space<vmem>>, %arg3: memref<256x512xbf16, #tpu.memory_space<vmem>>, %arg4: memref<1x512xf32, #tpu.memory_space<vmem>>, %arg5: memref<256x512xbf16, #tpu.memory_space<vmem>>, %arg6: memref<1x512xf32, #tpu.memory_space<vmem>>, %arg7: memref<2x8x128xf32, #tpu.memory_space<vmem>>, %arg8: memref<2x8x128xf32, #tpu.memory_space<vmem>>, %arg9: memref<2x8x128xf32, #tpu.memory_space<vmem>>, %arg10: memref<2x8x128xf32, #tpu.memory_space<vmem>>) attributes {dimension_semantics = [#tpu.dimension_semantics<parallel>, #tpu.dimension_semantics<arbitrary>], iteration_bounds = array<i64: 1, 4>, scalar_prefetch = 0 : i64, scratch_operands = 2 : i64, tpu.core_type = #tpu.core_type<tc>, window_params = [{transform_indices = @transform_0, window_bounds = array<i64: 1, 8, 128>}, {pipeline_mode = #tpu.pipeline_mode<synchronous>, transform_indices = @transform_1, window_bounds = array<i64: 256, 512>}, {pipeline_mode = #tpu.pipeline_mode<synchronous>, transform_indices = @transform_2, window_bounds = array<i64: 1, 512>}, {pipeline_mode = #tpu.pipeline_mode<synchronous>, transform_indices = @transform_3, window_bounds = array<i64: 256, 512>}, {pipeline_mode = #tpu.pipeline_mode<synchronous>, transform_indices = @transform_4, window_bounds = array<i64: 1, 512>}, {transform_indices = @transform_5, window_bounds = array<i64: 2, 8, 128>}, {transform_indices = @transform_6, window_bounds = array<i64: 2, 8, 128>}]} {
    %c0_i32 = arith.constant 0 : i32
    %0 = arith.cmpi eq, %arg1, %c0_i32 : i32
    %1 = arith.extui %0 : i1 to i32
    %c0_i32_0 = arith.constant 0 : i32
    %2 = arith.cmpi ne, %1, %c0_i32_0 : i32
    scf.if %2 {
      %cst_42 = arith.constant 0.000000e+00 : f32
      %92 = vector.broadcast %cst_42 : f32 to vector<2x8x128xf32>
      %c0_43 = arith.constant 0 : index
      %c0_44 = arith.constant 0 : index
      %c0_45 = arith.constant 0 : index
      %93 = vector.load %arg9[%c0_43, %c0_44, %c0_45] : memref<2x8x128xf32, #tpu.memory_space<vmem>>, vector<2x8x128xf32>
      tpu.vector_store %arg9[%c0_43, %c0_44, %c0_45], %92 {strides = array<i32>} : memref<2x8x128xf32, #tpu.memory_space<vmem>>, vector<2x8x128xf32>,
      %cst_46 = arith.constant 0.000000e+00 : f32
      %94 = vector.broadcast %cst_46 : f32 to vector<2x8x128xf32>
      %c0_47 = arith.constant 0 : index
      %c0_48 = arith.constant 0 : index
      %c0_49 = arith.constant 0 : index
      %95 = vector.load %arg10[%c0_47, %c0_48, %c0_49] : memref<2x8x128xf32, #tpu.memory_space<vmem>>, vector<2x8x128xf32>
      tpu.vector_store %arg10[%c0_47, %c0_48, %c0_49], %94 {strides = array<i32>} : memref<2x8x128xf32, #tpu.memory_space<vmem>>, vector<2x8x128xf32>,
    } else {
    }
    %c0 = arith.constant 0 : index
    %c0_1 = arith.constant 0 : index
    %c0_2 = arith.constant 0 : index
    %3 = vector.load %arg2[%c0, %c0_1, %c0_2] : memref<1x8x128xf32, #tpu.memory_space<vmem>>, vector<1x8x128xf32>
    %4 = vector.shape_cast %3 : vector<1x8x128xf32> to vector<8x128xf32>
    %c0_3 = arith.constant 0 : index
    %c0_4 = arith.constant 0 : index
    %5 = vector.load %arg3[%c0_3, %c0_4] : memref<256x512xbf16, #tpu.memory_space<vmem>>, vector<256x512xbf16>
    %c0_5 = arith.constant 0 : index
    %c0_6 = arith.constant 0 : index
    %6 = vector.load %arg4[%c0_5, %c0_6] : memref<1x512xf32, #tpu.memory_space<vmem>>, vector<1x512xf32>
    %c0_7 = arith.constant 0 : index
    %c0_8 = arith.constant 0 : index
    %c0_9 = arith.constant 0 : index
    %7 = vector.load %arg9[%c0_7, %c0_8, %c0_9] : memref<2x8x128xf32, #tpu.memory_space<vmem>>, vector<1x8x128xf32>
    %8 = vector.shape_cast %7 : vector<1x8x128xf32> to vector<8x128xf32>
    %c0_10 = arith.constant 0 : index
    %c0_11 = arith.constant 0 : index
    %c0_12 = arith.constant 0 : index
    %9 = vector.load %arg10[%c0_10, %c0_11, %c0_12] : memref<2x8x128xf32, #tpu.memory_space<vmem>>, vector<1x8x128xf32>
    %10 = vector.shape_cast %9 : vector<1x8x128xf32> to vector<8x128xf32>
    %11 = tpu.concatenate %4, %8 in 1 : vector<8x128xf32>, vector<8x128xf32> -> vector<8x256xf32>
    %12 = arith.truncf %11 : vector<8x256xf32> to vector<8x256xbf16>
    %cst = arith.constant dense<0.000000e+00> : vector<8x512xf32>
    %13 = tpu.matmul %12, %5, %cst {dimension_numbers = #tpu.dot_dimension_numbers<[1], [0], [0], [1], [0, 0, 1, 1], [], []>} : vector<8x256xbf16>, vector<256x512xbf16>, vector<8x512xf32> -> vector<8x512xf32>
    %14 = vector.broadcast %6 : vector<1x512xf32> to vector<8x512xf32>
    %15 = arith.addf %13, %14 : vector<8x512xf32>
    %16 = vector.extract_strided_slice %15 {offsets = [0, 0], sizes = [8, 128], strides = [1, 1]} : vector<8x512xf32> to vector<8x128xf32>
    %17 = arith.negf %16 : vector<8x128xf32>
    %18 = math.exp %17 : vector<8x128xf32>
    %cst_13 = arith.constant 1.000000e+00 : f32
    %19 = vector.broadcast %cst_13 : f32 to vector<8x128xf32>
    %20 = arith.addf %19, %18 : vector<8x128xf32>
    %21 = arith.divf %19, %20 : vector<8x128xf32>
    %22 = vector.extract_strided_slice %15 {offsets = [0, 128], sizes = [8, 128], strides = [1, 1]} : vector<8x512xf32> to vector<8x128xf32>
    %23 = arith.negf %22 : vector<8x128xf32>
    %24 = math.exp %23 : vector<8x128xf32>
    %cst_14 = arith.constant 1.000000e+00 : f32
    %25 = vector.broadcast %cst_14 : f32 to vector<8x128xf32>
    %26 = arith.addf %25, %24 : vector<8x128xf32>
    %27 = arith.divf %25, %26 : vector<8x128xf32>
    %28 = vector.extract_strided_slice %15 {offsets = [0, 256], sizes = [8, 128], strides = [1, 1]} : vector<8x512xf32> to vector<8x128xf32>
    %29 = math.tanh %28 : vector<8x128xf32>
    %30 = vector.extract_strided_slice %15 {offsets = [0, 384], sizes = [8, 128], strides = [1, 1]} : vector<8x512xf32> to vector<8x128xf32>
    %31 = arith.negf %30 : vector<8x128xf32>
    %32 = math.exp %31 : vector<8x128xf32>
    %cst_15 = arith.constant 1.000000e+00 : f32
    %33 = vector.broadcast %cst_15 : f32 to vector<8x128xf32>
    %34 = arith.addf %33, %32 : vector<8x128xf32>
    %35 = arith.divf %33, %34 : vector<8x128xf32>
    %36 = arith.mulf %27, %10 : vector<8x128xf32>
    %37 = arith.mulf %21, %29 : vector<8x128xf32>
    %38 = arith.addf %36, %37 : vector<8x128xf32>
    %39 = math.tanh %38 : vector<8x128xf32>
    %40 = arith.mulf %35, %39 : vector<8x128xf32>
    %c0_16 = arith.constant 0 : index
    %c0_17 = arith.constant 0 : index
    %c0_18 = arith.constant 0 : index
    %41 = vector.load %arg9[%c0_16, %c0_17, %c0_18] : memref<2x8x128xf32, #tpu.memory_space<vmem>>, vector<1x8x128xf32>
    %42 = vector.shape_cast %41 : vector<1x8x128xf32> to vector<8x128xf32>
    %43 = vector.shape_cast %40 : vector<8x128xf32> to vector<1x8x128xf32>
    tpu.vector_store %arg9[%c0_16, %c0_17, %c0_18], %43 {strides = array<i32>} : memref<2x8x128xf32, #tpu.memory_space<vmem>>, vector<1x8x128xf32>,
    %c0_19 = arith.constant 0 : index
    %c0_20 = arith.constant 0 : index
    %c0_21 = arith.constant 0 : index
    %44 = vector.load %arg10[%c0_19, %c0_20, %c0_21] : memref<2x8x128xf32, #tpu.memory_space<vmem>>, vector<1x8x128xf32>
    %45 = vector.shape_cast %44 : vector<1x8x128xf32> to vector<8x128xf32>
    %46 = vector.shape_cast %38 : vector<8x128xf32> to vector<1x8x128xf32>
    tpu.vector_store %arg10[%c0_19, %c0_20, %c0_21], %46 {strides = array<i32>} : memref<2x8x128xf32, #tpu.memory_space<vmem>>, vector<1x8x128xf32>,
    %c0_22 = arith.constant 0 : index
    %c0_23 = arith.constant 0 : index
    %47 = vector.load %arg5[%c0_22, %c0_23] : memref<256x512xbf16, #tpu.memory_space<vmem>>, vector<256x512xbf16>
    %c0_24 = arith.constant 0 : index
    %c0_25 = arith.constant 0 : index
    %48 = vector.load %arg6[%c0_24, %c0_25] : memref<1x512xf32, #tpu.memory_space<vmem>>, vector<1x512xf32>
    %c1 = arith.constant 1 : index
    %c0_26 = arith.constant 0 : index
    %c0_27 = arith.constant 0 : index
    %49 = vector.load %arg9[%c1, %c0_26, %c0_27] : memref<2x8x128xf32, #tpu.memory_space<vmem>>, vector<1x8x128xf32>
    %50 = vector.shape_cast %49 : vector<1x8x128xf32> to vector<8x128xf32>
    %c1_28 = arith.constant 1 : index
    %c0_29 = arith.constant 0 : index
    %c0_30 = arith.constant 0 : index
    %51 = vector.load %arg10[%c1_28, %c0_29, %c0_30] : memref<2x8x128xf32, #tpu.memory_space<vmem>>, vector<1x8x128xf32>
    %52 = vector.shape_cast %51 : vector<1x8x128xf32> to vector<8x128xf32>
    %53 = tpu.concatenate %40, %50 in 1 : vector<8x128xf32>, vector<8x128xf32> -> vector<8x256xf32>
    %54 = arith.truncf %53 : vector<8x256xf32> to vector<8x256xbf16>
    %cst_31 = arith.constant dense<0.000000e+00> : vector<8x512xf32>
    %55 = tpu.matmul %54, %47, %cst_31 {dimension_numbers = #tpu.dot_dimension_numbers<[1], [0], [0], [1], [0, 0, 1, 1], [], []>} : vector<8x256xbf16>, vector<256x512xbf16>, vector<8x512xf32> -> vector<8x512xf32>
    %56 = vector.broadcast %48 : vector<1x512xf32> to vector<8x512xf32>
    %57 = arith.addf %55, %56 : vector<8x512xf32>
    %58 = vector.extract_strided_slice %57 {offsets = [0, 0], sizes = [8, 128], strides = [1, 1]} : vector<8x512xf32> to vector<8x128xf32>
    %59 = arith.negf %58 : vector<8x128xf32>
    %60 = math.exp %59 : vector<8x128xf32>
    %cst_32 = arith.constant 1.000000e+00 : f32
    %61 = vector.broadcast %cst_32 : f32 to vector<8x128xf32>
    %62 = arith.addf %61, %60 : vector<8x128xf32>
    %63 = arith.divf %61, %62 : vector<8x128xf32>
    %64 = vector.extract_strided_slice %57 {offsets = [0, 128], sizes = [8, 128], strides = [1, 1]} : vector<8x512xf32> to vector<8x128xf32>
    %65 = arith.negf %64 : vector<8x128xf32>
    %66 = math.exp %65 : vector<8x128xf32>
    %cst_33 = arith.constant 1.000000e+00 : f32
    %67 = vector.broadcast %cst_33 : f32 to vector<8x128xf32>
    %68 = arith.addf %67, %66 : vector<8x128xf32>
    %69 = arith.divf %67, %68 : vector<8x128xf32>
    %70 = vector.extract_strided_slice %57 {offsets = [0, 256], sizes = [8, 128], strides = [1, 1]} : vector<8x512xf32> to vector<8x128xf32>
    %71 = math.tanh %70 : vector<8x128xf32>
    %72 = vector.extract_strided_slice %57 {offsets = [0, 384], sizes = [8, 128], strides = [1, 1]} : vector<8x512xf32> to vector<8x128xf32>
    %73 = arith.negf %72 : vector<8x128xf32>
    %74 = math.exp %73 : vector<8x128xf32>
    %cst_34 = arith.constant 1.000000e+00 : f32
    %75 = vector.broadcast %cst_34 : f32 to vector<8x128xf32>
    %76 = arith.addf %75, %74 : vector<8x128xf32>
    %77 = arith.divf %75, %76 : vector<8x128xf32>
    %78 = arith.mulf %69, %52 : vector<8x128xf32>
    %79 = arith.mulf %63, %71 : vector<8x128xf32>
    %80 = arith.addf %78, %79 : vector<8x128xf32>
    %81 = math.tanh %80 : vector<8x128xf32>
    %82 = arith.mulf %77, %81 : vector<8x128xf32>
    %c1_35 = arith.constant 1 : index
    %c0_36 = arith.constant 0 : index
    %c0_37 = arith.constant 0 : index
    %83 = vector.load %arg9[%c1_35, %c0_36, %c0_37] : memref<2x8x128xf32, #tpu.memory_space<vmem>>, vector<1x8x128xf32>
    %84 = vector.shape_cast %83 : vector<1x8x128xf32> to vector<8x128xf32>
    %85 = vector.shape_cast %82 : vector<8x128xf32> to vector<1x8x128xf32>
    tpu.vector_store %arg9[%c1_35, %c0_36, %c0_37], %85 {strides = array<i32>} : memref<2x8x128xf32, #tpu.memory_space<vmem>>, vector<1x8x128xf32>,
    %c1_38 = arith.constant 1 : index
    %c0_39 = arith.constant 0 : index
    %c0_40 = arith.constant 0 : index
    %86 = vector.load %arg10[%c1_38, %c0_39, %c0_40] : memref<2x8x128xf32, #tpu.memory_space<vmem>>, vector<1x8x128xf32>
    %87 = vector.shape_cast %86 : vector<1x8x128xf32> to vector<8x128xf32>
    %88 = vector.shape_cast %80 : vector<8x128xf32> to vector<1x8x128xf32>
    tpu.vector_store %arg10[%c1_38, %c0_39, %c0_40], %88 {strides = array<i32>} : memref<2x8x128xf32, #tpu.memory_space<vmem>>, vector<1x8x128xf32>,
    %c3_i32 = arith.constant 3 : i32
    %89 = arith.cmpi eq, %arg1, %c3_i32 : i32
    %90 = arith.extui %89 : i1 to i32
    %c0_i32_41 = arith.constant 0 : i32
    %91 = arith.cmpi ne, %90, %c0_i32_41 : i32
    scf.if %91 {
      %c0_42 = arith.constant 0 : index
      %c0_43 = arith.constant 0 : index
      %c0_44 = arith.constant 0 : index
      %92 = vector.load %arg9[%c0_42, %c0_43, %c0_44] : memref<2x8x128xf32, #tpu.memory_space<vmem>>, vector<2x8x128xf32>
      %c0_45 = arith.constant 0 : index
      %c0_46 = arith.constant 0 : index
      %c0_47 = arith.constant 0 : index
      %93 = vector.load %arg7[%c0_45, %c0_46, %c0_47] : memref<2x8x128xf32, #tpu.memory_space<vmem>>, vector<2x8x128xf32>
      tpu.vector_store %arg7[%c0_45, %c0_46, %c0_47], %92 {strides = array<i32>} : memref<2x8x128xf32, #tpu.memory_space<vmem>>, vector<2x8x128xf32>,
      %c0_48 = arith.constant 0 : index
      %c0_49 = arith.constant 0 : index
      %c0_50 = arith.constant 0 : index
      %94 = vector.load %arg10[%c0_48, %c0_49, %c0_50] : memref<2x8x128xf32, #tpu.memory_space<vmem>>, vector<2x8x128xf32>
      %c0_51 = arith.constant 0 : index
      %c0_52 = arith.constant 0 : index
      %c0_53 = arith.constant 0 : index
      %95 = vector.load %arg8[%c0_51, %c0_52, %c0_53] : memref<2x8x128xf32, #tpu.memory_space<vmem>>, vector<2x8x128xf32>
      tpu.vector_store %arg8[%c0_51, %c0_52, %c0_53], %94 {strides = array<i32>} : memref<2x8x128xf32, #tpu.memory_space<vmem>>, vector<2x8x128xf32>,
    } else {
    }
    return
  }
  func.func @transform_0(%arg0: i32, %arg1: i32) -> (i32, i32, i32) {
    %c0_i32 = arith.constant 0 : i32
    %c0_i32_0 = arith.constant 0 : i32
    return %arg1, %arg0, %c0_i32 : i32, i32, i32
  }
  func.func @transform_1(%arg0: i32, %arg1: i32) -> (i32, i32) {
    %c0_i32 = arith.constant 0 : i32
    %c0_i32_0 = arith.constant 0 : i32
    %c0_i32_1 = arith.constant 0 : i32
    return %c0_i32, %c0_i32_0 : i32, i32
  }
  func.func @transform_2(%arg0: i32, %arg1: i32) -> (i32, i32) {
    %c0_i32 = arith.constant 0 : i32
    %c0_i32_0 = arith.constant 0 : i32
    %c0_i32_1 = arith.constant 0 : i32
    return %c0_i32, %c0_i32_0 : i32, i32
  }
  func.func @transform_3(%arg0: i32, %arg1: i32) -> (i32, i32) {
    %c0_i32 = arith.constant 0 : i32
    %c0_i32_0 = arith.constant 0 : i32
    %c0_i32_1 = arith.constant 0 : i32
    return %c0_i32, %c0_i32_0 : i32, i32
  }
  func.func @transform_4(%arg0: i32, %arg1: i32) -> (i32, i32) {
    %c0_i32 = arith.constant 0 : i32
    %c0_i32_0 = arith.constant 0 : i32
    %c0_i32_1 = arith.constant 0 : i32
    return %c0_i32, %c0_i32_0 : i32, i32
  }
  func.func @transform_5(%arg0: i32, %arg1: i32) -> (i32, i32, i32) {
    %c0_i32 = arith.constant 0 : i32
    %c0_i32_0 = arith.constant 0 : i32
    %c0_i32_1 = arith.constant 0 : i32
    return %c0_i32, %arg0, %c0_i32_0 : i32, i32, i32
  }
  func.func @transform_6(%arg0: i32, %arg1: i32) -> (i32, i32, i32) {
    %c0_i32 = arith.constant 0 : i32
    %c0_i32_0 = arith.constant 0 : i32
    %c0_i32_1 = arith.constant 0 : i32
    return %c0_i32, %arg0, %c0_i32_0 : i32, i32, i32
  }
}

module attributes {stable_mosaic.version = 11 : i64} {
  func.func @kernel(%arg0: i32, %arg1: memref<7xi32, #tpu.memory_space<smem>>, %arg2: memref<1x8x128xf32, #tpu.memory_space<vmem>>, %arg3: memref<2x8x128xf32, #tpu.memory_space<vmem>>, %arg4: memref<2x8x128xf32, #tpu.memory_space<vmem>>, %arg5: memref<256x128xf32, #tpu.memory_space<vmem>>, %arg6: memref<128x256xbf16, #tpu.memory_space<vmem>>, %arg7: memref<1x256xf32, #tpu.memory_space<vmem>>, %arg8: memref<256x512xbf16, #tpu.memory_space<vmem>>, %arg9: memref<1x512xf32, #tpu.memory_space<vmem>>, %arg10: memref<256x512xbf16, #tpu.memory_space<vmem>>, %arg11: memref<1x512xf32, #tpu.memory_space<vmem>>, %arg12: memref<1x8x256xf32, #tpu.memory_space<vmem>>, %arg13: memref<2x8x128xf32, #tpu.memory_space<vmem>>, %arg14: memref<2x8x128xf32, #tpu.memory_space<vmem>>, %arg15: memref<8x128xf32, #tpu.memory_space<vmem>>) attributes {dimension_semantics = [#tpu.dimension_semantics<arbitrary>], iteration_bounds = array<i64: 7>, scalar_prefetch = 1 : i64, scratch_operands = 3 : i64, tpu.core_type = #tpu.core_type<tc>, window_params = [{transform_indices = @transform_0, window_bounds = array<i64: 1, 8, 128>}, {pipeline_mode = #tpu.pipeline_mode<synchronous>, transform_indices = @transform_1, window_bounds = array<i64: 2, 8, 128>}, {pipeline_mode = #tpu.pipeline_mode<synchronous>, transform_indices = @transform_2, window_bounds = array<i64: 2, 8, 128>}, {pipeline_mode = #tpu.pipeline_mode<synchronous>, transform_indices = @transform_3, window_bounds = array<i64: 256, 128>}, {pipeline_mode = #tpu.pipeline_mode<synchronous>, transform_indices = @transform_4, window_bounds = array<i64: 128, 256>}, {pipeline_mode = #tpu.pipeline_mode<synchronous>, transform_indices = @transform_5, window_bounds = array<i64: 1, 256>}, {pipeline_mode = #tpu.pipeline_mode<synchronous>, transform_indices = @transform_6, window_bounds = array<i64: 256, 512>}, {pipeline_mode = #tpu.pipeline_mode<synchronous>, transform_indices = @transform_7, window_bounds = array<i64: 1, 512>}, {pipeline_mode = #tpu.pipeline_mode<synchronous>, transform_indices = @transform_8, window_bounds = array<i64: 256, 512>}, {pipeline_mode = #tpu.pipeline_mode<synchronous>, transform_indices = @transform_9, window_bounds = array<i64: 1, 512>}, {transform_indices = @transform_10, window_bounds = array<i64: 1, 8, 256>}]} {
    %c0_i32 = arith.constant 0 : i32
    %0 = arith.cmpi eq, %arg0, %c0_i32 : i32
    %1 = arith.extui %0 : i1 to i32
    %c0_i32_0 = arith.constant 0 : i32
    %2 = arith.cmpi ne, %1, %c0_i32_0 : i32
    scf.if %2 {
      %c0_61 = arith.constant 0 : index
      %c0_62 = arith.constant 0 : index
      %c0_63 = arith.constant 0 : index
      %127 = vector.load %arg3[%c0_61, %c0_62, %c0_63] : memref<2x8x128xf32, #tpu.memory_space<vmem>>, vector<2x8x128xf32>
      %c0_64 = arith.constant 0 : index
      %c0_65 = arith.constant 0 : index
      %c0_66 = arith.constant 0 : index
      %128 = vector.load %arg13[%c0_64, %c0_65, %c0_66] : memref<2x8x128xf32, #tpu.memory_space<vmem>>, vector<2x8x128xf32>
      tpu.vector_store %arg13[%c0_64, %c0_65, %c0_66], %127 {strides = array<i32>} : memref<2x8x128xf32, #tpu.memory_space<vmem>>, vector<2x8x128xf32>,
      %c0_67 = arith.constant 0 : index
      %c0_68 = arith.constant 0 : index
      %c0_69 = arith.constant 0 : index
      %129 = vector.load %arg4[%c0_67, %c0_68, %c0_69] : memref<2x8x128xf32, #tpu.memory_space<vmem>>, vector<2x8x128xf32>
      %c0_70 = arith.constant 0 : index
      %c0_71 = arith.constant 0 : index
      %c0_72 = arith.constant 0 : index
      %130 = vector.load %arg14[%c0_70, %c0_71, %c0_72] : memref<2x8x128xf32, #tpu.memory_space<vmem>>, vector<2x8x128xf32>
      tpu.vector_store %arg14[%c0_70, %c0_71, %c0_72], %129 {strides = array<i32>} : memref<2x8x128xf32, #tpu.memory_space<vmem>>, vector<2x8x128xf32>,
      %cst_73 = arith.constant 0.000000e+00 : f32
      %131 = vector.broadcast %cst_73 : f32 to vector<8x128xf32>
      %c0_74 = arith.constant 0 : index
      %c0_75 = arith.constant 0 : index
      %132 = vector.load %arg15[%c0_74, %c0_75] : memref<8x128xf32, #tpu.memory_space<vmem>>, vector<8x128xf32>
      tpu.vector_store %arg15[%c0_74, %c0_75], %131 {strides = array<i32>} : memref<8x128xf32, #tpu.memory_space<vmem>>, vector<8x128xf32>,
    } else {
    }
    %3 = arith.index_cast %arg0 : i32 to index
    %4 = memref.load %arg1[%3] : memref<7xi32, #tpu.memory_space<smem>>
    %c0_i32_1 = arith.constant 0 : i32
    %5 = arith.cmpi ne, %4, %c0_i32_1 : i32
    %6 = arith.extui %5 : i1 to i32
    %7 = arith.sitofp %6 : i32 to f32
    %c0 = arith.constant 0 : index
    %c0_2 = arith.constant 0 : index
    %c0_3 = arith.constant 0 : index
    %8 = vector.load %arg2[%c0, %c0_2, %c0_3] : memref<1x8x128xf32, #tpu.memory_space<vmem>>, vector<1x8x128xf32>
    %9 = vector.shape_cast %8 : vector<1x8x128xf32> to vector<8x128xf32>
    %10 = vector.broadcast %7 : f32 to vector<8x128xf32>
    %11 = arith.mulf %10, %9 : vector<8x128xf32>
    %cst = arith.constant 1.000000e+00 : f32
    %12 = arith.subf %cst, %7 : f32
    %c0_4 = arith.constant 0 : index
    %c0_5 = arith.constant 0 : index
    %13 = vector.load %arg15[%c0_4, %c0_5] : memref<8x128xf32, #tpu.memory_space<vmem>>, vector<8x128xf32>
    %14 = vector.broadcast %12 : f32 to vector<8x128xf32>
    %15 = arith.mulf %14, %13 : vector<8x128xf32>
    %16 = arith.addf %11, %15 : vector<8x128xf32>
    %c0_6 = arith.constant 0 : index
    %c0_7 = arith.constant 0 : index
    %17 = vector.load %arg8[%c0_6, %c0_7] : memref<256x512xbf16, #tpu.memory_space<vmem>>, vector<256x512xbf16>
    %c0_8 = arith.constant 0 : index
    %c0_9 = arith.constant 0 : index
    %18 = vector.load %arg9[%c0_8, %c0_9] : memref<1x512xf32, #tpu.memory_space<vmem>>, vector<1x512xf32>
    %c0_10 = arith.constant 0 : index
    %c0_11 = arith.constant 0 : index
    %c0_12 = arith.constant 0 : index
    %19 = vector.load %arg13[%c0_10, %c0_11, %c0_12] : memref<2x8x128xf32, #tpu.memory_space<vmem>>, vector<1x8x128xf32>
    %20 = vector.shape_cast %19 : vector<1x8x128xf32> to vector<8x128xf32>
    %c0_13 = arith.constant 0 : index
    %c0_14 = arith.constant 0 : index
    %c0_15 = arith.constant 0 : index
    %21 = vector.load %arg14[%c0_13, %c0_14, %c0_15] : memref<2x8x128xf32, #tpu.memory_space<vmem>>, vector<1x8x128xf32>
    %22 = vector.shape_cast %21 : vector<1x8x128xf32> to vector<8x128xf32>
    %23 = tpu.concatenate %16, %20 in 1 : vector<8x128xf32>, vector<8x128xf32> -> vector<8x256xf32>
    %24 = arith.truncf %23 : vector<8x256xf32> to vector<8x256xbf16>
    %cst_16 = arith.constant dense<0.000000e+00> : vector<8x512xf32>
    %25 = tpu.matmul %24, %17, %cst_16 {dimension_numbers = #tpu.dot_dimension_numbers<[1], [0], [0], [1], [0, 0, 1, 1], [], []>} : vector<8x256xbf16>, vector<256x512xbf16>, vector<8x512xf32> -> vector<8x512xf32>
    %26 = vector.broadcast %18 : vector<1x512xf32> to vector<8x512xf32>
    %27 = arith.addf %25, %26 : vector<8x512xf32>
    %28 = vector.extract_strided_slice %27 {offsets = [0, 0], sizes = [8, 128], strides = [1, 1]} : vector<8x512xf32> to vector<8x128xf32>
    %29 = arith.negf %28 : vector<8x128xf32>
    %30 = math.exp %29 : vector<8x128xf32>
    %cst_17 = arith.constant 1.000000e+00 : f32
    %31 = vector.broadcast %cst_17 : f32 to vector<8x128xf32>
    %32 = arith.addf %31, %30 : vector<8x128xf32>
    %33 = arith.divf %31, %32 : vector<8x128xf32>
    %34 = vector.extract_strided_slice %27 {offsets = [0, 128], sizes = [8, 128], strides = [1, 1]} : vector<8x512xf32> to vector<8x128xf32>
    %35 = arith.negf %34 : vector<8x128xf32>
    %36 = math.exp %35 : vector<8x128xf32>
    %cst_18 = arith.constant 1.000000e+00 : f32
    %37 = vector.broadcast %cst_18 : f32 to vector<8x128xf32>
    %38 = arith.addf %37, %36 : vector<8x128xf32>
    %39 = arith.divf %37, %38 : vector<8x128xf32>
    %40 = vector.extract_strided_slice %27 {offsets = [0, 256], sizes = [8, 128], strides = [1, 1]} : vector<8x512xf32> to vector<8x128xf32>
    %41 = math.tanh %40 : vector<8x128xf32>
    %42 = vector.extract_strided_slice %27 {offsets = [0, 384], sizes = [8, 128], strides = [1, 1]} : vector<8x512xf32> to vector<8x128xf32>
    %43 = arith.negf %42 : vector<8x128xf32>
    %44 = math.exp %43 : vector<8x128xf32>
    %cst_19 = arith.constant 1.000000e+00 : f32
    %45 = vector.broadcast %cst_19 : f32 to vector<8x128xf32>
    %46 = arith.addf %45, %44 : vector<8x128xf32>
    %47 = arith.divf %45, %46 : vector<8x128xf32>
    %48 = arith.mulf %39, %22 : vector<8x128xf32>
    %49 = arith.mulf %33, %41 : vector<8x128xf32>
    %50 = arith.addf %48, %49 : vector<8x128xf32>
    %51 = math.tanh %50 : vector<8x128xf32>
    %52 = arith.mulf %47, %51 : vector<8x128xf32>
    %c0_20 = arith.constant 0 : index
    %c0_21 = arith.constant 0 : index
    %c0_22 = arith.constant 0 : index
    %53 = vector.load %arg13[%c0_20, %c0_21, %c0_22] : memref<2x8x128xf32, #tpu.memory_space<vmem>>, vector<1x8x128xf32>
    %54 = vector.shape_cast %53 : vector<1x8x128xf32> to vector<8x128xf32>
    %55 = vector.shape_cast %52 : vector<8x128xf32> to vector<1x8x128xf32>
    tpu.vector_store %arg13[%c0_20, %c0_21, %c0_22], %55 {strides = array<i32>} : memref<2x8x128xf32, #tpu.memory_space<vmem>>, vector<1x8x128xf32>,
    %c0_23 = arith.constant 0 : index
    %c0_24 = arith.constant 0 : index
    %c0_25 = arith.constant 0 : index
    %56 = vector.load %arg14[%c0_23, %c0_24, %c0_25] : memref<2x8x128xf32, #tpu.memory_space<vmem>>, vector<1x8x128xf32>
    %57 = vector.shape_cast %56 : vector<1x8x128xf32> to vector<8x128xf32>
    %58 = vector.shape_cast %50 : vector<8x128xf32> to vector<1x8x128xf32>
    tpu.vector_store %arg14[%c0_23, %c0_24, %c0_25], %58 {strides = array<i32>} : memref<2x8x128xf32, #tpu.memory_space<vmem>>, vector<1x8x128xf32>,
    %c0_26 = arith.constant 0 : index
    %c0_27 = arith.constant 0 : index
    %59 = vector.load %arg10[%c0_26, %c0_27] : memref<256x512xbf16, #tpu.memory_space<vmem>>, vector<256x512xbf16>
    %c0_28 = arith.constant 0 : index
    %c0_29 = arith.constant 0 : index
    %60 = vector.load %arg11[%c0_28, %c0_29] : memref<1x512xf32, #tpu.memory_space<vmem>>, vector<1x512xf32>
    %c1 = arith.constant 1 : index
    %c0_30 = arith.constant 0 : index
    %c0_31 = arith.constant 0 : index
    %61 = vector.load %arg13[%c1, %c0_30, %c0_31] : memref<2x8x128xf32, #tpu.memory_space<vmem>>, vector<1x8x128xf32>
    %62 = vector.shape_cast %61 : vector<1x8x128xf32> to vector<8x128xf32>
    %c1_32 = arith.constant 1 : index
    %c0_33 = arith.constant 0 : index
    %c0_34 = arith.constant 0 : index
    %63 = vector.load %arg14[%c1_32, %c0_33, %c0_34] : memref<2x8x128xf32, #tpu.memory_space<vmem>>, vector<1x8x128xf32>
    %64 = vector.shape_cast %63 : vector<1x8x128xf32> to vector<8x128xf32>
    %65 = tpu.concatenate %52, %62 in 1 : vector<8x128xf32>, vector<8x128xf32> -> vector<8x256xf32>
    %66 = arith.truncf %65 : vector<8x256xf32> to vector<8x256xbf16>
    %cst_35 = arith.constant dense<0.000000e+00> : vector<8x512xf32>
    %67 = tpu.matmul %66, %59, %cst_35 {dimension_numbers = #tpu.dot_dimension_numbers<[1], [0], [0], [1], [0, 0, 1, 1], [], []>} : vector<8x256xbf16>, vector<256x512xbf16>, vector<8x512xf32> -> vector<8x512xf32>
    %68 = vector.broadcast %60 : vector<1x512xf32> to vector<8x512xf32>
    %69 = arith.addf %67, %68 : vector<8x512xf32>
    %70 = vector.extract_strided_slice %69 {offsets = [0, 0], sizes = [8, 128], strides = [1, 1]} : vector<8x512xf32> to vector<8x128xf32>
    %71 = arith.negf %70 : vector<8x128xf32>
    %72 = math.exp %71 : vector<8x128xf32>
    %cst_36 = arith.constant 1.000000e+00 : f32
    %73 = vector.broadcast %cst_36 : f32 to vector<8x128xf32>
    %74 = arith.addf %73, %72 : vector<8x128xf32>
    %75 = arith.divf %73, %74 : vector<8x128xf32>
    %76 = vector.extract_strided_slice %69 {offsets = [0, 128], sizes = [8, 128], strides = [1, 1]} : vector<8x512xf32> to vector<8x128xf32>
    %77 = arith.negf %76 : vector<8x128xf32>
    %78 = math.exp %77 : vector<8x128xf32>
    %cst_37 = arith.constant 1.000000e+00 : f32
    %79 = vector.broadcast %cst_37 : f32 to vector<8x128xf32>
    %80 = arith.addf %79, %78 : vector<8x128xf32>
    %81 = arith.divf %79, %80 : vector<8x128xf32>
    %82 = vector.extract_strided_slice %69 {offsets = [0, 256], sizes = [8, 128], strides = [1, 1]} : vector<8x512xf32> to vector<8x128xf32>
    %83 = math.tanh %82 : vector<8x128xf32>
    %84 = vector.extract_strided_slice %69 {offsets = [0, 384], sizes = [8, 128], strides = [1, 1]} : vector<8x512xf32> to vector<8x128xf32>
    %85 = arith.negf %84 : vector<8x128xf32>
    %86 = math.exp %85 : vector<8x128xf32>
    %cst_38 = arith.constant 1.000000e+00 : f32
    %87 = vector.broadcast %cst_38 : f32 to vector<8x128xf32>
    %88 = arith.addf %87, %86 : vector<8x128xf32>
    %89 = arith.divf %87, %88 : vector<8x128xf32>
    %90 = arith.mulf %81, %64 : vector<8x128xf32>
    %91 = arith.mulf %75, %83 : vector<8x128xf32>
    %92 = arith.addf %90, %91 : vector<8x128xf32>
    %93 = math.tanh %92 : vector<8x128xf32>
    %94 = arith.mulf %89, %93 : vector<8x128xf32>
    %c1_39 = arith.constant 1 : index
    %c0_40 = arith.constant 0 : index
    %c0_41 = arith.constant 0 : index
    %95 = vector.load %arg13[%c1_39, %c0_40, %c0_41] : memref<2x8x128xf32, #tpu.memory_space<vmem>>, vector<1x8x128xf32>
    %96 = vector.shape_cast %95 : vector<1x8x128xf32> to vector<8x128xf32>
    %97 = vector.shape_cast %94 : vector<8x128xf32> to vector<1x8x128xf32>
    tpu.vector_store %arg13[%c1_39, %c0_40, %c0_41], %97 {strides = array<i32>} : memref<2x8x128xf32, #tpu.memory_space<vmem>>, vector<1x8x128xf32>,
    %c1_42 = arith.constant 1 : index
    %c0_43 = arith.constant 0 : index
    %c0_44 = arith.constant 0 : index
    %98 = vector.load %arg14[%c1_42, %c0_43, %c0_44] : memref<2x8x128xf32, #tpu.memory_space<vmem>>, vector<1x8x128xf32>
    %99 = vector.shape_cast %98 : vector<1x8x128xf32> to vector<8x128xf32>
    %100 = vector.shape_cast %92 : vector<8x128xf32> to vector<1x8x128xf32>
    tpu.vector_store %arg14[%c1_42, %c0_43, %c0_44], %100 {strides = array<i32>} : memref<2x8x128xf32, #tpu.memory_space<vmem>>, vector<1x8x128xf32>,
    %101 = arith.truncf %94 : vector<8x128xf32> to vector<8x128xbf16>
    %c0_45 = arith.constant 0 : index
    %c0_46 = arith.constant 0 : index
    %102 = vector.load %arg6[%c0_45, %c0_46] : memref<128x256xbf16, #tpu.memory_space<vmem>>, vector<128x256xbf16>
    %cst_47 = arith.constant dense<0.000000e+00> : vector<8x256xf32>
    %103 = tpu.matmul %101, %102, %cst_47 {dimension_numbers = #tpu.dot_dimension_numbers<[1], [0], [0], [1], [0, 0, 1, 1], [], []>} : vector<8x128xbf16>, vector<128x256xbf16>, vector<8x256xf32> -> vector<8x256xf32>
    %c0_48 = arith.constant 0 : index
    %c0_49 = arith.constant 0 : index
    %104 = vector.load %arg7[%c0_48, %c0_49] : memref<1x256xf32, #tpu.memory_space<vmem>>, vector<1x256xf32>
    %105 = vector.broadcast %104 : vector<1x256xf32> to vector<8x256xf32>
    %106 = arith.addf %103, %105 : vector<8x256xf32>
    %c0_50 = arith.constant 0 : index
    %c0_51 = arith.constant 0 : index
    %c0_52 = arith.constant 0 : index
    %107 = vector.load %arg12[%c0_50, %c0_51, %c0_52] : memref<1x8x256xf32, #tpu.memory_space<vmem>>, vector<1x8x256xf32>
    %108 = vector.shape_cast %107 : vector<1x8x256xf32> to vector<8x256xf32>
    %109 = vector.shape_cast %106 : vector<8x256xf32> to vector<1x8x256xf32>
    tpu.vector_store %arg12[%c0_50, %c0_51, %c0_52], %109 {strides = array<i32>} : memref<1x8x256xf32, #tpu.memory_space<vmem>>, vector<1x8x256xf32>,
    %110 = tpu.iota {dimensions = array<i32: 1>} : vector<8x256xi32>
    %111 = arith.sitofp %110 : vector<8x256xi32> to vector<8x256xf32>
    %cst_53 = arith.constant dense<0xFF800000> : vector<8xf32>
    %112 = vector.multi_reduction <maximumf>, %106, %cst_53 [1] : vector<8x256xf32> to vector<8xf32>
    %113 = vector.shape_cast %112 : vector<8xf32> to vector<8x1xf32>
    %114 = vector.broadcast %113 : vector<8x1xf32> to vector<8x256xf32>
    %115 = arith.cmpf oge, %106, %114 : vector<8x256xf32>
    %cst_54 = arith.constant 2.560000e+02 : f32
    %116 = vector.broadcast %cst_54 : f32 to vector<8x256xf32>
    %117 = arith.select %115, %111, %116 : vector<8x256xi1>, vector<8x256xf32>
    %cst_55 = arith.constant dense<0x7F800000> : vector<8xf32>
    %118 = vector.multi_reduction <minimumf>, %117, %cst_55 [1] : vector<8x256xf32> to vector<8xf32>
    %119 = vector.shape_cast %118 : vector<8xf32> to vector<8x1xf32>
    %120 = vector.broadcast %119 : vector<8x1xf32> to vector<8x256xf32>
    %121 = arith.cmpf oeq, %111, %120 : vector<8x256xf32>
    %122 = arith.extui %121 : vector<8x256xi1> to vector<8x256xi32>
    %123 = arith.sitofp %122 : vector<8x256xi32> to vector<8x256xf32>
    %c0_56 = arith.constant 0 : index
    %c0_57 = arith.constant 0 : index
    %124 = vector.load %arg5[%c0_56, %c0_57] : memref<256x128xf32, #tpu.memory_space<vmem>>, vector<256x128xf32>
    %cst_58 = arith.constant dense<0.000000e+00> : vector<8x128xf32>
    %125 = tpu.matmul %123, %124, %cst_58 {dimension_numbers = #tpu.dot_dimension_numbers<[1], [0], [0], [1], [0, 0, 1, 1], [], []>} : vector<8x256xf32>, vector<256x128xf32>, vector<8x128xf32> -> vector<8x128xf32>
    %c0_59 = arith.constant 0 : index
    %c0_60 = arith.constant 0 : index
    %126 = vector.load %arg15[%c0_59, %c0_60] : memref<8x128xf32, #tpu.memory_space<vmem>>, vector<8x128xf32>
    tpu.vector_store %arg15[%c0_59, %c0_60], %125 {strides = array<i32>} : memref<8x128xf32, #tpu.memory_space<vmem>>, vector<8x128xf32>,
    return
  }
  func.func @transform_0(%arg0: i32, %arg1: memref<7xi32, #tpu.memory_space<smem>>) -> (i32, i32, i32) {
    %c0_i32 = arith.constant 0 : i32
    %c0_i32_0 = arith.constant 0 : i32
    %c0_i32_1 = arith.constant 0 : i32
    return %arg0, %c0_i32, %c0_i32_0 : i32, i32, i32
  }
  func.func @transform_1(%arg0: i32, %arg1: memref<7xi32, #tpu.memory_space<smem>>) -> (i32, i32, i32) {
    %c0_i32 = arith.constant 0 : i32
    %c0_i32_0 = arith.constant 0 : i32
    %c0_i32_1 = arith.constant 0 : i32
    %c0_i32_2 = arith.constant 0 : i32
    return %c0_i32, %c0_i32_0, %c0_i32_1 : i32, i32, i32
  }
  func.func @transform_2(%arg0: i32, %arg1: memref<7xi32, #tpu.memory_space<smem>>) -> (i32, i32, i32) {
    %c0_i32 = arith.constant 0 : i32
    %c0_i32_0 = arith.constant 0 : i32
    %c0_i32_1 = arith.constant 0 : i32
    %c0_i32_2 = arith.constant 0 : i32
    return %c0_i32, %c0_i32_0, %c0_i32_1 : i32, i32, i32
  }
  func.func @transform_3(%arg0: i32, %arg1: memref<7xi32, #tpu.memory_space<smem>>) -> (i32, i32) {
    %c0_i32 = arith.constant 0 : i32
    %c0_i32_0 = arith.constant 0 : i32
    %c0_i32_1 = arith.constant 0 : i32
    return %c0_i32, %c0_i32_0 : i32, i32
  }
  func.func @transform_4(%arg0: i32, %arg1: memref<7xi32, #tpu.memory_space<smem>>) -> (i32, i32) {
    %c0_i32 = arith.constant 0 : i32
    %c0_i32_0 = arith.constant 0 : i32
    %c0_i32_1 = arith.constant 0 : i32
    return %c0_i32, %c0_i32_0 : i32, i32
  }
  func.func @transform_5(%arg0: i32, %arg1: memref<7xi32, #tpu.memory_space<smem>>) -> (i32, i32) {
    %c0_i32 = arith.constant 0 : i32
    %c0_i32_0 = arith.constant 0 : i32
    %c0_i32_1 = arith.constant 0 : i32
    return %c0_i32, %c0_i32_0 : i32, i32
  }
  func.func @transform_6(%arg0: i32, %arg1: memref<7xi32, #tpu.memory_space<smem>>) -> (i32, i32) {
    %c0_i32 = arith.constant 0 : i32
    %c0_i32_0 = arith.constant 0 : i32
    %c0_i32_1 = arith.constant 0 : i32
    return %c0_i32, %c0_i32_0 : i32, i32
  }
  func.func @transform_7(%arg0: i32, %arg1: memref<7xi32, #tpu.memory_space<smem>>) -> (i32, i32) {
    %c0_i32 = arith.constant 0 : i32
    %c0_i32_0 = arith.constant 0 : i32
    %c0_i32_1 = arith.constant 0 : i32
    return %c0_i32, %c0_i32_0 : i32, i32
  }
  func.func @transform_8(%arg0: i32, %arg1: memref<7xi32, #tpu.memory_space<smem>>) -> (i32, i32) {
    %c0_i32 = arith.constant 0 : i32
    %c0_i32_0 = arith.constant 0 : i32
    %c0_i32_1 = arith.constant 0 : i32
    return %c0_i32, %c0_i32_0 : i32, i32
  }
  func.func @transform_9(%arg0: i32, %arg1: memref<7xi32, #tpu.memory_space<smem>>) -> (i32, i32) {
    %c0_i32 = arith.constant 0 : i32
    %c0_i32_0 = arith.constant 0 : i32
    %c0_i32_1 = arith.constant 0 : i32
    return %c0_i32, %c0_i32_0 : i32, i32
  }
  func.func @transform_10(%arg0: i32, %arg1: memref<7xi32, #tpu.memory_space<smem>>) -> (i32, i32, i32) {
    %c0_i32 = arith.constant 0 : i32
    %c0_i32_0 = arith.constant 0 : i32
    %c0_i32_1 = arith.constant 0 : i32
    return %arg0, %c0_i32, %c0_i32_0 : i32, i32, i32
  }
}

</mosaic_0001>

<bundles_post_ra>
// kernel: _hier_forward_jit.4
= control target key start
LH: loop header
LB: loop body
LE: loop exit
PB: predicated region body
PF: predicated region fallthrough
CT: control target
= control target key end

     0   :  { %12 = vsyncpa [#allocation5], 0  ;;  %s2647_s0 = inlined_call_operand.hbm [shape: f32[4,8,128], index: 0, kind: input, shape index: {}]   ;;  %s2648_s1 = inlined_call_operand.hbm [shape: bf16[256,512], index: 1, kind: input, shape index: {}]   ;;  %s2649_s2 = inlined_call_operand.hbm [shape: f32[1,512], index: 2, kind: input, shape index: {}]   ;;  %s2650_s3 = inlined_call_operand.hbm [shape: bf16[256,512], index: 3, kind: input, shape index: {}]   ;;  %s2651_s4 = inlined_call_operand.hbm [shape: f32[1,512], index: 4, kind: input, shape index: {}]   ;;  %s2652_s5 = inlined_call_operand.hbm [shape: f32[2,8,128], index: 5, kind: output, shape index: {0}]   ;;  %s2653_s6 = inlined_call_operand.hbm [shape: f32[2,8,128], index: 6, kind: output, shape index: {1}]  }
   0x1   :  { %14 = vsyncpa [#allocation5 + $0x1], 0 }
   0x2   :  { %15 = vsyncpa [#allocation8], 0 }
   0x3   :  { %16 = vsyncpa [#allocation11], 0 }
   0x4   :  { %17 = vsyncpa [#allocation6], 0 }
   0x5   :  { %18 = vsyncpa [#allocation15], 0  ;;  %s2336_s21 = smov 0   ;;  %s2338_s22 = smov 0  }
   0x6   :  { %s2340_s23 = smov 0   ;;  %s2342_s24 = smov 0  }
   0x7   :  { %s2344_s25 = smov 0   ;;  %s2346_s26 = smov 0  }
   0x8 LB: > { %s2654_s27 = sadd.s32 4294967295, %s2287_s26   ;;  %p1532_p0 = scmp.ge.s32.totalorder %s2287_s26, 1  ;;  %s2287_s26 = sphi %s2346_s26, %s24_s26   ;;  %s2283_s25 = sphi %s2344_s25, %s2674_s25   ;;  %s2279_s24 = sphi %s2342_s24, %s2673_s24   ;;  %s2275_s23 = sphi %s2340_s23, %s2672_s23   ;;  %s2271_s22 = sphi %s2338_s22, %s2671_s22   ;;  %s2267_s21 = sphi %s2336_s21, %s2670_s21  }
   0x9   : > { %p2370_p1 = scmp.eq.s32.totalorder %s2654_s27, 0  ;;  %p205_p2 = scmp.lt.s32.totalorder %s2287_s26, 5 }
   0xa   : > { %s2289_s30 = smov [#allocation7]   ;;  %s2290_s9 = smov [#allocation10]  }
   0xb   : > { %s2658_s28 = scalar_select %p2370_p1, 1, 0 }
   0xc   : > { %p2375_p3 = pnand %p1532_p0, %p205_p2  ;;  %s217_s7 = sshll.u32 %s2289_s30, 4  ;;  %s2379_s7 = int_to_ptr.vmem [resolvable:$true] %s217_s7 }
   0xd   : > { %s241_s10 = sshll.u32 %s2290_s9, 4  ;;  %s2291_s11 = smov [#allocation9]   ;;  %s2389_s10 = int_to_ptr.vmem [resolvable:$true] %s241_s10 }
   0xe   : > { %s2659_s29 = scalar_select %p2375_p3, 1, 0 }
   0xf   : > { %p1714_p4 = pneg %p2375_p3  ;;  %s2391_s12 = sshll.u32 %s2291_s11, 4  ;;  %s232_s12 = int_to_ptr.vmem [resolvable:$true] %s2391_s12 }
  0x10   : > { %s2027_s15 = scalar_lea.hbm %s2648_s1, 8192 }
  0x11   : > { %p2385_p5 = pnand %p1714_p4, %p2370_p1  ;;  %p2028_p6 = scmp.ne.s32.totalorder %s2648_s1, %s2027_s15 }
  0x12   : > { %p2034_p10 = scmp.lt.u32.totalorder %s2027_s15, %s2648_s1 }
  0x13   : > { %p2401_p7 = pneg %p2385_p5 }
  0x15   : > { %p2030_p8 = pnand %p2401_p7, %p2028_p6 }
  0x17   : > { %p2031_p9 = pneg %p2030_p8 }
  0x19   : > { %p2036_p11 = pnand %p2034_p10, %p2031_p9 }
  0x1b   : > { %2039 = shalt.err (!%p2036_p11)
}
  0x1c   : > { %s2040_s30 = scalar_lea.vmem %s2379_s7, 8192  ;;  %p2048_p2 = scmp.lt.s32.totalorder %s2379_s7, %s2379_s7 }
  0x1d   : > { %p2041_p12 = scmp.ne.s32.totalorder %s2379_s7, %s2040_s30  ;;  %p2049_p4 = scmp.lt.s32.totalorder %s2040_s30, %s2040_s30 }
  0x1f   : > { %p2043_p13 = pnand %p2041_p12, %p2401_p7  ;;  %p2050_p6 = por %p2049_p4, %p2048_p2 }
  0x21   : > { %p2044_p0 = pneg %p2043_p13 }
  0x23   : > { %p2051_p8 = pnand %p2050_p6, %p2044_p0 }
  0x25   : > { %2054 = shalt.err (!%p2051_p8)
}
  0x26   : > { %s2292_s9 = smov 256   ;;  %s2293_s11 = smov 16  }
  0x27   : > { %1717 = dma.hbm_to_vmem [thread:$0]  (!%p2385_p5), %s2648_s1, 8192, %s2379_s7, [#allocation8], %s2292_s9, %s2292_s9, %s2293_s11  }
  0x28   : > { %s2055_s17 = scalar_lea.hbm %s2650_s3, 8192 }
  0x29   : > { %p2056_p9 = scmp.ne.s32.totalorder %s2650_s3, %s2055_s17  ;;  %p2062_p12 = scmp.lt.u32.totalorder %s2055_s17, %s2650_s3 }
  0x2b   : > { %p2058_p10 = pnand %p2056_p9, %p2401_p7 }
  0x2d   : > { %p2059_p11 = pneg %p2058_p10 }
  0x2f   : > { %p2064_p13 = pnand %p2062_p12, %p2059_p11 }
  0x31   : > { %2067 = shalt.err (!%p2064_p13)
}
  0x32   : > { %s2068_s7 = scalar_lea.vmem %s2389_s10, 8192  ;;  %p2076_p6 = scmp.lt.s32.totalorder %s2389_s10, %s2389_s10 }
  0x33   : > { %p2069_p0 = scmp.ne.s32.totalorder %s2389_s10, %s2068_s7  ;;  %p2077_p8 = scmp.lt.s32.totalorder %s2068_s7, %s2068_s7 }
  0x35   : > { %p2071_p2 = pnand %p2069_p0, %p2401_p7  ;;  %p2078_p9 = por %p2077_p8, %p2076_p6 }
  0x37   : > { %p2072_p4 = pneg %p2071_p2 }
  0x39   : > { %p2079_p10 = pnand %p2078_p9, %p2072_p4 }
  0x3b   : > { %2082 = shalt.err (!%p2079_p10)
}
  0x3c   : > { %1723 = dma.hbm_to_vmem [thread:$0]  (!%p2385_p5), %s2650_s3, 8192, %s2389_s10, [#allocation11], %s2292_s9, %s2292_s9, %s2293_s11  }
  0x3d   : > { %s2083_s16 = scalar_lea.hbm %s2649_s2, 64 }
  0x3e   : > { %p2084_p11 = scmp.ne.s32.totalorder %s2649_s2, %s2083_s16  ;;  %p2090_p0 = scmp.lt.u32.totalorder %s2083_s16, %s2649_s2 }
  0x40   : > { %p2086_p12 = pnand %p2084_p11, %p2401_p7 }
  0x42   : > { %p2087_p13 = pneg %p2086_p12 }
  0x44   : > { %p2092_p2 = pnand %p2090_p0, %p2087_p13 }
  0x46   : > { %2095 = shalt.err (!%p2092_p2)
}
  0x47   : > { %s2096_s7 = scalar_lea.vmem %s232_s12, 64  ;;  %p2104_p9 = scmp.lt.s32.totalorder %s232_s12, %s232_s12 }
  0x48   : > { %p2097_p4 = scmp.ne.s32.totalorder %s232_s12, %s2096_s7  ;;  %p2105_p10 = scmp.lt.s32.totalorder %s2096_s7, %s2096_s7 }
  0x4a   : > { %p2099_p6 = pnand %p2097_p4, %p2401_p7  ;;  %p2106_p3 = por %p2105_p10, %p2104_p9 }
  0x4c   : > { %p2100_p8 = pneg %p2099_p6 }
  0x4e   : > { %p2107_p1 = pnand %p2106_p3, %p2100_p8 }
  0x50   : > { %2110 = shalt.err (!%p2107_p1)
}
  0x51   : > { %1720 = dma.hbm_to_vmem [thread:$0]  (!%p2385_p5), %s2649_s2, 64, %s232_s12, [#allocation8]  }
  0x52   : > { %s2294_s11 = smov [#allocation12]   ;;  %s2111_s15 = scalar_lea.hbm %s2651_s4, 64 }
  0x53   : > { %s255_s27 = sshll.u32 %s2294_s11, 4  ;;  %p2112_p11 = scmp.ne.s32.totalorder %s2651_s4, %s2111_s15  ;;  %s256_s27 = int_to_ptr.vmem [resolvable:$true] %s255_s27 }
  0x54   : > { %p2118_p12 = scmp.lt.u32.totalorder %s2111_s15, %s2651_s4 }
  0x55   : > { %p2114_p1 = pnand %p2112_p11, %p2401_p7 }
  0x57   : > { %p2115_p3 = pneg %p2114_p1 }
  0x59   : > { %p2120_p13 = pnand %p2118_p12, %p2115_p3 }
  0x5b   : > { %2123 = shalt.err (!%p2120_p13)
}
  0x5c   : > { %s2124_s12 = scalar_lea.vmem %s256_s27, 64  ;;  %p2132_p6 = scmp.lt.s32.totalorder %s256_s27, %s256_s27 }
  0x5d   : > { %p2125_p0 = scmp.ne.s32.totalorder %s256_s27, %s2124_s12  ;;  %p2133_p8 = scmp.lt.s32.totalorder %s2124_s12, %s2124_s12 }
  0x5f   : > { %p2127_p2 = pnand %p2125_p0, %p2401_p7  ;;  %p2134_p9 = por %p2133_p8, %p2132_p6 }
  0x61   : > { %p2128_p4 = pneg %p2127_p2 }
  0x63   : > { %p2135_p10 = pnand %p2134_p9, %p2128_p4 }
  0x65   : > { %2138 = shalt.err (!%p2135_p10)
}
  0x66   : > { %1726 = dma.hbm_to_vmem [thread:$0]  (!%p2385_p5), %s2651_s4, 64, %s256_s27, [#allocation11]  }
  0x67   : > { %s33_s18 = sadd.s32 1, %s2283_s25  ;;  %s45_s10 = sadd.s32 1, %s2275_s23 }
  0x68   : > { %p34_p7 = scmp.ge.s32.totalorder %s33_s18, 4  ;;  %p52_p11 = scmp.ne.s32.totalorder %s2275_s23, %s2271_s22 }
  0x69   : > { %p53_p1 = scmp.eq.s32.totalorder %s2287_s26, 0  ;;  %p58_p3 = scmp.ne.s32.totalorder %s2271_s22, %s2267_s21 }
  0x6a   : > { %s2676_s18 = smov (%p34_p7, %s33_s18), 0  ;;  %p2663_p13 = scmp.ne.s32.totalorder %s2658_s28, 0 }
  0x6b   : > { %p2491_p12 = por %p53_p1, %p52_p11  ;;  %s40_s11 = ssub.s32 %s2283_s25, %s2676_s18 }
  0x6c   : > { %p2497_p0 = por %p2663_p13, %p58_p3  ;;  %p1735_p5 = scmp.lt.s32.totalorder %s2287_s26, 4 }
  0x6d   : > { %p43_p2 = scmp.eq.s32.totalorder %s40_s11, 0  ;;  %s266_s27 = sand.u32 1, %s2275_s23  }
  0x6e   : > { %s1538_s13 = sshll.u32 %s266_s27, 3  ;;  %s1539_s21 = sshll.u32 %s2283_s25, 7 }
  0x6f   : > { %s2506_s14 = scalar_select %p43_p2, %s2275_s23, %s45_s10  }
  0x70   : > { %s2512_s17 = scalar_lea.hbm %s2647_s0, %s1539_s21  ;;  %s270_s19 = scalar_lea.vmem [#allocation4], %s1538_s13 }
  0x71   : > { %s278_s20 = sshll.u32 %s270_s19, 4  ;;  %p2518_p4 = pnand %p1735_p5, %p2491_p12  ;;  %s2514_s20 = int_to_ptr.vmem [resolvable:$true] %s278_s20 }
  0x72   : > { %s267_s30 = scalar_lea.sflag [#allocation5], %s266_s27  ;;  %s2139_s7 = scalar_lea.hbm %s2512_s17, 128 }
  0x73   : > { %p2140_p6 = scmp.ne.s32.totalorder %s2512_s17, %s2139_s7  ;;  %p2141_p8 = pneg %p2518_p4 }
  0x74   : > { %s2144_s13 = scalar_lea.hbm %s2647_s0, 512  ;;  %p2145_p7 = scmp.lt.u32.totalorder %s2512_s17, %s2647_s0 }
  0x75   : > { %p2142_p9 = pnand %p2141_p8, %p2140_p6  ;;  %p2146_p11 = scmp.lt.u32.totalorder %s2144_s13, %s2139_s7 }
  0x76   : > { %p2148_p3 = scmp.lt.u32.totalorder %s2139_s7, %s2512_s17 }
  0x77   : > { %p2143_p10 = pneg %p2142_p9  ;;  %p2147_p1 = por %p2146_p11, %p2145_p7 }
  0x79   : > { %p2149_p12 = por %p2148_p3, %p2147_p1 }
  0x7b   : > { %p2150_p13 = pnand %p2149_p12, %p2143_p10 }
  0x7d   : > { %2153 = shalt.err (!%p2150_p13)
}
  0x7e   : > { %s2154_s27 = scalar_lea.vmem %s2514_s20, 128  ;;  %s2295_s15 = smov [#allocation4]  }
  0x7f   : > { %p2155_p5 = scmp.ne.s32.totalorder %s2514_s20, %s2154_s27  ;;  %s2159_s16 = sshll.u32 %s2295_s15, 4  ;;  %s2160_s16 = int_to_ptr.vmem [resolvable:$false] %s2159_s16 }
  0x80   : > { %s2161_s19 = scalar_lea.vmem %s2160_s16, 256  ;;  %p2162_p9 = scmp.lt.s32.totalorder %s2514_s20, %s2160_s16 }
  0x81   : > { %p2157_p2 = pnand %p2155_p5, %p2141_p8  ;;  %p2163_p7 = scmp.lt.s32.totalorder %s2161_s19, %s2154_s27 }
  0x83   : > { %p2158_p6 = pneg %p2157_p2  ;;  %p2164_p11 = por %p2163_p7, %p2162_p9 }
  0x85   : > { %p2165_p1 = pnand %p2164_p11, %p2158_p6 }
  0x87   : > { %2168 = shalt.err (!%p2165_p1)
}
  0x88   : > { %1730 = dma.hbm_to_vmem [thread:$0]  (!%p2518_p4), %s2512_s17, 128, %s2514_s20, %s267_s30  }
  0x89   : > { %p2666_p10 = scmp.ne.s32.totalorder %s2659_s29, 0 }
  0x8a   : > { %s289_s7 = sand.u32 (!%p2666_p10), 1, %s2271_s22  }
  0x8b   : > { %287 = sbr.rel (%p2666_p10) target bundleno = 804 (0x324), region = 40  ;;  %s2550_s10 = sshll.u32 (!%p2666_p10), %s289_s7, 3 }
  0x8c   : > { %s290_s11 = scalar_lea.sflag (!%p2666_p10), [#allocation5], %s289_s7  ;;  %s293_s13 = scalar_lea.vmem (!%p2666_p10), [#allocation4], %s2550_s10 }
  0x92   : > { %2246 = dma.done.wait (%p2497_p0), %s290_s11, 128  }
  0x93   : > { %2248 = vsyncadd (%p2497_p0), %s290_s11, 4294967168  ;;  %p2667_p8 = scmp.ne.s32.totalorder %s2658_s28, 0 }
  0x95   : > { %2250 = dma.done.wait (%p2667_p8), [#allocation8], 8256  }
  0x96   : > { %2252 = vsyncadd (%p2667_p8), [#allocation8], 4294959040 }
  0x97   : > { %2254 = dma.done.wait (%p2667_p8), [#allocation11], 8256  }
  0x98   : > { %2256 = vsyncadd (%p2667_p8), [#allocation11], 4294959040  ;;  %p1546_p4 = scmp.ne.s32.totalorder %s2279_s24, 0 }
  0x99   : > { %v2296_v0 = vmov (!%p1546_p4), 0.0  }
  0x9a   : > { %336 = sbr.rel (%p1546_p4) target bundleno = 161 (0xa1), region = 64  ;;  %337 = vst [vmem:[#allocation2] sm:$0xff] (!%p1546_p4), %v2296_v0  ;;  %338 = vst [vmem:[#allocation2 + $0x8] sm:$0xff] (!%p1546_p4), %v2296_v0 }
  0x9b   : > { %339 = vst [vmem:[#allocation3] sm:$0xff] (!%p1546_p4), %v2296_v0  ;;  %340 = vst [vmem:[#allocation3 + $0x8] sm:$0xff] (!%p1546_p4), %v2296_v0 }
  0xa1 PF: > { %v1803_v1 = vld [vmem:[#allocation7 + $0x4] ss:$16 sps:$4 sm:$0xff]   ;;  %v1805_v2 = vld [vmem:[#allocation7] ss:$16 sps:$4 sm:$0xff]   ;;  %v1814_v6 = vld [vmem:[#allocation7 + $0xc] ss:$16 sps:$4 sm:$0xff]  }
  0xa2   : > { %752 = vmatprep.subr.bf16.mxu0 %v1803_v1  ;;  %v1806_v3 = vld [vmem:[#allocation7 + $0x24] ss:$16 sps:$4 sm:$0xff]   ;;  %v1808_v4 = vld [vmem:[#allocation7 + $0x20] ss:$16 sps:$4 sm:$0xff]   ;;  %v1817_v7 = vld [vmem:[#allocation7 + $0x8] ss:$16 sps:$4 sm:$0xff]   ;;  %793 = vmatprep.subr.bf16.mxu1 %v1814_v6 }
  0xa3   : > { %753 = vmatpush1.bf16.msra.mxu0 %v1805_v2  ;;  %v1809_v5 = vld [vmem:[#allocation7 + $0x44] ss:$16 sps:$4 sm:$0xff]   ;;  %v1811_v8 = vld [vmem:[#allocation7 + $0x40] ss:$16 sps:$4 sm:$0xff]   ;;  %794 = vmatpush1.bf16.msra.mxu1 %v1817_v7  ;;  %v1820_v10 = vld [vmem:[#allocation7 + $0x2c] ss:$16 sps:$4 sm:$0xff]  }
  0xa4   : > { %754 = vmatprep.subr.bf16.mxu0 %v1806_v3  ;;  %v1812_v9 = vld [vmem:[#allocation7 + $0x64] ss:$16 sps:$4 sm:$0xff]   ;;  %v1823_v11 = vld [vmem:[#allocation7 + $0x28] ss:$16 sps:$4 sm:$0xff]   ;;  %795 = vmatprep.subr.bf16.mxu1 %v1820_v10  ;;  %v1816_v12 = vld [vmem:[#allocation7 + $0x60] ss:$16 sps:$4 sm:$0xff]  }
  0xa5   : > { %v1818_v13 = vld [vmem:[#allocation7 + $0x84] ss:$16 sps:$4 sm:$0xff]   ;;  %v1826_v14 = vld [vmem:[#allocation7 + $0x4c] ss:$16 sps:$4 sm:$0xff]   ;;  %v1829_v15 = vld [vmem:[#allocation7 + $0x48] ss:$16 sps:$4 sm:$0xff]  }
  0xa6   : > { %v1832_v16 = vld [vmem:[#allocation7 + $0x6c] ss:$16 sps:$4 sm:$0xff]   ;;  %v1822_v17 = vld [vmem:[#allocation7 + $0x80] ss:$16 sps:$4 sm:$0xff]   ;;  %v1824_v18 = vld [vmem:[#allocation7 + $0xa4] ss:$16 sps:$4 sm:$0xff]  }
  0xa7   : > { %755 = vmatpush1.bf16.msra.mxu0 %v1808_v4  ;;  %796 = vmatpush1.bf16.msra.mxu1 %v1823_v11  ;;  %v1835_v19 = vld [vmem:[#allocation7 + $0x68] ss:$16 sps:$4 sm:$0xff]   ;;  %v1838_v20 = vld [vmem:[#allocation7 + $0x8c] ss:$16 sps:$4 sm:$0xff]   ;;  %v1828_v21 = vld [vmem:[#allocation7 + $0xa0] ss:$16 sps:$4 sm:$0xff]  }
  0xa8   : > { %756 = vmatprep.subr.bf16.mxu0 %v1809_v5  ;;  %797 = vmatprep.subr.bf16.mxu1 %v1826_v14  ;;  %v1830_v22 = vld [vmem:[#allocation7 + $0xc4] ss:$16 sps:$4 sm:$0xff]   ;;  %v1841_v23 = vld [vmem:[#allocation7 + $0x88] ss:$16 sps:$4 sm:$0xff]   ;;  %v1844_v24 = vld [vmem:[#allocation7 + $0xac] ss:$16 sps:$4 sm:$0xff]  }
  0xa9   : > { %v1834_v25 = vld [vmem:[#allocation7 + $0xc0] ss:$16 sps:$4 sm:$0xff]   ;;  %v1836_v26 = vld [vmem:[#allocation7 + $0xe4] ss:$16 sps:$4 sm:$0xff]   ;;  %v1847_v27 = vld [vmem:[#allocation7 + $0xa8] ss:$16 sps:$4 sm:$0xff]  }
  0xaa   : > { %v1850_v28 = vld [vmem:[#allocation7 + $0xcc] ss:$16 sps:$4 sm:$0xff]   ;;  %v1840_v29 = vld [vmem:[#allocation7 + $0xe0] ss:$16 sps:$4 sm:$0xff]   ;;  %v1842_v30 = vld [vmem:[#allocation7 + $0x104] ss:$16 sps:$4 sm:$0xff]  }
  0xab   : > { %757 = vmatpush1.bf16.msra.mxu0 %v1811_v8  ;;  %798 = vmatpush1.bf16.msra.mxu1 %v1829_v15  ;;  %v1853_v31 = vld [vmem:[#allocation7 + $0xc8] ss:$16 sps:$4 sm:$0xff]   ;;  %v1856_v32 = vld [vmem:[#allocation7 + $0xec] ss:$16 sps:$4 sm:$0xff]   ;;  %v1846_v33 = vld [vmem:[#allocation7 + $0x100] ss:$16 sps:$4 sm:$0xff]  }
  0xac   : > { %758 = vmatprep.subr.bf16.mxu0 %v1812_v9  ;;  %799 = vmatprep.subr.bf16.mxu1 %v1832_v16  ;;  %v1848_v34 = vld [vmem:[#allocation7 + $0x124] ss:$16 sps:$4 sm:$0xff]   ;;  %v1859_v35 = vld [vmem:[#allocation7 + $0xe8] ss:$16 sps:$4 sm:$0xff]   ;;  %v1862_v36 = vld [vmem:[#allocation7 + $0x10c] ss:$16 sps:$4 sm:$0xff]  }
  0xad   : > { %v1852_v37 = vld [vmem:[#allocation7 + $0x120] ss:$16 sps:$4 sm:$0xff]   ;;  %v1854_v38 = vld [vmem:[#allocation7 + $0x144] ss:$16 sps:$4 sm:$0xff]   ;;  %v1865_v39 = vld [vmem:[#allocation7 + $0x108] ss:$16 sps:$4 sm:$0xff]  }
  0xae   : > { %v1868_v40 = vld [vmem:[#allocation7 + $0x12c] ss:$16 sps:$4 sm:$0xff]   ;;  %v407_v41 = vld [vmem:[#allocation2] sm:$0xff]  ;;  %v1871_v45 = vld [vmem:[#allocation7 + $0x128] ss:$16 sps:$4 sm:$0xff]   ;;  %p1681_p0 = scmp.ne.s32.totalorder %s2279_s24, 3 }
  0xaf   : > { %759 = vmatpush1.bf16.msra.mxu0 %v1816_v12  ;;  %800 = vmatpush1.bf16.msra.mxu1 %v1835_v19  ;;  %v1858_v42 = vld [vmem:[#allocation7 + $0x140] ss:$16 sps:$4 sm:$0xff]   ;;  %v410_v43 = vpack.c.bf16 %v407_v41, %v407_v41  ;;  %v1860_v44 = vld [vmem:[#allocation7 + $0x164] ss:$16 sps:$4 sm:$0xff]   ;;  %v1874_v46 = vld [vmem:[#allocation7 + $0x14c] ss:$16 sps:$4 sm:$0xff]  }
  0xb0   : > { %760 = vmatprep.subr.bf16.mxu0 %v1818_v13  ;;  %801 = vmatprep.subr.bf16.mxu1 %v1838_v20  ;;  %v1864_v47 = vld [vmem:[#allocation7 + $0x160] ss:$16 sps:$4 sm:$0xff]   ;;  %v1866_v48 = vld [vmem:[#allocation7 + $0x184] ss:$16 sps:$4 sm:$0xff]   ;;  %v1877_v49 = vld [vmem:[#allocation7 + $0x148] ss:$16 sps:$4 sm:$0xff]  }
  0xb1   : > { %784 = vmatprep.mubr.bf16.mxu0 %v410_v43  ;;  %825 = vmatprep.mubr.bf16.mxu1 %v410_v43  ;;  %v1880_v50 = vld [vmem:[#allocation7 + $0x16c] ss:$16 sps:$4 sm:$0xff]   ;;  %v1870_v51 = vld [vmem:[#allocation7 + $0x180] ss:$16 sps:$4 sm:$0xff]   ;;  %v1872_v52 = vld [vmem:[#allocation7 + $0x1a4] ss:$16 sps:$4 sm:$0xff]  }
  0xb2   : > { %v1883_v53 = vld [vmem:[#allocation7 + $0x168] ss:$16 sps:$4 sm:$0xff]   ;;  %v1886_v54 = vld [vmem:[#allocation7 + $0x18c] ss:$16 sps:$4 sm:$0xff]   ;;  %v1876_v55 = vld [vmem:[#allocation7 + $0x1a0] ss:$16 sps:$4 sm:$0xff]  }
  0xb3   : > { %761 = vmatpush1.bf16.msra.mxu0 %v1822_v17  ;;  %802 = vmatpush1.bf16.msra.mxu1 %v1841_v23  ;;  %v1878_v56 = vld [vmem:[#allocation7 + $0x1c4] ss:$16 sps:$4 sm:$0xff]   ;;  %v1889_v57 = vld [vmem:[#allocation7 + $0x188] ss:$16 sps:$4 sm:$0xff]   ;;  %v1882_v58 = vld [vmem:[#allocation7 + $0x1c0] ss:$16 sps:$4 sm:$0xff]  }
  0xb4   : > { %762 = vmatprep.subr.bf16.mxu0 %v1824_v18  ;;  %803 = vmatprep.subr.bf16.mxu1 %v1844_v24  ;;  %v1890_v59 = vld [vmem:[#allocation7 + $0x1ac] ss:$16 sps:$4 sm:$0xff]   ;;  %v1884_v60 = vld [vmem:[#allocation7 + $0x1e4] ss:$16 sps:$4 sm:$0xff]   ;;  %v1892_v61 = vld [vmem:[#allocation7 + $0x1a8] ss:$16 sps:$4 sm:$0xff]  }
  0xb5   : > { %v1893_v62 = vld [vmem:[#allocation7 + $0x1cc] ss:$16 sps:$4 sm:$0xff]   ;;  %v1888_v63 = vld [vmem:[#allocation7 + $0x1e0] ss:$16 sps:$4 sm:$0xff]   ;;  %v1895_v1 = vld [vmem:[#allocation7 + $0x1c8] ss:$16 sps:$4 sm:$0xff]  }
  0xb6   : > { %v341_v0 = vld [vmem:[%s293_s13] sm:$0xff] }
  0xb7   : > { %763 = vmatpush1.bf16.msra.mxu0 %v1828_v21  ;;  %804 = vmatpush1.bf16.msra.mxu1 %v1847_v27  ;;  %v1901_v2 = vld [vmem:[#allocation10 + $0x4] ss:$16 sps:$4 sm:$0xff]   ;;  %v1896_v3 = vld [vmem:[#allocation7 + $0x1ec] ss:$16 sps:$4 sm:$0xff]   ;;  %v1899_v4 = vld [vmem:[#allocation10] ss:$16 sps:$4 sm:$0xff]   ;;  %v409_v5 = vpack.c.bf16 %v341_v0, %v341_v0 }
  0xb8   : > { %764 = vmatprep.subr.bf16.mxu0 %v1830_v22  ;;  %805 = vmatprep.subr.bf16.mxu1 %v1850_v28  ;;  %v1898_v6 = vld [vmem:[#allocation7 + $0x1e8] ss:$16 sps:$4 sm:$0xff]   ;;  %v1904_v8 = vld [vmem:[#allocation10 + $0xc] ss:$16 sps:$4 sm:$0xff]   ;;  %v1905_v9 = vld [vmem:[#allocation10 + $0x20] ss:$16 sps:$4 sm:$0xff]  }
  0xb9   : > { %v1907_v7 = vld [vmem:[#allocation10 + $0x24] ss:$16 sps:$4 sm:$0xff]   ;;  %v1902_v10 = vld [vmem:[#allocation10 + $0x8] ss:$16 sps:$4 sm:$0xff]   ;;  %v1910_v12 = vld [vmem:[#allocation10 + $0x2c] ss:$16 sps:$4 sm:$0xff]  }
  0xba   : > { %v1913_v11 = vld [vmem:[#allocation10 + $0x44] ss:$16 sps:$4 sm:$0xff]   ;;  %v1911_v13 = vld [vmem:[#allocation10 + $0x40] ss:$16 sps:$4 sm:$0xff]   ;;  %v1908_v14 = vld [vmem:[#allocation10 + $0x28] ss:$16 sps:$4 sm:$0xff]  }
  0xbb   : > { %765 = vmatpush1.bf16.msra.mxu0 %v1834_v25  ;;  %806 = vmatpush1.bf16.msra.mxu1 %v1853_v31  ;;  %v1919_v15 = vld [vmem:[#allocation10 + $0x64] ss:$16 sps:$4 sm:$0xff]   ;;  %v1916_v16 = vld [vmem:[#allocation10 + $0x4c] ss:$16 sps:$4 sm:$0xff]   ;;  %v1917_v17 = vld [vmem:[#allocation10 + $0x60] ss:$16 sps:$4 sm:$0xff]  }
  0xbc   : > { %766 = vmatprep.subr.bf16.mxu0 %v1836_v26  ;;  %807 = vmatprep.subr.bf16.mxu1 %v1856_v32  ;;  %v1914_v18 = vld [vmem:[#allocation10 + $0x48] ss:$16 sps:$4 sm:$0xff]   ;;  %v1922_v19 = vld [vmem:[#allocation10 + $0x6c] ss:$16 sps:$4 sm:$0xff]   ;;  %v1925_v21 = vld [vmem:[#allocation10 + $0x84] ss:$16 sps:$4 sm:$0xff]  }
  0xbd   : > { %v1920_v20 = vld [vmem:[#allocation10 + $0x68] ss:$16 sps:$4 sm:$0xff]   ;;  %v1928_v22 = vld [vmem:[#allocation10 + $0x8c] ss:$16 sps:$4 sm:$0xff]   ;;  %v1923_v23 = vld [vmem:[#allocation10 + $0x80] ss:$16 sps:$4 sm:$0xff]  }
  0xbe   : > { %v1926_v24 = vld [vmem:[#allocation10 + $0x88] ss:$16 sps:$4 sm:$0xff]   ;;  %v1931_v25 = vld [vmem:[#allocation10 + $0xa4] ss:$16 sps:$4 sm:$0xff]   ;;  %v1934_v26 = vld [vmem:[#allocation10 + $0xac] ss:$16 sps:$4 sm:$0xff]  }
  0xbf   : > { %767 = vmatpush1.bf16.msra.mxu0 %v1840_v29  ;;  %808 = vmatpush1.bf16.msra.mxu1 %v1859_v35  ;;  %v1929_v27 = vld [vmem:[#allocation10 + $0xa0] ss:$16 sps:$4 sm:$0xff]   ;;  %v1932_v28 = vld [vmem:[#allocation10 + $0xa8] ss:$16 sps:$4 sm:$0xff]   ;;  %v1937_v29 = vld [vmem:[#allocation10 + $0xc4] ss:$16 sps:$4 sm:$0xff]  }
  0xc0   : > { %768 = vmatprep.subr.bf16.mxu0 %v1842_v30  ;;  %809 = vmatprep.subr.bf16.mxu1 %v1862_v36  ;;  %v1940_v30 = vld [vmem:[#allocation10 + $0xcc] ss:$16 sps:$4 sm:$0xff]   ;;  %v1935_v31 = vld [vmem:[#allocation10 + $0xc0] ss:$16 sps:$4 sm:$0xff]   ;;  %v1938_v32 = vld [vmem:[#allocation10 + $0xc8] ss:$16 sps:$4 sm:$0xff]  }
  0xc1   : > { %v1941_v35 = vld [vmem:[#allocation10 + $0xe0] ss:$16 sps:$4 sm:$0xff]   ;;  %v1944_v36 = vld [vmem:[#allocation10 + $0xe8] ss:$16 sps:$4 sm:$0xff]   ;;  %v1955_v41 = vld [vmem:[#allocation10 + $0x124] ss:$16 sps:$4 sm:$0xff]  }
  0xc2   : > { %v1953_v43 = vld [vmem:[#allocation10 + $0x120] ss:$16 sps:$4 sm:$0xff]   ;;  %v1986_v0 = vld [vmem:[#allocation10 + $0x1c8] ss:$16 sps:$4 sm:$0xff]  }
  0xc3   : > { %769 = vmatpush1.bf16.msra.mxu0 %v1846_v33  ;;  %810 = vmatpush1.bf16.msra.mxu1 %v1865_v39  ;;  %v1943_v33 = vld [vmem:[#allocation10 + $0xe4] ss:$16 sps:$4 sm:$0xff]   ;;  %v1947_v39 = vld [vmem:[#allocation10 + $0x100] ss:$16 sps:$4 sm:$0xff]  }
  0xc4   : > { %770 = vmatprep.subr.bf16.mxu0 %v1848_v34  ;;  %811 = vmatprep.subr.bf16.mxu1 %v1868_v40  ;;  %v1946_v34 = vld [vmem:[#allocation10 + $0xec] ss:$16 sps:$4 sm:$0xff]   ;;  %v1950_v40 = vld [vmem:[#allocation10 + $0x108] ss:$16 sps:$4 sm:$0xff]  }
  0xc7   : > { %771 = vmatpush1.bf16.msra.mxu0 %v1852_v37  ;;  %812 = vmatpush1.bf16.msra.mxu1 %v1871_v45  ;;  %v1949_v37 = vld [vmem:[#allocation10 + $0x104] ss:$16 sps:$4 sm:$0xff]  }
  0xc8   : > { %772 = vmatprep.subr.bf16.mxu0 %v1854_v38  ;;  %813 = vmatprep.subr.bf16.mxu1 %v1874_v46  ;;  %v1952_v38 = vld [vmem:[#allocation10 + $0x10c] ss:$16 sps:$4 sm:$0xff]   ;;  %v1961_v45 = vld [vmem:[#allocation10 + $0x144] ss:$16 sps:$4 sm:$0xff]  }
  0xc9   : > { %v1964_v46 = vld [vmem:[#allocation10 + $0x14c] ss:$16 sps:$4 sm:$0xff]  }
  0xcb   : > { %773 = vmatpush1.bf16.msra.mxu0 %v1858_v42  ;;  %814 = vmatpush1.bf16.msra.mxu1 %v1877_v49  ;;  %v1958_v42 = vld [vmem:[#allocation10 + $0x12c] ss:$16 sps:$4 sm:$0xff]   ;;  %v1967_v49 = vld [vmem:[#allocation10 + $0x164] ss:$16 sps:$4 sm:$0xff]  }
  0xcc   : > { %774 = vmatprep.subr.bf16.mxu0 %v1860_v44  ;;  %815 = vmatprep.subr.bf16.mxu1 %v1880_v50  ;;  %v1956_v44 = vld [vmem:[#allocation10 + $0x128] ss:$16 sps:$4 sm:$0xff]   ;;  %v1970_v50 = vld [vmem:[#allocation10 + $0x16c] ss:$16 sps:$4 sm:$0xff]  }
  0xcf   : > { %775 = vmatpush1.bf16.msra.mxu0 %v1864_v47  ;;  %816 = vmatpush1.bf16.msra.mxu1 %v1883_v53  ;;  %v1959_v47 = vld [vmem:[#allocation10 + $0x140] ss:$16 sps:$4 sm:$0xff]   ;;  %v1973_v53 = vld [vmem:[#allocation10 + $0x184] ss:$16 sps:$4 sm:$0xff]  }
  0xd0   : > { %776 = vmatprep.subr.bf16.mxu0 %v1866_v48  ;;  %817 = vmatprep.subr.bf16.mxu1 %v1886_v54  ;;  %v1962_v48 = vld [vmem:[#allocation10 + $0x148] ss:$16 sps:$4 sm:$0xff]   ;;  %v1976_v54 = vld [vmem:[#allocation10 + $0x18c] ss:$16 sps:$4 sm:$0xff]  }
  0xd3   : > { %777 = vmatpush1.bf16.msra.mxu0 %v1870_v51  ;;  %818 = vmatpush1.bf16.msra.mxu1 %v1889_v57  ;;  %v1965_v51 = vld [vmem:[#allocation10 + $0x160] ss:$16 sps:$4 sm:$0xff]  }
  0xd4   : > { %778 = vmatprep.subr.bf16.mxu0 %v1872_v52  ;;  %819 = vmatprep.subr.bf16.mxu1 %v1890_v59  ;;  %v1968_v52 = vld [vmem:[#allocation10 + $0x168] ss:$16 sps:$4 sm:$0xff]   ;;  %v1977_v57 = vld [vmem:[#allocation10 + $0x1a0] ss:$16 sps:$4 sm:$0xff]  }
  0xd5   : > { %v1980_v59 = vld [vmem:[#allocation10 + $0x1a8] ss:$16 sps:$4 sm:$0xff]  }
  0xd7   : > { %779 = vmatpush1.bf16.msra.mxu0 %v1876_v55  ;;  %820 = vmatpush1.bf16.msra.mxu1 %v1892_v61  ;;  %v1971_v55 = vld [vmem:[#allocation10 + $0x180] ss:$16 sps:$4 sm:$0xff]   ;;  %v1985_v61 = vld [vmem:[#allocation10 + $0x1c4] ss:$16 sps:$4 sm:$0xff]  }
  0xd8   : > { %780 = vmatprep.subr.bf16.mxu0 %v1878_v56  ;;  %821 = vmatprep.subr.bf16.mxu1 %v1893_v62  ;;  %v1974_v56 = vld [vmem:[#allocation10 + $0x188] ss:$16 sps:$4 sm:$0xff]   ;;  %v1988_v62 = vld [vmem:[#allocation10 + $0x1cc] ss:$16 sps:$4 sm:$0xff]  }
  0xdb   : > { %781 = vmatpush1.bf16.msra.mxu0 %v1882_v58  ;;  %822 = vmatpush1.bf16.msra.mxu1 %v1895_v1  ;;  %v1979_v58 = vld [vmem:[#allocation10 + $0x1a4] ss:$16 sps:$4 sm:$0xff]  }
  0xdc   : > { %782 = vmatprep.subr.bf16.mxu0 %v1884_v60  ;;  %823 = vmatprep.subr.bf16.mxu1 %v1896_v3  ;;  %v1982_v60 = vld [vmem:[#allocation10 + $0x1ac] ss:$16 sps:$4 sm:$0xff]   ;;  %v926_v1 = vld [vmem:[#allocation2 + $0x8] sm:$0xff] }
  0xdd   : > { %v1994_v3 = vld [vmem:[#allocation10 + $0x1ec] ss:$16 sps:$4 sm:$0xff]  }
  0xdf   : > { %783 = vmatpush1.bf16.msra.mxu0 %v1888_v63  ;;  %824 = vmatpush1.bf16.msra.mxu1 %v1898_v6  ;;  %v1983_v63 = vld [vmem:[#allocation10 + $0x1c0] ss:$16 sps:$4 sm:$0xff]   ;;  %v1992_v6 = vld [vmem:[#allocation10 + $0x1e8] ss:$16 sps:$4 sm:$0xff]  }
  0xe0   : > { %1272 = vmatprep.subr.bf16.mxu0 %v1901_v2  ;;  %1313 = vmatprep.subr.bf16.mxu1 %v1904_v8  ;;  %v1991_v2 = vld [vmem:[#allocation10 + $0x1e4] ss:$16 sps:$4 sm:$0xff]  }
  0xe2   : > { %785 = vmatmul.mubr.bf16.vlgmr.msra.gmra.mrb[0].mxu0 %v409_v5  ;;  %826 = vmatmul.mubr.bf16.vlgmr.msra.gmra.mrb[0].mxu1 %v409_v5  ;;  %v1989_v5 = vld [vmem:[#allocation10 + $0x1e0] ss:$16 sps:$4 sm:$0xff]  }
  0xe3   : > { %1273 = vmatpush1.bf16.msra.mxu0 %v1899_v4  ;;  %1314 = vmatpush1.bf16.msra.mxu1 %v1902_v10  ;;  %v930_v4 = vpack.c.bf16 %v926_v1, %v926_v1  ;;  %v406_v10 = vld [vmem:[#allocation9] sm:$0xf] }
  0xe4   : > { %1274 = vmatprep.subr.bf16.mxu0 %v1907_v7  ;;  %1315 = vmatprep.subr.bf16.mxu1 %v1910_v12  ;;  %v412_v7 = vlaneseq }
  0xe5   : > { %1304 = vmatprep.mubr.bf16.mxu0 %v930_v4  ;;  %1345 = vmatprep.mubr.bf16.mxu1 %v930_v4 }
  0xe6   : > { %v2568_v8 = vshrl.u32 %v412_v7, 7 }
  0xe7   : > { %1275 = vmatpush1.bf16.msra.mxu0 %v1905_v9  ;;  %1316 = vmatpush1.bf16.msra.mxu1 %v1908_v14 }
  0xe8   : > { %1276 = vmatprep.subr.bf16.mxu0 %v1913_v11  ;;  %1317 = vmatprep.subr.bf16.mxu1 %v1916_v16  ;;  %v414_v9 = vsub.s32 0, %v2568_v8  ;;  %v418_v11 = vsub.s32 1, %v2568_v8  ;;  %v426_v14 = vsub.s32 3, %v2568_v8 }
  0xea   : > { %v415_v12 = vrot.slane %v406_v10, %v414_v9 }
  0xeb   : > { %1277 = vmatpush1.bf16.msra.mxu0 %v1911_v13  ;;  %1318 = vmatpush1.bf16.msra.mxu1 %v1914_v18  ;;  %v419_v13 = vrot.slane %v406_v10, %v418_v11 }
  0xec   : > { %1278 = vmatprep.subr.bf16.mxu0 %v1919_v15  ;;  %1319 = vmatprep.subr.bf16.mxu1 %v1922_v19 }
  0xef   : > { %1279 = vmatpush1.bf16.msra.mxu0 %v1917_v17  ;;  %1320 = vmatpush1.bf16.msra.mxu1 %v1920_v20 }
  0xf0   : > { %1280 = vmatprep.subr.bf16.mxu0 %v1925_v21  ;;  %1321 = vmatprep.subr.bf16.mxu1 %v1928_v22  ;;  %v427_v22 = vrot.slane %v406_v10, %v426_v14 }
  0xf3   : > { %1281 = vmatpush1.bf16.msra.mxu0 %v1923_v23  ;;  %1322 = vmatpush1.bf16.msra.mxu1 %v1926_v24  ;;  %v422_v24 = vsub.s32 2, %v2568_v8 }
  0xf4   : > { %1282 = vmatprep.subr.bf16.mxu0 %v1931_v25  ;;  %1323 = vmatprep.subr.bf16.mxu1 %v1934_v26 }
  0xf7   : > { %1283 = vmatpush1.bf16.msra.mxu0 %v1929_v27  ;;  %1324 = vmatpush1.bf16.msra.mxu1 %v1932_v28 }
  0xf8   : > { %1284 = vmatprep.subr.bf16.mxu0 %v1937_v29  ;;  %1325 = vmatprep.subr.bf16.mxu1 %v1940_v30  ;;  %v423_v29 = vrot.slane %v406_v10, %v422_v24 }
  0xfb   : > { %1285 = vmatpush1.bf16.msra.mxu0 %v1935_v31  ;;  %1326 = vmatpush1.bf16.msra.mxu1 %v1938_v32 }
  0xfc   : > { %1286 = vmatprep.subr.bf16.mxu0 %v1943_v33  ;;  %1327 = vmatprep.subr.bf16.mxu1 %v1946_v34 }
  0xff   : > { %1287 = vmatpush1.bf16.msra.mxu0 %v1941_v35  ;;  %1328 = vmatpush1.bf16.msra.mxu1 %v1944_v36 }
 0x100   : > { %1288 = vmatprep.subr.bf16.mxu0 %v1949_v37  ;;  %1329 = vmatprep.subr.bf16.mxu1 %v1952_v38 }
 0x103   : > { %1289 = vmatpush1.bf16.msra.mxu0 %v1947_v39  ;;  %1330 = vmatpush1.bf16.msra.mxu1 %v1950_v40  ;;  %v408_v39 = vld [vmem:[#allocation3] sm:$0xff] }
 0x104   : > { %1290 = vmatprep.subr.bf16.mxu0 %v1955_v41  ;;  %1331 = vmatprep.subr.bf16.mxu1 %v1958_v42 }
 0x107   : > { %1291 = vmatpush1.bf16.msra.mxu0 %v1953_v43  ;;  %1332 = vmatpush1.bf16.msra.mxu1 %v1956_v44 }
 0x108   : > { %1292 = vmatprep.subr.bf16.mxu0 %v1961_v45  ;;  %1333 = vmatprep.subr.bf16.mxu1 %v1964_v46 }
 0x10b   : > { %1293 = vmatpush1.bf16.msra.mxu0 %v1959_v47  ;;  %1334 = vmatpush1.bf16.msra.mxu1 %v1962_v48 }
 0x10c   : > { %1294 = vmatprep.subr.bf16.mxu0 %v1967_v49  ;;  %1335 = vmatprep.subr.bf16.mxu1 %v1970_v50  ;;  %v924_v50 = vld [vmem:[#allocation12] sm:$0xf] }
 0x10d   : > { %v947_v1 = vrot.slane %v924_v50, %v426_v14 }
 0x10f   : > { %1295 = vmatpush1.bf16.msra.mxu0 %v1965_v51  ;;  %1336 = vmatpush1.bf16.msra.mxu1 %v1968_v52  ;;  %v935_v51 = vrot.slane %v924_v50, %v414_v9  ;;  %v939_v52 = vrot.slane %v924_v50, %v418_v11 }
 0x110   : > { %1296 = vmatprep.subr.bf16.mxu0 %v1973_v53  ;;  %1337 = vmatprep.subr.bf16.mxu1 %v1976_v54 }
 0x113   : > { %1297 = vmatpush1.bf16.msra.mxu0 %v1971_v55  ;;  %1338 = vmatpush1.bf16.msra.mxu1 %v1974_v56 }
 0x114   : > { %1298 = vmatprep.subr.bf16.mxu0 %v1979_v58  ;;  %1339 = vmatprep.subr.bf16.mxu1 %v1982_v60 }
 0x117   : > { %1299 = vmatpush1.bf16.msra.mxu0 %v1977_v57  ;;  %1340 = vmatpush1.bf16.msra.mxu1 %v1980_v59 }
 0x118   : > { %1300 = vmatprep.subr.bf16.mxu0 %v1985_v61  ;;  %1341 = vmatprep.subr.bf16.mxu1 %v1988_v62 }
 0x11b   : > { %1301 = vmatpush1.bf16.msra.mxu0 %v1983_v63  ;;  %1342 = vmatpush1.bf16.msra.mxu1 %v1986_v0 }
 0x11c   : > { %1302 = vmatprep.subr.bf16.mxu0 %v1991_v2  ;;  %1343 = vmatprep.subr.bf16.mxu1 %v1994_v3  ;;  %v943_v3 = vrot.slane %v924_v50, %v422_v24 }
 0x11f   : > { %1303 = vmatpush1.bf16.msra.mxu0 %v1989_v5  ;;  %1344 = vmatpush1.bf16.msra.mxu1 %v1992_v6 }
 0x1b5   : > { %v786_v15 = vpop.f32.mrb[0].mxu0  ;;  %v827_v25 = vpop.f32.mrb[0].mxu1 }
 0x1b6   : > { %v787_v16 = vadd.f32 %v786_v15, %v415_v12  ;;  %v788_v17 = vpop.f32.mrb[1].mxu0  ;;  %v829_v26 = vpop.f32.mrb[1].mxu1  ;;  %v828_v32 = vadd.f32 %v827_v25, %v423_v29 }
 0x1b7   : > { %v789_v18 = vadd.f32 %v788_v17, %v419_v13  ;;  %v790_v19 = vpop.f32.mrb[2].mxu0  ;;  %v830_v27 = vadd.f32 %v829_v26, %v427_v22  ;;  %v831_v28 = vpop.f32.mrb[2].mxu1  ;;  %v928_v13 = vld [vmem:[#allocation3 + $0x8] sm:$0xff] }
 0x1b8   : > { %v1611_v20 = vmul.f32 -1.442695, %v787_v16  ;;  %v791_v21 = vpop.f32.mrb[3].mxu0  ;;  %v832_v30 = vpop.f32.mrb[3].mxu1 }
 0x1b9   : > { %v1612_v23 = vmul.f32 -1.442695, %v789_v18  ;;  %v1613_v31 = vmul.f32 -1.442695, %v830_v27 }
 0x1ba   : > { %1995 = vpow2.f32 %v1611_v20 }
 0x1bb   : > { %1997 = vpow2.f32 %v1612_v23 }
 0x1bc   : > { %1999 = vpow2.f32 %v1613_v31 }
 0x1bd   : > { %2001 = vtanh.f32 %v828_v32 }
 0x1c4   : > { %v1996_v33 = vpop.eup %1995 }
 0x1c5   : > { %v1998_v34 = vpop.eup %1997  ;;  %v837_v35 = vadd.f32 1.0, %v1996_v33 }
 0x1c6   : > { %v843_v36 = vadd.f32 1.0, %v1998_v34  ;;  %v2000_v37 = vpop.eup %1999 }
 0x1c7   : > { %2003 = vrcp.f32 %v837_v35  ;;  %v2002_v38 = vpop.eup %2001  ;;  %v850_v41 = vadd.f32 1.0, %v2000_v37 }
 0x1c8   : > { %2005 = vrcp.f32 %v843_v36 }
 0x1c9   : > { %2007 = vrcp.f32 %v850_v41 }
 0x1d1   : > { %v2004_v40 = vpop.eup %2003 }
 0x1d2   : > { %v2006_v42 = vpop.eup %2005  ;;  %v854_v43 = vmul.f32 %v2004_v40, %v2002_v38 }
 0x1d3   : > { %v853_v44 = vmul.f32 %v2006_v42, %v408_v39  ;;  %v2008_v46 = vpop.eup %2007 }
 0x1d5   : > { %v855_v45 = vadd.f32 %v854_v43, %v853_v44 }
 0x1d7   : > { %2009 = vtanh.f32 %v855_v45  ;;  %859 = vst [vmem:[#allocation3] sm:$0xff] %v855_v45 }
 0x1de   : > { %v1388_v24 = vld [vmem:[#allocation3] sm:$0xff] (!%p1681_p0) }
 0x1df   : > { %1390 = vst [vmem:[#allocation14] sm:$0xff] (!%p1681_p0), %v1388_v24 }
 0x1e1   : > { %v2010_v47 = vpop.eup %2009 }
 0x1e2   : > { %v857_v48 = vmul.f32 %v2010_v47, %v2008_v46 }
 0x1e4   : > { %858 = vst [vmem:[#allocation2] sm:$0xff] %v857_v48  ;;  %v929_v49 = vpack.c.bf16 %v857_v48, %v857_v48 }
 0x1e6   : > { %1305 = vmatmul.mubr.bf16.vlgmr.msra.gmra.mrb[4].mxu0 %v929_v49  ;;  %1346 = vmatmul.mubr.bf16.vlgmr.msra.gmra.mrb[4].mxu1 %v929_v49 }
 0x1eb   : > { %v1384_v22 = vld [vmem:[#allocation2] sm:$0xff] (!%p1681_p0) }
 0x1ec   : > { %1386 = vst [vmem:[#allocation13] sm:$0xff] (!%p1681_p0), %v1384_v22 }
 0x2b9   : > { %v1306_v53 = vpop.f32.mrb[4].mxu0  ;;  %v1347_v54 = vpop.f32.mrb[4].mxu1 }
 0x2ba   : > { %v1307_v55 = vadd.f32 %v1306_v53, %v935_v51  ;;  %v1308_v56 = vpop.f32.mrb[5].mxu0  ;;  %v1349_v57 = vpop.f32.mrb[5].mxu1  ;;  %v1348_v5 = vadd.f32 %v1347_v54, %v943_v3 }
 0x2bb   : > { %v1309_v58 = vadd.f32 %v1308_v56, %v939_v52  ;;  %v1310_v59 = vpop.f32.mrb[6].mxu0  ;;  %v1351_v60 = vpop.f32.mrb[6].mxu1  ;;  %v1350_v2 = vadd.f32 %v1349_v57, %v947_v1 }
 0x2bc   : > { %v1678_v61 = vmul.f32 -1.442695, %v1307_v55  ;;  %v1311_v62 = vpop.f32.mrb[7].mxu0  ;;  %v1352_v63 = vpop.f32.mrb[7].mxu1 }
 0x2bd   : > { %v1679_v0 = vmul.f32 -1.442695, %v1309_v58  ;;  %v1680_v4 = vmul.f32 -1.442695, %v1350_v2 }
 0x2be   : > { %2011 = vpow2.f32 %v1678_v61 }
 0x2bf   : > { %2013 = vpow2.f32 %v1679_v0 }
 0x2c0   : > { %2015 = vpow2.f32 %v1680_v4 }
 0x2c1   : > { %2017 = vtanh.f32 %v1348_v5 }
 0x2c8   : > { %v2012_v6 = vpop.eup %2011 }
 0x2c9   : > { %v2014_v7 = vpop.eup %2013  ;;  %v1357_v9 = vadd.f32 1.0, %v2012_v6 }
 0x2ca   : > { %v1363_v10 = vadd.f32 1.0, %v2014_v7  ;;  %v2016_v11 = vpop.eup %2015 }
 0x2cb   : > { %2019 = vrcp.f32 %v1357_v9  ;;  %v2018_v12 = vpop.eup %2017  ;;  %v1370_v16 = vadd.f32 1.0, %v2016_v11 }
 0x2cc   : > { %2021 = vrcp.f32 %v1363_v10 }
 0x2cd   : > { %2023 = vrcp.f32 %v1370_v16 }
 0x2d5   : > { %v2020_v15 = vpop.eup %2019 }
 0x2d6   : > { %v2022_v8 = vpop.eup %2021  ;;  %v1374_v14 = vmul.f32 %v2020_v15, %v2018_v12 }
 0x2d7   : > { %v1373_v17 = vmul.f32 %v2022_v8, %v928_v13  ;;  %v2024_v19 = vpop.eup %2023 }
 0x2d9   : > { %v1375_v18 = vadd.f32 %v1374_v14, %v1373_v17 }
 0x2db   : > { %2025 = vtanh.f32 %v1375_v18  ;;  %1379 = vst [vmem:[#allocation3 + $0x8] sm:$0xff] %v1375_v18 }
 0x2e2   : > { %1383 = sbr.rel (%p1681_p0) target bundleno = 753 (0x2f1), region = 68  ;;  %v1389_v25 = vld [vmem:[#allocation3 + $0x8] sm:$0xff] (!%p1681_p0) }
 0x2e3   : > { %1391 = vst [vmem:[#allocation14 + $0x8] sm:$0xff] (!%p1681_p0), %v1389_v25 }
 0x2e5   : > { %v2026_v20 = vpop.eup %2025 }
 0x2e6   : > { %v1377_v21 = vmul.f32 %v2026_v20, %v2024_v19 }
 0x2e8   : > { %1378 = vst [vmem:[#allocation2 + $0x8] sm:$0xff] %v1377_v21 }
 0x2ef   : > { %v1385_v23 = vld [vmem:[#allocation2 + $0x8] sm:$0xff] }
 0x2f0   : > { %1387 = vst [vmem:[#allocation13 + $0x8] sm:$0xff] %v1385_v23 }
 0x2f1 PF: > { %s2668_s28 = sadd.s32 4294967295, %s2287_s26   ;;  %s2297_s9 = smov [#allocation13]  }
 0x2f2   : > { %p2581_p3 = scmp.eq.s32.totalorder %s2668_s28, 3  ;;  %s1400_s17 = sshll.u32 %s2297_s9, 4  ;;  %s1401_s17 = int_to_ptr.vmem [resolvable:$true] %s1400_s17 }
 0x2f3   : > { %s2169_s24 = scalar_lea.vmem %s1401_s17, 256  ;;  %p2176_p2 = scmp.lt.s32.totalorder %s1401_s17, %s1401_s17 }
 0x2f4   : > { %p2170_p12 = scmp.ne.s32.totalorder %s1401_s17, %s2169_s24  ;;  %p2177_p6 = scmp.lt.s32.totalorder %s2169_s24, %s2169_s24 }
 0x2f6   : > { %p2171_p13 = pnand %p2170_p12, %p2581_p3  ;;  %p2178_p9 = por %p2177_p6, %p2176_p2 }
 0x2f8   : > { %p2172_p5 = pneg %p2171_p13 }
 0x2fa   : > { %p2179_p7 = pnand %p2178_p9, %p2172_p5 }
 0x2fc   : > { %2182 = shalt.err (!%p2179_p7)
}
 0x2fd   : > { %s2183_s30 = scalar_lea.hbm %s2652_s5, 256 }
 0x2fe   : > { %p2184_p11 = scmp.ne.s32.totalorder %s2652_s5, %s2183_s30  ;;  %p2189_p8 = scmp.lt.u32.totalorder %s2183_s30, %s2652_s5 }
 0x300   : > { %p2185_p1 = pnand %p2184_p11, %p2581_p3 }
 0x302   : > { %p2186_p10 = pneg %p2185_p1 }
 0x304   : > { %p2191_p4 = pnand %p2189_p8, %p2186_p10 }
 0x306   : > { %2194 = shalt.err (!%p2191_p4)
}
 0x307   : > { %s2298_s16 = smov 128   ;;  %s2299_s19 = smov 8  }
 0x308   : > { %1707 = dma.vmem_to_hbm [thread:$0]  (%p2581_p3), %s1401_s17, 256, %s2652_s5, [#allocation6], %s2298_s16, %s2298_s16, %s2299_s19  }
 0x309   : > { %s2300_s11 = smov [#allocation14]  }
 0x30a   : > { %s1415_s13 = sshll.u32 %s2300_s11, 4  ;;  %s1416_s13 = int_to_ptr.vmem [resolvable:$true] %s1415_s13 }
 0x30b   : > { %s2195_s28 = scalar_lea.vmem %s1416_s13, 256  ;;  %p2202_p5 = scmp.lt.s32.totalorder %s1416_s13, %s1416_s13 }
 0x30c   : > { %p2196_p0 = scmp.ne.s32.totalorder %s1416_s13, %s2195_s28  ;;  %p2203_p2 = scmp.lt.s32.totalorder %s2195_s28, %s2195_s28 }
 0x30e   : > { %p2197_p12 = pnand %p2196_p0, %p2581_p3  ;;  %p2204_p6 = por %p2203_p2, %p2202_p5 }
 0x310   : > { %p2198_p13 = pneg %p2197_p12 }
 0x312   : > { %p2205_p9 = pnand %p2204_p6, %p2198_p13 }
 0x314   : > { %2208 = shalt.err (!%p2205_p9)
}
 0x315   : > { %s2209_s20 = scalar_lea.hbm %s2653_s6, 256 }
 0x316   : > { %p2210_p7 = scmp.ne.s32.totalorder %s2653_s6, %s2209_s20  ;;  %p2215_p10 = scmp.lt.u32.totalorder %s2209_s20, %s2653_s6 }
 0x318   : > { %p2211_p11 = pnand %p2210_p7, %p2581_p3 }
 0x31a   : > { %p2212_p1 = pneg %p2211_p11 }
 0x31c   : > { %p2217_p8 = pnand %p2215_p10, %p2212_p1 }
 0x31e   : > { %2220 = shalt.err (!%p2217_p8)
}
 0x31f   : > { %1709 = dma.vmem_to_hbm [thread:$0]  (%p2581_p3), %s1416_s13, 256, %s2653_s6, [#allocation15], %s2298_s16, %s2298_s16, %s2299_s19  }
 0x320   : > { %2258 = dma.done.wait (%p2581_p3), [#allocation6], 256  }
 0x321   : > { %2260 = vsyncadd (%p2581_p3), [#allocation6], 4294967040 }
 0x322   : > { %2262 = dma.done.wait (%p2581_p3), [#allocation15], 256  }
 0x323   : > { %2264 = vsyncadd (%p2581_p3), [#allocation15], 4294967040 }
 0x324 PF: > { %s24_s26 = sadd.s32 1, %s2287_s26   ;;  %s2670_s21 = smov %s2271_s22 }
 0x325   : > { %p21_p4 = scmp.ge.s32.totalorder %s24_s26, 6   ;;  %s2671_s22 = smov %s2275_s23 }
 0x326   : > { %s2672_s23 = smov %s2506_s14  ;;  %s2673_s24 = smov %s2283_s25 }
 0x327   : > { %s2674_s25 = smov %s2676_s18  ;;  %23 = sbr.rel (!%p21_p4) target bundleno = 8 (0x8), region = 113 }
 0x32e   :  { %1435 = vsyncpa [#allocation5], 1 }
 0x32f   :  { %1437 = vsyncpa [#allocation5 + $0x1], 1 }
 0x330   :  { %1438 = vsyncpa [#allocation8], 1 }
 0x331   :  { %1439 = vsyncpa [#allocation11], 1 }
 0x332   :  { %1440 = vsyncpa [#allocation6], 1 }
 0x333   :  { %1442 = vsyncpa [#allocation6 + $0x1], 1 }
 0x334   :  { %1443 = vsyncpa [#allocation15], 1 }

// kernel: _hier_forward_jit.3
= control target key start
LH: loop header
LB: loop body
LE: loop exit
PB: predicated region body
PF: predicated region fallthrough
CT: control target
= control target key end

     0   :  { %s3046_s0 = inlined_call_operand.hbm [shape: f32[6,32,128], index: 0, kind: input, shape index: {}]   ;;  %s3047_s1 = inlined_call_operand.hbm [shape: bf16[256,512], index: 1, kind: input, shape index: {}]   ;;  %s3048_s2 = inlined_call_operand.hbm [shape: f32[1,512], index: 2, kind: input, shape index: {}]   ;;  %s3049_s3 = inlined_call_operand.hbm [shape: bf16[256,512], index: 3, kind: input, shape index: {}]   ;;  %s3050_s4 = inlined_call_operand.hbm [shape: f32[1,512], index: 4, kind: input, shape index: {}]   ;;  %s3051_s5 = inlined_call_operand.hbm [shape: f32[2,32,128], index: 5, kind: output, shape index: {0}]   ;;  %s3052_s6 = inlined_call_operand.hbm [shape: f32[2,32,128], index: 6, kind: output, shape index: {1}]  }
   0x1   :  { %3063 = sst [smem:[#allocation31_spill]] %s3047_s1 }
   0x2   :  { %3064 = sst [smem:[#allocation32_spill]] %s3048_s2 }
   0x3   :  { %3065 = sst [smem:[#allocation33_spill]] %s3049_s3 }
   0x4   :  { %3066 = sst [smem:[#allocation34_spill]] %s3050_s4 }
   0x5   :  { %3067 = sst [smem:[#allocation35_spill]] %s3051_s5 }
   0x6   :  { %3068 = sst [smem:[#allocation36_spill]] %s3052_s6 }
   0x7   :  { %12 = vsyncpa [#allocation5], 0 }
   0x8   :  { %14 = vsyncpa [#allocation5 + $0x1], 0 }
   0x9   :  { %15 = vsyncpa [#allocation8], 0 }
   0xa   :  { %16 = vsyncpa [#allocation11], 0 }
   0xb   :  { %17 = vsyncpa [#allocation6], 0 }
   0xc   :  { %19 = vsyncpa [#allocation6 + $0x1], 0 }
   0xd   :  { %20 = vsyncpa [#allocation15], 0 }
   0xe   :  { %22 = vsyncpa [#allocation15 + $0x1], 0  ;;  %s2656_s21 = smov 0   ;;  %s2658_s22 = smov 0  }
   0xf   :  { %s2660_s23 = smov 0   ;;  %s2662_s24 = smov 0  }
  0x10   :  { %s2664_s25 = smov 0   ;;  %s2666_s26 = smov 0  }
  0x11   :  { %s2668_s27 = smov 0   ;;  %s2670_s28 = smov 0  }
  0x12   :  { %s2672_s29 = smov 0   ;;  %s2674_s30 = smov 0  }
  0x13   :  { %s2676_s7 = smov 0  }
  0x14 LB: > { %3069 = sst [smem:[#allocation25_spill]] %s2555_s21  ;;  %s1740_s8 = sadd.s32 4294967295, %s2595_s7   ;;  %s2595_s7 = sphi %s2676_s7, %s28_s7   ;;  %s2591_s30 = sphi %s2674_s30, %s3112_s30   ;;  %s2587_s29 = sphi %s2672_s29, %s3111_s29   ;;  %s2583_s28 = sphi %s2670_s28, %s3110_s28   ;;  %s2579_s27 = sphi %s2668_s27, %s3109_s27   ;;  %s2575_s26 = sphi %s2666_s26, %s3108_s26   ;;  %s2571_s25 = sphi %s2664_s25, %s3107_s25   ;;  %s2567_s24 = sphi %s2662_s24, %s3106_s24   ;;  %s2563_s23 = sphi %s2660_s23, %s3105_s23   ;;  %s2559_s22 = sphi %s2658_s22, %s3104_s22   ;;  %s2555_s21 = sphi %s2656_s21, %s3103_s21  }
  0x15   : > { %3070 = sst [smem:[#allocation26_spill]] %s2579_s27  ;;  %s1741_s9 = sadd.s32 4294967294, %s2595_s7  }
  0x16   : > { %3071 = sst [smem:[#allocation27_spill]] %s2583_s28  ;;  %p62_p0 = scmp.ne.s32.totalorder %s2571_s25, %s2567_s24 }
  0x17   : > { %p2712_p1 = scmp.eq.s32.totalorder %s1740_s8, 0  ;;  %p169_p2 = scmp.ne.s32.totalorder %s2563_s23, %s2559_s22 }
  0x18   : > { %p170_p3 = scmp.eq.s32.totalorder %s1740_s8, 11  ;;  %p175_p5 = scmp.ne.s32.totalorder %s2559_s22, %s2555_s21 }
  0x19   : > { %s3072_s10 = scalar_select %p2712_p1, 1, 0 }
  0x1a   : > { %p2720_p4 = por %p2712_p1, %p62_p0  ;;  %p2726_p6 = por %p170_p3, %p169_p2 }
  0x1b   : > { %p176_p7 = scmp.eq.s32.totalorder %s1741_s9, 11  ;;  %p1742_p8 = scmp.ge.s32.totalorder %s2595_s7, 1 }
  0x1c   : > { %s3073_s11 = scalar_select %p2720_p4, 1, 0 }
  0x1d   : > { %s3074_s12 = scalar_select %p2726_p6, 1, 0 }
  0x1e   : > { %p209_p9 = scmp.lt.s32.totalorder %s2595_s7, 13  ;;  %p2732_p10 = por %p176_p7, %p175_p5 }
  0x1f   : > { %3075 = sst [smem:[#allocation28_spill]] %s3074_s12  ;;  %s2597_s15 = smov [#allocation7]  }
  0x20   : > { %s3076_s13 = scalar_select %p2732_p10, 1, 0 }
  0x21   : > { %p2736_p11 = pnand %p1742_p8, %p209_p9  ;;  %s221_s16 = sshll.u32 %s2597_s15, 4  ;;  %s222_s16 = int_to_ptr.vmem [resolvable:$true] %s221_s16 }
  0x22   : > { %3077 = sst [smem:[#allocation29_spill]] %s3076_s13  ;;  %s2598_s18 = smov [#allocation10]  }
  0x23   : > { %s3078_s14 = scalar_select %p2736_p11, 1, 0 }
  0x24   : > { %p1946_p12 = pneg %p2736_p11  ;;  %s245_s19 = sshll.u32 %s2598_s18, 4  ;;  %s2748_s19 = int_to_ptr.vmem [resolvable:$true] %s245_s19 }
  0x25   : > { %s3080_s1 = sld [smem:[#allocation31_spill]] }
  0x26   : > { %p2744_p13 = pnand %p1946_p12, %p2712_p1 }
  0x28   : > { %p2758_p2 = pneg %p2744_p13 }
  0x2b   : > { %s2347_s8 = scalar_lea.hbm %s3080_s1, 8192 }
  0x2c   : > { %p2348_p0 = scmp.ne.s32.totalorder %s3080_s1, %s2347_s8  ;;  %p2354_p7 = scmp.lt.u32.totalorder %s2347_s8, %s3080_s1 }
  0x2e   : > { %p2350_p3 = pnand %p2758_p2, %p2348_p0 }
  0x30   : > { %p2351_p5 = pneg %p2350_p3 }
  0x32   : > { %p2356_p8 = pnand %p2354_p7, %p2351_p5 }
  0x34   : > { %2359 = shalt.err (!%p2356_p8)
}
  0x35   : > { %s2360_s20 = scalar_lea.vmem %s222_s16, 8192  ;;  %p2368_p6 = scmp.lt.s32.totalorder %s222_s16, %s222_s16 }
  0x36   : > { %p2361_p9 = scmp.ne.s32.totalorder %s222_s16, %s2360_s20  ;;  %p2369_p1 = scmp.lt.s32.totalorder %s2360_s20, %s2360_s20 }
  0x38   : > { %p2363_p12 = pnand %p2361_p9, %p2758_p2  ;;  %p2370_p4 = por %p2369_p1, %p2368_p6 }
  0x3a   : > { %p2364_p10 = pneg %p2363_p12 }
  0x3c   : > { %p2371_p11 = pnand %p2370_p4, %p2364_p10 }
  0x3e   : > { %2374 = shalt.err (!%p2371_p11)
}
  0x3f   : > { %s2599_s13 = smov 256   ;;  %s2600_s24 = smov 16  }
  0x40   : > { %1949 = dma.hbm_to_vmem [thread:$0]  (!%p2744_p13), %s3080_s1, 8192, %s222_s16, [#allocation8], %s2599_s13, %s2599_s13, %s2600_s24  }
  0x41   : > { %s3082_s3 = sld [smem:[#allocation33_spill]] }
  0x47   : > { %s2375_s6 = scalar_lea.hbm %s3082_s3, 8192 }
  0x48   : > { %p2376_p0 = scmp.ne.s32.totalorder %s3082_s3, %s2375_s6  ;;  %p2382_p6 = scmp.lt.u32.totalorder %s2375_s6, %s3082_s3 }
  0x4a   : > { %p2378_p1 = pnand %p2376_p0, %p2758_p2 }
  0x4c   : > { %p2379_p4 = pneg %p2378_p1 }
  0x4e   : > { %p2384_p10 = pnand %p2382_p6, %p2379_p4 }
  0x50   : > { %2387 = shalt.err (!%p2384_p10)
}
  0x51   : > { %s2388_s16 = scalar_lea.vmem %s2748_s19, 8192  ;;  %p2396_p7 = scmp.lt.s32.totalorder %s2748_s19, %s2748_s19 }
  0x52   : > { %p2389_p11 = scmp.ne.s32.totalorder %s2748_s19, %s2388_s16  ;;  %p2397_p8 = scmp.lt.s32.totalorder %s2388_s16, %s2388_s16 }
  0x54   : > { %p2391_p3 = pnand %p2389_p11, %p2758_p2  ;;  %p2398_p9 = por %p2397_p8, %p2396_p7 }
  0x56   : > { %p2392_p5 = pneg %p2391_p3 }
  0x58   : > { %p2399_p12 = pnand %p2398_p9, %p2392_p5 }
  0x5a   : > { %2402 = shalt.err (!%p2399_p12)
}
  0x5b   : > { %1955 = dma.hbm_to_vmem [thread:$0]  (!%p2744_p13), %s3082_s3, 8192, %s2748_s19, [#allocation11], %s2599_s13, %s2599_s13, %s2600_s24  }
  0x5c   : > { %s2601_s28 = smov [#allocation9]   ;;  %s2602_s21 = smov [#allocation12]  }
  0x5d   : > { %s235_s12 = sshll.u32 %s2601_s28, 4  ;;  %s259_s8 = sshll.u32 %s2602_s21, 4  ;;  %s236_s12 = int_to_ptr.vmem [resolvable:$true] %s235_s12  ;;  %s260_s8 = int_to_ptr.vmem [resolvable:$true] %s259_s8 }
  0x5e   : > { %s3083_s2 = sld [smem:[#allocation32_spill]] }
  0x64   : > { %s2403_s20 = scalar_lea.hbm %s3083_s2, 64 }
  0x65   : > { %p2404_p0 = scmp.ne.s32.totalorder %s3083_s2, %s2403_s20  ;;  %p2410_p6 = scmp.lt.u32.totalorder %s2403_s20, %s3083_s2 }
  0x67   : > { %p2406_p1 = pnand %p2404_p0, %p2758_p2 }
  0x69   : > { %p2407_p4 = pneg %p2406_p1 }
  0x6b   : > { %p2412_p10 = pnand %p2410_p6, %p2407_p4 }
  0x6d   : > { %2415 = shalt.err (!%p2412_p10)
}
  0x6e   : > { %s2416_s19 = scalar_lea.vmem %s236_s12, 64  ;;  %p2424_p7 = scmp.lt.s32.totalorder %s236_s12, %s236_s12 }
  0x6f   : > { %p2417_p11 = scmp.ne.s32.totalorder %s236_s12, %s2416_s19  ;;  %p2425_p8 = scmp.lt.s32.totalorder %s2416_s19, %s2416_s19 }
  0x71   : > { %p2419_p3 = pnand %p2417_p11, %p2758_p2  ;;  %p2426_p9 = por %p2425_p8, %p2424_p7 }
  0x73   : > { %p2420_p5 = pneg %p2419_p3 }
  0x75   : > { %p2427_p12 = pnand %p2426_p9, %p2420_p5 }
  0x77   : > { %2430 = shalt.err (!%p2427_p12)
}
  0x78   : > { %1952 = dma.hbm_to_vmem [thread:$0]  (!%p2744_p13), %s3083_s2, 64, %s236_s12, [#allocation8]  }
  0x79   : > { %s3084_s4 = sld [smem:[#allocation34_spill]] }
  0x7f   : > { %s2431_s6 = scalar_lea.hbm %s3084_s4, 64 }
  0x80   : > { %p2432_p0 = scmp.ne.s32.totalorder %s3084_s4, %s2431_s6  ;;  %p2438_p6 = scmp.lt.u32.totalorder %s2431_s6, %s3084_s4 }
  0x82   : > { %p2434_p1 = pnand %p2432_p0, %p2758_p2 }
  0x84   : > { %p2435_p4 = pneg %p2434_p1 }
  0x86   : > { %p2440_p10 = pnand %p2438_p6, %p2435_p4 }
  0x88   : > { %2443 = shalt.err (!%p2440_p10)
}
  0x89   : > { %s2444_s20 = scalar_lea.vmem %s260_s8, 64  ;;  %p2452_p7 = scmp.lt.s32.totalorder %s260_s8, %s260_s8 }
  0x8a   : > { %p2445_p11 = scmp.ne.s32.totalorder %s260_s8, %s2444_s20  ;;  %p2453_p8 = scmp.lt.s32.totalorder %s2444_s20, %s2444_s20 }
  0x8c   : > { %p2447_p3 = pnand %p2445_p11, %p2758_p2  ;;  %p2454_p9 = por %p2453_p8, %p2452_p7 }
  0x8e   : > { %p2448_p5 = pneg %p2447_p3 }
  0x90   : > { %p2455_p12 = pnand %p2454_p9, %p2448_p5 }
  0x92   : > { %2458 = shalt.err (!%p2455_p12)
}
  0x93   : > { %1958 = dma.hbm_to_vmem [thread:$0]  (!%p2744_p13), %s3084_s4, 64, %s260_s8, [#allocation11]  }
  0x94   : > { %s37_s15 = sadd.s32 1, %s2587_s29  ;;  %s40_s17 = sadd.s32 1, %s2591_s30 }
  0x95   : > { %p38_p2 = scmp.ge.s32.totalorder %s37_s15, 6  ;;  %s49_s5 = sadd.s32 1, %s2575_s26 }
  0x96   : > { %p56_p0 = scmp.ne.s32.totalorder %s2575_s26, %s2571_s25  ;;  %p57_p1 = scmp.eq.s32.totalorder %s2595_s7, 0 }
  0x97   : > { %s3114_s15 = smov (%p38_p2, %s37_s15), 0  ;;  %s3116_s17 = smov (!%p38_p2, %s40_s17), %s2591_s30 }
  0x98   : > { %3085 = sst [smem:[#allocation30_spill]] %s3114_s15  ;;  %s44_s19 = ssub.s32 %s2587_s29, %s3114_s15 }
  0x99   : > { %p42_p4 = scmp.ge.s32.totalorder %s3116_s17, 2  ;;  %s159_s1 = sadd.s32 1, %s2563_s23 }
  0x9a   : > { %p2845_p6 = por %p57_p1, %p56_p0  ;;  %p1974_p13 = scmp.lt.s32.totalorder %s2595_s7, 12 }
  0x9b   : > { %s3118_s17 = smov (%p42_p4, %s3116_s17), 0  ;;  %s270_s13 = sand.u32 1, %s2575_s26  }
  0x9c   : > { %s1749_s27 = sshll.u32 %s2591_s30, 1  ;;  %s45_s24 = ssub.s32 %s2591_s30, %s3118_s17 }
  0x9d   : > { %s46_s6 = sor.u32 %s45_s24, %s44_s19  ;;  %p157_p10 = scmp.eq.s32.totalorder %s45_s24, 0 }
  0x9e   : > { %p47_p11 = scmp.eq.s32.totalorder %s46_s6, 0  ;;  %s1748_s28 = sshll.u32 %s270_s13, 4 }
  0x9f   : > { %s2857_s21 = scalar_select %p157_p10, %s2563_s23, %s159_s1  }
  0xa0   : > { %s2860_s9 = scalar_select %p47_p11, %s2575_s26, %s49_s5  }
  0xa1   : > { %s1750_s18 = sshll.u32 %s2587_s29, 2  ;;  %s274_s12 = scalar_lea.vmem [#allocation4], %s1748_s28 }
  0xa2   : > { %s280_s20 = sadd.s32 %s1750_s18, %s1749_s27  ;;  %s283_s16 = sshll.u32 %s274_s12, 4  ;;  %s2863_s16 = int_to_ptr.vmem [resolvable:$true] %s283_s16 }
  0xa3   : > { %s1751_s2 = sshll.u32 %s280_s20, 7  ;;  %p2874_p3 = pnand %p1974_p13, %p2845_p6 }
  0xa4   : > { %s2868_s15 = scalar_lea.hbm %s3046_s0, %s1751_s2  ;;  %s2878_s19 = scalar_lea.sflag [#allocation5], %s270_s13 }
  0xa5   : > { %s2459_s1 = scalar_lea.hbm %s2868_s15, 256  ;;  %p2461_p7 = pneg %p2874_p3 }
  0xa6   : > { %p2460_p5 = scmp.ne.s32.totalorder %s2868_s15, %s2459_s1  ;;  %s2464_s4 = scalar_lea.hbm %s3046_s0, 3072 }
  0xa7   : > { %p2465_p12 = scmp.lt.u32.totalorder %s2868_s15, %s3046_s0  ;;  %p2466_p2 = scmp.lt.u32.totalorder %s2464_s4, %s2459_s1 }
  0xa8   : > { %p2462_p8 = pnand %p2461_p7, %p2460_p5  ;;  %p2468_p1 = scmp.lt.u32.totalorder %s2459_s1, %s2868_s15 }
  0xa9   : > { %p2467_p0 = por %p2466_p2, %p2465_p12 }
  0xaa   : > { %p2463_p9 = pneg %p2462_p8 }
  0xab   : > { %p2469_p4 = por %p2468_p1, %p2467_p0 }
  0xad   : > { %p2470_p6 = pnand %p2469_p4, %p2463_p9 }
  0xaf   : > { %2473 = shalt.err (!%p2470_p6)
}
  0xb0   : > { %s2474_s13 = scalar_lea.vmem %s2863_s16, 256  ;;  %s2603_s24 = smov [#allocation4]  }
  0xb1   : > { %p2475_p13 = scmp.ne.s32.totalorder %s2863_s16, %s2474_s13  ;;  %s2479_s6 = sshll.u32 %s2603_s24, 4  ;;  %s2480_s6 = int_to_ptr.vmem [resolvable:$false] %s2479_s6 }
  0xb2   : > { %s2481_s28 = scalar_lea.vmem %s2480_s6, 512  ;;  %p2482_p5 = scmp.lt.s32.totalorder %s2863_s16, %s2480_s6 }
  0xb3   : > { %p2477_p10 = pnand %p2475_p13, %p2461_p7  ;;  %p2483_p8 = scmp.lt.s32.totalorder %s2481_s28, %s2474_s13 }
  0xb5   : > { %p2478_p11 = pneg %p2477_p10  ;;  %p2484_p12 = por %p2483_p8, %p2482_p5 }
  0xb7   : > { %p2485_p2 = pnand %p2484_p12, %p2478_p11 }
  0xb9   : > { %2488 = shalt.err (!%p2485_p2)
}
  0xba   : > { %s2604_s18 = smov 128   ;;  %s2605_s20 = smov 8  }
  0xbb   : > { %1962 = dma.hbm_to_vmem [thread:$0]  (!%p2874_p3), %s2868_s15, 256, %s2863_s16, %s2878_s19, %s2604_s18, %s2604_s18, %s2605_s20  }
  0xbc   : > { %p3088_p7 = scmp.ne.s32.totalorder %s3078_s14, 0 }
  0xbd   : > { %s297_s12 = sand.u32 (!%p3088_p7), 1, %s2571_s25   ;;  %p3089_p9 = scmp.ne.s32.totalorder (!%p3088_p7), %s3073_s11, 0 }
  0xbe   : > { %295 = sbr.rel (%p3088_p7) target bundleno = 840 (0x348), region = 40  ;;  %s2909_s1 = sshll.u32 (!%p3088_p7), %s297_s12, 4 }
  0xbf   : > { %s298_s2 = scalar_lea.sflag (!%p3088_p7), [#allocation5], %s297_s12  ;;  %s301_s3 = scalar_lea.vmem (!%p3088_p7), [#allocation4], %s2909_s1 }
  0xc5   : > { %2534 = dma.done.wait (%p3089_p9), %s298_s2, 256  }
  0xc6   : > { %2536 = vsyncadd (%p3089_p9), %s298_s2, 4294967040  ;;  %p3090_p0 = scmp.ne.s32.totalorder %s3072_s10, 0 }
  0xc8   : > { %2538 = dma.done.wait (%p3090_p0), [#allocation8], 8256  }
  0xc9   : > { %2540 = vsyncadd (%p3090_p0), [#allocation8], 4294959040 }
  0xca   : > { %2542 = dma.done.wait (%p3090_p0), [#allocation11], 8256  }
  0xcb   : > { %2544 = vsyncadd (%p3090_p0), [#allocation11], 4294959040  ;;  %s2925_s14 = sand.u32 1, %s2559_s22   ;;  %s3091_s5 = sld [smem:[#allocation26_spill]] }
  0xcc   : > { %s1758_s15 = sshll.u32 %s2925_s14, 5 }
  0xcd   : > { %s2928_s16 = scalar_lea.vmem [#allocation13], %s1758_s15  ;;  %s2930_s11 = scalar_lea.vmem [#allocation14], %s1758_s15 }
  0xd1   : > { %p1760_p3 = scmp.ne.s32.totalorder %s3091_s5, 0 }
  0xd2   : > { %v2606_v0 = vmov (!%p1760_p3), 0.0  }
  0xd3   : > { %357 = sbr.rel (%p1760_p3) target bundleno = 218 (0xda), region = 64  ;;  %358 = vst [vmem:[#allocation2] sm:$0xff] (!%p1760_p3), %v2606_v0  ;;  %359 = vst [vmem:[#allocation2 + $0x8] sm:$0xff] (!%p1760_p3), %v2606_v0 }
  0xd4   : > { %360 = vst [vmem:[#allocation2 + $0x10] sm:$0xff] (!%p1760_p3), %v2606_v0  ;;  %361 = vst [vmem:[#allocation2 + $0x18] sm:$0xff] (!%p1760_p3), %v2606_v0 }
  0xd5   : > { %362 = vst [vmem:[#allocation3] sm:$0xff] (!%p1760_p3), %v2606_v0  ;;  %363 = vst [vmem:[#allocation3 + $0x8] sm:$0xff] (!%p1760_p3), %v2606_v0 }
  0xd6   : > { %364 = vst [vmem:[#allocation3 + $0x10] sm:$0xff] (!%p1760_p3), %v2606_v0  ;;  %365 = vst [vmem:[#allocation3 + $0x18] sm:$0xff] (!%p1760_p3), %v2606_v0 }
  0xda PF: > { %v2091_v1 = vld [vmem:[#allocation7 + $0x4] ss:$16 sps:$4 sm:$0xff]   ;;  %v2093_v2 = vld [vmem:[#allocation7] ss:$16 sps:$4 sm:$0xff]   ;;  %v2102_v6 = vld [vmem:[#allocation7 + $0xc] ss:$16 sps:$4 sm:$0xff]  }
  0xdb   : > { %780 = vmatprep.subr.bf16.mxu0 %v2091_v1  ;;  %v2094_v3 = vld [vmem:[#allocation7 + $0x24] ss:$16 sps:$4 sm:$0xff]   ;;  %v2096_v4 = vld [vmem:[#allocation7 + $0x20] ss:$16 sps:$4 sm:$0xff]   ;;  %v2105_v7 = vld [vmem:[#allocation7 + $0x8] ss:$16 sps:$4 sm:$0xff]   ;;  %823 = vmatprep.subr.bf16.mxu1 %v2102_v6 }
  0xdc   : > { %781 = vmatpush1.bf16.msra.mxu0 %v2093_v2  ;;  %v2097_v5 = vld [vmem:[#allocation7 + $0x44] ss:$16 sps:$4 sm:$0xff]   ;;  %v2099_v8 = vld [vmem:[#allocation7 + $0x40] ss:$16 sps:$4 sm:$0xff]   ;;  %824 = vmatpush1.bf16.msra.mxu1 %v2105_v7  ;;  %v2108_v10 = vld [vmem:[#allocation7 + $0x2c] ss:$16 sps:$4 sm:$0xff]  }
  0xdd   : > { %782 = vmatprep.subr.bf16.mxu0 %v2094_v3  ;;  %v2100_v9 = vld [vmem:[#allocation7 + $0x64] ss:$16 sps:$4 sm:$0xff]   ;;  %v2111_v11 = vld [vmem:[#allocation7 + $0x28] ss:$16 sps:$4 sm:$0xff]   ;;  %825 = vmatprep.subr.bf16.mxu1 %v2108_v10  ;;  %v2104_v12 = vld [vmem:[#allocation7 + $0x60] ss:$16 sps:$4 sm:$0xff]  }
  0xde   : > { %v2106_v13 = vld [vmem:[#allocation7 + $0x84] ss:$16 sps:$4 sm:$0xff]   ;;  %v2114_v14 = vld [vmem:[#allocation7 + $0x4c] ss:$16 sps:$4 sm:$0xff]   ;;  %v2117_v15 = vld [vmem:[#allocation7 + $0x48] ss:$16 sps:$4 sm:$0xff]  }
  0xdf   : > { %v2120_v16 = vld [vmem:[#allocation7 + $0x6c] ss:$16 sps:$4 sm:$0xff]   ;;  %v2110_v17 = vld [vmem:[#allocation7 + $0x80] ss:$16 sps:$4 sm:$0xff]   ;;  %v2112_v18 = vld [vmem:[#allocation7 + $0xa4] ss:$16 sps:$4 sm:$0xff]  }
  0xe0   : > { %783 = vmatpush1.bf16.msra.mxu0 %v2096_v4  ;;  %826 = vmatpush1.bf16.msra.mxu1 %v2111_v11  ;;  %v2123_v19 = vld [vmem:[#allocation7 + $0x68] ss:$16 sps:$4 sm:$0xff]   ;;  %v2126_v20 = vld [vmem:[#allocation7 + $0x8c] ss:$16 sps:$4 sm:$0xff]   ;;  %v2116_v21 = vld [vmem:[#allocation7 + $0xa0] ss:$16 sps:$4 sm:$0xff]  }
  0xe1   : > { %784 = vmatprep.subr.bf16.mxu0 %v2097_v5  ;;  %827 = vmatprep.subr.bf16.mxu1 %v2114_v14  ;;  %v2118_v22 = vld [vmem:[#allocation7 + $0xc4] ss:$16 sps:$4 sm:$0xff]   ;;  %v2129_v23 = vld [vmem:[#allocation7 + $0x88] ss:$16 sps:$4 sm:$0xff]   ;;  %v2132_v24 = vld [vmem:[#allocation7 + $0xac] ss:$16 sps:$4 sm:$0xff]  }
  0xe2   : > { %v2122_v25 = vld [vmem:[#allocation7 + $0xc0] ss:$16 sps:$4 sm:$0xff]   ;;  %v2124_v26 = vld [vmem:[#allocation7 + $0xe4] ss:$16 sps:$4 sm:$0xff]   ;;  %v2135_v27 = vld [vmem:[#allocation7 + $0xa8] ss:$16 sps:$4 sm:$0xff]  }
  0xe3   : > { %v2138_v28 = vld [vmem:[#allocation7 + $0xcc] ss:$16 sps:$4 sm:$0xff]   ;;  %v2128_v29 = vld [vmem:[#allocation7 + $0xe0] ss:$16 sps:$4 sm:$0xff]   ;;  %v2130_v30 = vld [vmem:[#allocation7 + $0x104] ss:$16 sps:$4 sm:$0xff]  }
  0xe4   : > { %785 = vmatpush1.bf16.msra.mxu0 %v2099_v8  ;;  %828 = vmatpush1.bf16.msra.mxu1 %v2117_v15  ;;  %v2141_v31 = vld [vmem:[#allocation7 + $0xc8] ss:$16 sps:$4 sm:$0xff]   ;;  %v2144_v32 = vld [vmem:[#allocation7 + $0xec] ss:$16 sps:$4 sm:$0xff]   ;;  %v2134_v33 = vld [vmem:[#allocation7 + $0x100] ss:$16 sps:$4 sm:$0xff]  }
  0xe5   : > { %786 = vmatprep.subr.bf16.mxu0 %v2100_v9  ;;  %829 = vmatprep.subr.bf16.mxu1 %v2120_v16  ;;  %v2136_v34 = vld [vmem:[#allocation7 + $0x124] ss:$16 sps:$4 sm:$0xff]   ;;  %v2147_v35 = vld [vmem:[#allocation7 + $0xe8] ss:$16 sps:$4 sm:$0xff]   ;;  %v2150_v36 = vld [vmem:[#allocation7 + $0x10c] ss:$16 sps:$4 sm:$0xff]  }
  0xe6   : > { %v2140_v37 = vld [vmem:[#allocation7 + $0x120] ss:$16 sps:$4 sm:$0xff]   ;;  %v2142_v38 = vld [vmem:[#allocation7 + $0x144] ss:$16 sps:$4 sm:$0xff]   ;;  %v2153_v39 = vld [vmem:[#allocation7 + $0x108] ss:$16 sps:$4 sm:$0xff]  }
  0xe7   : > { %v2156_v40 = vld [vmem:[#allocation7 + $0x12c] ss:$16 sps:$4 sm:$0xff]   ;;  %v433_v41 = vld [vmem:[#allocation2] sm:$0xff]  ;;  %v2159_v45 = vld [vmem:[#allocation7 + $0x128] ss:$16 sps:$4 sm:$0xff]   ;;  %s3092_s10 = sld [smem:[#allocation26_spill]] }
  0xe8   : > { %787 = vmatpush1.bf16.msra.mxu0 %v2104_v12  ;;  %830 = vmatpush1.bf16.msra.mxu1 %v2123_v19  ;;  %v2146_v42 = vld [vmem:[#allocation7 + $0x140] ss:$16 sps:$4 sm:$0xff]   ;;  %v2148_v43 = vld [vmem:[#allocation7 + $0x164] ss:$16 sps:$4 sm:$0xff]   ;;  %v434_v44 = vld [vmem:[#allocation2 + $0x8] sm:$0xff] }
  0xe9   : > { %788 = vmatprep.subr.bf16.mxu0 %v2106_v13  ;;  %831 = vmatprep.subr.bf16.mxu1 %v2126_v20  ;;  %v438_v46 = vpack.c.bf16 %v434_v44, %v433_v41  ;;  %v2162_v47 = vld [vmem:[#allocation7 + $0x14c] ss:$16 sps:$4 sm:$0xff]   ;;  %v2152_v48 = vld [vmem:[#allocation7 + $0x160] ss:$16 sps:$4 sm:$0xff]   ;;  %v2154_v49 = vld [vmem:[#allocation7 + $0x184] ss:$16 sps:$4 sm:$0xff]  }
  0xea   : > { %v2165_v50 = vld [vmem:[#allocation7 + $0x148] ss:$16 sps:$4 sm:$0xff]   ;;  %v2168_v51 = vld [vmem:[#allocation7 + $0x16c] ss:$16 sps:$4 sm:$0xff]   ;;  %v2158_v52 = vld [vmem:[#allocation7 + $0x180] ss:$16 sps:$4 sm:$0xff]  }
  0xeb   : > { %812 = vmatprep.mubr.bf16.mxu0 %v438_v46  ;;  %855 = vmatprep.mubr.bf16.mxu1 %v438_v46  ;;  %v2160_v53 = vld [vmem:[#allocation7 + $0x1a4] ss:$16 sps:$4 sm:$0xff]   ;;  %v2171_v54 = vld [vmem:[#allocation7 + $0x168] ss:$16 sps:$4 sm:$0xff]   ;;  %v2174_v55 = vld [vmem:[#allocation7 + $0x18c] ss:$16 sps:$4 sm:$0xff]  }
  0xec   : > { %789 = vmatpush1.bf16.msra.mxu0 %v2110_v17  ;;  %832 = vmatpush1.bf16.msra.mxu1 %v2129_v23  ;;  %v2164_v56 = vld [vmem:[#allocation7 + $0x1a0] ss:$16 sps:$4 sm:$0xff]   ;;  %v2166_v57 = vld [vmem:[#allocation7 + $0x1c4] ss:$16 sps:$4 sm:$0xff]   ;;  %v2177_v58 = vld [vmem:[#allocation7 + $0x188] ss:$16 sps:$4 sm:$0xff]  }
  0xed   : > { %790 = vmatprep.subr.bf16.mxu0 %v2112_v18  ;;  %833 = vmatprep.subr.bf16.mxu1 %v2132_v24  ;;  %v2178_v59 = vld [vmem:[#allocation7 + $0x1ac] ss:$16 sps:$4 sm:$0xff]   ;;  %v2170_v60 = vld [vmem:[#allocation7 + $0x1c0] ss:$16 sps:$4 sm:$0xff]   ;;  %v2172_v61 = vld [vmem:[#allocation7 + $0x1e4] ss:$16 sps:$4 sm:$0xff]  }
  0xee   : > { %v2180_v62 = vld [vmem:[#allocation7 + $0x1a8] ss:$16 sps:$4 sm:$0xff]   ;;  %v2181_v63 = vld [vmem:[#allocation7 + $0x1cc] ss:$16 sps:$4 sm:$0xff]   ;;  %v2176_v0 = vld [vmem:[#allocation7 + $0x1e0] ss:$16 sps:$4 sm:$0xff]  }
  0xef   : > { %v366_v1 = vld [vmem:[%s301_s3] sm:$0xff]  ;;  %v367_v2 = vld [vmem:[%s301_s3 + $0x8] sm:$0xff]  ;;  %p1901_p1 = scmp.ne.s32.totalorder %s3092_s10, 5 }
  0xf0   : > { %791 = vmatpush1.bf16.msra.mxu0 %v2116_v21  ;;  %834 = vmatpush1.bf16.msra.mxu1 %v2135_v27  ;;  %v2183_v3 = vld [vmem:[#allocation7 + $0x1c8] ss:$16 sps:$4 sm:$0xff]   ;;  %v2184_v5 = vld [vmem:[#allocation7 + $0x1ec] ss:$16 sps:$4 sm:$0xff]   ;;  %v2187_v6 = vld [vmem:[#allocation10] ss:$16 sps:$4 sm:$0xff]   ;;  %v437_v7 = vpack.c.bf16 %v367_v2, %v366_v1 }
  0xf1   : > { %792 = vmatprep.subr.bf16.mxu0 %v2118_v22  ;;  %835 = vmatprep.subr.bf16.mxu1 %v2138_v28  ;;  %v2189_v4 = vld [vmem:[#allocation10 + $0x4] ss:$16 sps:$4 sm:$0xff]   ;;  %v2192_v10 = vld [vmem:[#allocation10 + $0xc] ss:$16 sps:$4 sm:$0xff]   ;;  %v2193_v11 = vld [vmem:[#allocation10 + $0x20] ss:$16 sps:$4 sm:$0xff]  }
  0xf2   : > { %v2186_v8 = vld [vmem:[#allocation7 + $0x1e8] ss:$16 sps:$4 sm:$0xff]   ;;  %v2190_v12 = vld [vmem:[#allocation10 + $0x8] ss:$16 sps:$4 sm:$0xff]   ;;  %v2198_v14 = vld [vmem:[#allocation10 + $0x2c] ss:$16 sps:$4 sm:$0xff]  }
  0xf3   : > { %v2195_v9 = vld [vmem:[#allocation10 + $0x24] ss:$16 sps:$4 sm:$0xff]   ;;  %v2199_v15 = vld [vmem:[#allocation10 + $0x40] ss:$16 sps:$4 sm:$0xff]   ;;  %v2196_v16 = vld [vmem:[#allocation10 + $0x28] ss:$16 sps:$4 sm:$0xff]  }
  0xf4   : > { %793 = vmatpush1.bf16.msra.mxu0 %v2122_v25  ;;  %836 = vmatpush1.bf16.msra.mxu1 %v2141_v31  ;;  %v2201_v13 = vld [vmem:[#allocation10 + $0x44] ss:$16 sps:$4 sm:$0xff]   ;;  %v2204_v18 = vld [vmem:[#allocation10 + $0x4c] ss:$16 sps:$4 sm:$0xff]   ;;  %v2205_v19 = vld [vmem:[#allocation10 + $0x60] ss:$16 sps:$4 sm:$0xff]  }
  0xf5   : > { %794 = vmatprep.subr.bf16.mxu0 %v2124_v26  ;;  %837 = vmatprep.subr.bf16.mxu1 %v2144_v32  ;;  %v2207_v17 = vld [vmem:[#allocation10 + $0x64] ss:$16 sps:$4 sm:$0xff]   ;;  %v2202_v20 = vld [vmem:[#allocation10 + $0x48] ss:$16 sps:$4 sm:$0xff]   ;;  %v2210_v21 = vld [vmem:[#allocation10 + $0x6c] ss:$16 sps:$4 sm:$0xff]  }
  0xf6   : > { %v2208_v22 = vld [vmem:[#allocation10 + $0x68] ss:$16 sps:$4 sm:$0xff]   ;;  %v2213_v23 = vld [vmem:[#allocation10 + $0x84] ss:$16 sps:$4 sm:$0xff]   ;;  %v2216_v24 = vld [vmem:[#allocation10 + $0x8c] ss:$16 sps:$4 sm:$0xff]  }
  0xf7   : > { %v2211_v25 = vld [vmem:[#allocation10 + $0x80] ss:$16 sps:$4 sm:$0xff]   ;;  %v2214_v26 = vld [vmem:[#allocation10 + $0x88] ss:$16 sps:$4 sm:$0xff]   ;;  %v2219_v27 = vld [vmem:[#allocation10 + $0xa4] ss:$16 sps:$4 sm:$0xff]  }
  0xf8   : > { %795 = vmatpush1.bf16.msra.mxu0 %v2128_v29  ;;  %838 = vmatpush1.bf16.msra.mxu1 %v2147_v35  ;;  %v2222_v28 = vld [vmem:[#allocation10 + $0xac] ss:$16 sps:$4 sm:$0xff]   ;;  %v2217_v29 = vld [vmem:[#allocation10 + $0xa0] ss:$16 sps:$4 sm:$0xff]   ;;  %v2225_v31 = vld [vmem:[#allocation10 + $0xc4] ss:$16 sps:$4 sm:$0xff]  }
  0xf9   : > { %796 = vmatprep.subr.bf16.mxu0 %v2130_v30  ;;  %839 = vmatprep.subr.bf16.mxu1 %v2150_v36  ;;  %v2220_v30 = vld [vmem:[#allocation10 + $0xa8] ss:$16 sps:$4 sm:$0xff]   ;;  %v2228_v32 = vld [vmem:[#allocation10 + $0xcc] ss:$16 sps:$4 sm:$0xff]   ;;  %v2231_v35 = vld [vmem:[#allocation10 + $0xe4] ss:$16 sps:$4 sm:$0xff]  }
  0xfa   : > { %v2234_v36 = vld [vmem:[#allocation10 + $0xec] ss:$16 sps:$4 sm:$0xff]   ;;  %v2235_v41 = vld [vmem:[#allocation10 + $0x100] ss:$16 sps:$4 sm:$0xff]   ;;  %v2244_v46 = vld [vmem:[#allocation10 + $0x128] ss:$16 sps:$4 sm:$0xff]  }
  0xfb   : > { %v2246_v44 = vld [vmem:[#allocation10 + $0x12c] ss:$16 sps:$4 sm:$0xff]   ;;  %v2271_v1 = vld [vmem:[#allocation10 + $0x1c0] ss:$16 sps:$4 sm:$0xff]   ;;  %v2274_v2 = vld [vmem:[#allocation10 + $0x1c8] ss:$16 sps:$4 sm:$0xff]  }
  0xfc   : > { %797 = vmatpush1.bf16.msra.mxu0 %v2134_v33  ;;  %840 = vmatpush1.bf16.msra.mxu1 %v2153_v39  ;;  %v2223_v33 = vld [vmem:[#allocation10 + $0xc0] ss:$16 sps:$4 sm:$0xff]   ;;  %v2237_v39 = vld [vmem:[#allocation10 + $0x104] ss:$16 sps:$4 sm:$0xff]  }
  0xfd   : > { %798 = vmatprep.subr.bf16.mxu0 %v2136_v34  ;;  %841 = vmatprep.subr.bf16.mxu1 %v2156_v40  ;;  %v2226_v34 = vld [vmem:[#allocation10 + $0xc8] ss:$16 sps:$4 sm:$0xff]   ;;  %v2240_v40 = vld [vmem:[#allocation10 + $0x10c] ss:$16 sps:$4 sm:$0xff]  }
 0x100   : > { %799 = vmatpush1.bf16.msra.mxu0 %v2140_v37  ;;  %842 = vmatpush1.bf16.msra.mxu1 %v2159_v45  ;;  %v2229_v37 = vld [vmem:[#allocation10 + $0xe0] ss:$16 sps:$4 sm:$0xff]  }
 0x101   : > { %800 = vmatprep.subr.bf16.mxu0 %v2142_v38  ;;  %843 = vmatprep.subr.bf16.mxu1 %v2162_v47  ;;  %v2232_v38 = vld [vmem:[#allocation10 + $0xe8] ss:$16 sps:$4 sm:$0xff]   ;;  %v2241_v45 = vld [vmem:[#allocation10 + $0x120] ss:$16 sps:$4 sm:$0xff]   ;;  %v2249_v47 = vld [vmem:[#allocation10 + $0x144] ss:$16 sps:$4 sm:$0xff]  }
 0x104   : > { %801 = vmatpush1.bf16.msra.mxu0 %v2146_v42  ;;  %844 = vmatpush1.bf16.msra.mxu1 %v2165_v50  ;;  %v2238_v42 = vld [vmem:[#allocation10 + $0x108] ss:$16 sps:$4 sm:$0xff]  }
 0x105   : > { %802 = vmatprep.subr.bf16.mxu0 %v2148_v43  ;;  %845 = vmatprep.subr.bf16.mxu1 %v2168_v51  ;;  %v2243_v43 = vld [vmem:[#allocation10 + $0x124] ss:$16 sps:$4 sm:$0xff]   ;;  %v2250_v50 = vld [vmem:[#allocation10 + $0x148] ss:$16 sps:$4 sm:$0xff]  }
 0x106   : > { %v2255_v51 = vld [vmem:[#allocation10 + $0x164] ss:$16 sps:$4 sm:$0xff]  }
 0x108   : > { %803 = vmatpush1.bf16.msra.mxu0 %v2152_v48  ;;  %846 = vmatpush1.bf16.msra.mxu1 %v2171_v54  ;;  %v2252_v48 = vld [vmem:[#allocation10 + $0x14c] ss:$16 sps:$4 sm:$0xff]   ;;  %v2256_v54 = vld [vmem:[#allocation10 + $0x168] ss:$16 sps:$4 sm:$0xff]  }
 0x109   : > { %804 = vmatprep.subr.bf16.mxu0 %v2154_v49  ;;  %847 = vmatprep.subr.bf16.mxu1 %v2174_v55  ;;  %v2247_v49 = vld [vmem:[#allocation10 + $0x140] ss:$16 sps:$4 sm:$0xff]   ;;  %v2261_v55 = vld [vmem:[#allocation10 + $0x184] ss:$16 sps:$4 sm:$0xff]  }
 0x10c   : > { %805 = vmatpush1.bf16.msra.mxu0 %v2158_v52  ;;  %848 = vmatpush1.bf16.msra.mxu1 %v2177_v58  ;;  %v2258_v52 = vld [vmem:[#allocation10 + $0x16c] ss:$16 sps:$4 sm:$0xff]   ;;  %v2262_v58 = vld [vmem:[#allocation10 + $0x188] ss:$16 sps:$4 sm:$0xff]  }
 0x10d   : > { %806 = vmatprep.subr.bf16.mxu0 %v2160_v53  ;;  %849 = vmatprep.subr.bf16.mxu1 %v2178_v59  ;;  %v2253_v53 = vld [vmem:[#allocation10 + $0x160] ss:$16 sps:$4 sm:$0xff]  }
 0x10e   : > { %v2265_v59 = vld [vmem:[#allocation10 + $0x1a0] ss:$16 sps:$4 sm:$0xff]  }
 0x110   : > { %807 = vmatpush1.bf16.msra.mxu0 %v2164_v56  ;;  %850 = vmatpush1.bf16.msra.mxu1 %v2180_v62  ;;  %v2264_v56 = vld [vmem:[#allocation10 + $0x18c] ss:$16 sps:$4 sm:$0xff]  }
 0x111   : > { %808 = vmatprep.subr.bf16.mxu0 %v2166_v57  ;;  %851 = vmatprep.subr.bf16.mxu1 %v2181_v63  ;;  %v2259_v57 = vld [vmem:[#allocation10 + $0x180] ss:$16 sps:$4 sm:$0xff]   ;;  %v2270_v62 = vld [vmem:[#allocation10 + $0x1ac] ss:$16 sps:$4 sm:$0xff]   ;;  %v2273_v63 = vld [vmem:[#allocation10 + $0x1c4] ss:$16 sps:$4 sm:$0xff]  }
 0x114   : > { %809 = vmatpush1.bf16.msra.mxu0 %v2170_v60  ;;  %852 = vmatpush1.bf16.msra.mxu1 %v2183_v3  ;;  %v2267_v60 = vld [vmem:[#allocation10 + $0x1a4] ss:$16 sps:$4 sm:$0xff]   ;;  %v984_v3 = vld [vmem:[#allocation2 + $0x10] sm:$0xff] }
 0x115   : > { %810 = vmatprep.subr.bf16.mxu0 %v2172_v61  ;;  %853 = vmatprep.subr.bf16.mxu1 %v2184_v5  ;;  %v2268_v61 = vld [vmem:[#allocation10 + $0x1a8] ss:$16 sps:$4 sm:$0xff]   ;;  %v2279_v5 = vld [vmem:[#allocation10 + $0x1e4] ss:$16 sps:$4 sm:$0xff]  }
 0x118   : > { %811 = vmatpush1.bf16.msra.mxu0 %v2176_v0  ;;  %854 = vmatpush1.bf16.msra.mxu1 %v2186_v8  ;;  %v2276_v0 = vld [vmem:[#allocation10 + $0x1cc] ss:$16 sps:$4 sm:$0xff]   ;;  %v2277_v8 = vld [vmem:[#allocation10 + $0x1e0] ss:$16 sps:$4 sm:$0xff]  }
 0x119   : > { %1332 = vmatprep.subr.bf16.mxu0 %v2189_v4  ;;  %1375 = vmatprep.subr.bf16.mxu1 %v2192_v10  ;;  %v985_v4 = vld [vmem:[#allocation2 + $0x18] sm:$0xff]  ;;  %v440_v10 = vlaneseq }
 0x11b   : > { %813 = vmatmul.mubr.bf16.vlgmr.msra.gmra.mrb[0].mxu0 %v437_v7  ;;  %856 = vmatmul.mubr.bf16.vlgmr.msra.gmra.mrb[0].mxu1 %v437_v7  ;;  %v990_v7 = vpack.c.bf16 %v985_v4, %v984_v3 }
 0x11c   : > { %1333 = vmatpush1.bf16.msra.mxu0 %v2187_v6  ;;  %1376 = vmatpush1.bf16.msra.mxu1 %v2190_v12  ;;  %v2282_v6 = vld [vmem:[#allocation10 + $0x1ec] ss:$16 sps:$4 sm:$0xff]  }
 0x11d   : > { %1334 = vmatprep.subr.bf16.mxu0 %v2195_v9  ;;  %1377 = vmatprep.subr.bf16.mxu1 %v2198_v14  ;;  %v2280_v9 = vld [vmem:[#allocation10 + $0x1e8] ss:$16 sps:$4 sm:$0xff]  }
 0x11e   : > { %1364 = vmatprep.mubr.bf16.mxu0 %v990_v7  ;;  %1407 = vmatprep.mubr.bf16.mxu1 %v990_v7 }
 0x120   : > { %1335 = vmatpush1.bf16.msra.mxu0 %v2193_v11  ;;  %1378 = vmatpush1.bf16.msra.mxu1 %v2196_v16  ;;  %v2937_v11 = vshrl.u32 %v440_v10, 7 }
 0x121   : > { %1336 = vmatprep.subr.bf16.mxu0 %v2201_v13  ;;  %1379 = vmatprep.subr.bf16.mxu1 %v2204_v18  ;;  %v432_v13 = vld [vmem:[#allocation9] sm:$0xf] }
 0x122   : > { %v442_v12 = vsub.s32 0, %v2937_v11  ;;  %v446_v14 = vsub.s32 1, %v2937_v11 }
 0x124   : > { %1337 = vmatpush1.bf16.msra.mxu0 %v2199_v15  ;;  %1380 = vmatpush1.bf16.msra.mxu1 %v2202_v20  ;;  %v443_v15 = vrot.slane %v432_v13, %v442_v12  ;;  %v447_v16 = vrot.slane %v432_v13, %v446_v14 }
 0x125   : > { %1338 = vmatprep.subr.bf16.mxu0 %v2207_v17  ;;  %1381 = vmatprep.subr.bf16.mxu1 %v2210_v21  ;;  %v454_v17 = vsub.s32 3, %v2937_v11 }
 0x128   : > { %1339 = vmatpush1.bf16.msra.mxu0 %v2205_v19  ;;  %1382 = vmatpush1.bf16.msra.mxu1 %v2208_v22 }
 0x129   : > { %1340 = vmatprep.subr.bf16.mxu0 %v2213_v23  ;;  %1383 = vmatprep.subr.bf16.mxu1 %v2216_v24  ;;  %v450_v23 = vsub.s32 2, %v2937_v11 }
 0x12c   : > { %1341 = vmatpush1.bf16.msra.mxu0 %v2211_v25  ;;  %1384 = vmatpush1.bf16.msra.mxu1 %v2214_v26 }
 0x12d   : > { %1342 = vmatprep.subr.bf16.mxu0 %v2219_v27  ;;  %1385 = vmatprep.subr.bf16.mxu1 %v2222_v28  ;;  %v455_v27 = vrot.slane %v432_v13, %v454_v17 }
 0x130   : > { %1343 = vmatpush1.bf16.msra.mxu0 %v2217_v29  ;;  %1386 = vmatpush1.bf16.msra.mxu1 %v2220_v30 }
 0x131   : > { %1344 = vmatprep.subr.bf16.mxu0 %v2225_v31  ;;  %1387 = vmatprep.subr.bf16.mxu1 %v2228_v32 }
 0x134   : > { %1345 = vmatpush1.bf16.msra.mxu0 %v2223_v33  ;;  %1388 = vmatpush1.bf16.msra.mxu1 %v2226_v34  ;;  %v451_v33 = vrot.slane %v432_v13, %v450_v23 }
 0x135   : > { %1346 = vmatprep.subr.bf16.mxu0 %v2231_v35  ;;  %1389 = vmatprep.subr.bf16.mxu1 %v2234_v36 }
 0x138   : > { %1347 = vmatpush1.bf16.msra.mxu0 %v2229_v37  ;;  %1390 = vmatpush1.bf16.msra.mxu1 %v2232_v38 }
 0x139   : > { %1348 = vmatprep.subr.bf16.mxu0 %v2237_v39  ;;  %1391 = vmatprep.subr.bf16.mxu1 %v2240_v40 }
 0x13c   : > { %1349 = vmatpush1.bf16.msra.mxu0 %v2235_v41  ;;  %1392 = vmatpush1.bf16.msra.mxu1 %v2238_v42 }
 0x13d   : > { %1350 = vmatprep.subr.bf16.mxu0 %v2243_v43  ;;  %1393 = vmatprep.subr.bf16.mxu1 %v2246_v44 }
 0x140   : > { %1351 = vmatpush1.bf16.msra.mxu0 %v2241_v45  ;;  %1394 = vmatpush1.bf16.msra.mxu1 %v2244_v46 }
 0x141   : > { %1352 = vmatprep.subr.bf16.mxu0 %v2249_v47  ;;  %1395 = vmatprep.subr.bf16.mxu1 %v2252_v48 }
 0x144   : > { %1353 = vmatpush1.bf16.msra.mxu0 %v2247_v49  ;;  %1396 = vmatpush1.bf16.msra.mxu1 %v2250_v50 }
 0x145   : > { %1354 = vmatprep.subr.bf16.mxu0 %v2255_v51  ;;  %1397 = vmatprep.subr.bf16.mxu1 %v2258_v52 }
 0x148   : > { %1355 = vmatpush1.bf16.msra.mxu0 %v2253_v53  ;;  %1398 = vmatpush1.bf16.msra.mxu1 %v2256_v54 }
 0x149   : > { %1356 = vmatprep.subr.bf16.mxu0 %v2261_v55  ;;  %1399 = vmatprep.subr.bf16.mxu1 %v2264_v56  ;;  %v435_v55 = vld [vmem:[#allocation3] sm:$0xff] }
 0x14c   : > { %1357 = vmatpush1.bf16.msra.mxu0 %v2259_v57  ;;  %1400 = vmatpush1.bf16.msra.mxu1 %v2262_v58 }
 0x14d   : > { %1358 = vmatprep.subr.bf16.mxu0 %v2267_v60  ;;  %1401 = vmatprep.subr.bf16.mxu1 %v2270_v62 }
 0x150   : > { %1359 = vmatpush1.bf16.msra.mxu0 %v2265_v59  ;;  %1402 = vmatpush1.bf16.msra.mxu1 %v2268_v61  ;;  %v436_v59 = vld [vmem:[#allocation3 + $0x8] sm:$0xff] }
 0x151   : > { %1360 = vmatprep.subr.bf16.mxu0 %v2273_v63  ;;  %1403 = vmatprep.subr.bf16.mxu1 %v2276_v0 }
 0x154   : > { %1361 = vmatpush1.bf16.msra.mxu0 %v2271_v1  ;;  %1404 = vmatpush1.bf16.msra.mxu1 %v2274_v2 }
 0x155   : > { %1362 = vmatprep.subr.bf16.mxu0 %v2279_v5  ;;  %1405 = vmatprep.subr.bf16.mxu1 %v2282_v6 }
 0x158   : > { %1363 = vmatpush1.bf16.msra.mxu0 %v2277_v8  ;;  %1406 = vmatpush1.bf16.msra.mxu1 %v2280_v9 }
 0x1ee   : > { %v814_v18 = vpop.f32.mrb[0].mxu0  ;;  %v857_v31 = vpop.f32.mrb[0].mxu1 }
 0x1ef   : > { %v815_v19 = vadd.f32 %v814_v18, %v443_v15  ;;  %v816_v20 = vpop.f32.mrb[1].mxu0  ;;  %v859_v34 = vpop.f32.mrb[1].mxu1  ;;  %v858_v39 = vadd.f32 %v857_v31, %v451_v33 }
 0x1f0   : > { %v817_v21 = vadd.f32 %v816_v20, %v447_v16  ;;  %v818_v22 = vpop.f32.mrb[2].mxu0  ;;  %v860_v35 = vadd.f32 %v859_v34, %v455_v27  ;;  %v861_v36 = vpop.f32.mrb[2].mxu1 }
 0x1f1   : > { %v1825_v24 = vmul.f32 -1.442695, %v815_v19  ;;  %v819_v25 = vadd.f32 %v818_v22, %v443_v15  ;;  %v820_v26 = vpop.f32.mrb[3].mxu0  ;;  %v863_v37 = vpop.f32.mrb[3].mxu1  ;;  %v862_v41 = vadd.f32 %v861_v36, %v451_v33  ;;  %v982_v15 = vld [vmem:[#allocation12] sm:$0xf] }
 0x1f2   : > { %v1827_v28 = vmul.f32 -1.442695, %v817_v21  ;;  %v821_v29 = vadd.f32 %v820_v26, %v447_v16  ;;  %v864_v38 = vadd.f32 %v863_v37, %v455_v27  ;;  %v1829_v40 = vmul.f32 -1.442695, %v860_v35 }
 0x1f3   : > { %2283 = vpow2.f32 %v1825_v24  ;;  %v1826_v30 = vmul.f32 -1.442695, %v819_v25  ;;  %v995_v16 = vrot.slane %v982_v15, %v442_v12  ;;  %v999_v18 = vrot.slane %v982_v15, %v446_v14 }
 0x1f4   : > { %2285 = vpow2.f32 %v1827_v28  ;;  %v1828_v32 = vmul.f32 -1.442695, %v821_v29  ;;  %v1830_v42 = vmul.f32 -1.442695, %v864_v38  ;;  %v1007_v33 = vrot.slane %v982_v15, %v454_v17 }
 0x1f5   : > { %2287 = vpow2.f32 %v1826_v30  ;;  %v1003_v35 = vrot.slane %v982_v15, %v450_v23 }
 0x1f6   : > { %2289 = vpow2.f32 %v1828_v32 }
 0x1f7   : > { %2291 = vtanh.f32 %v858_v39 }
 0x1f8   : > { %2293 = vpow2.f32 %v1829_v40 }
 0x1f9   : > { %2295 = vtanh.f32 %v862_v41 }
 0x1fa   : > { %2297 = vpow2.f32 %v1830_v42 }
 0x1fd   : > { %v2284_v43 = vpop.eup %2283 }
 0x1fe   : > { %v2286_v44 = vpop.eup %2285  ;;  %v872_v45 = vadd.f32 1.0, %v2284_v43 }
 0x1ff   : > { %v2288_v46 = vpop.eup %2287  ;;  %v884_v47 = vadd.f32 1.0, %v2286_v44 }
 0x200   : > { %v2290_v48 = vpop.eup %2289  ;;  %2299 = vrcp.f32 %v872_v45  ;;  %v873_v49 = vadd.f32 1.0, %v2288_v46 }
 0x201   : > { %2301 = vrcp.f32 %v884_v47  ;;  %v885_v50 = vadd.f32 1.0, %v2290_v48  ;;  %v2292_v51 = vpop.eup %2291 }
 0x202   : > { %2303 = vrcp.f32 %v873_v49  ;;  %v2294_v52 = vpop.eup %2293 }
 0x203   : > { %2305 = vrcp.f32 %v885_v50  ;;  %v2296_v53 = vpop.eup %2295  ;;  %v898_v57 = vadd.f32 1.0, %v2294_v52  ;;  %v987_v50 = vld [vmem:[#allocation3 + $0x10] sm:$0xff] }
 0x204   : > { %v2298_v54 = vpop.eup %2297 }
 0x205   : > { %v899_v1 = vadd.f32 1.0, %v2298_v54  ;;  %2307 = vrcp.f32 %v898_v57 }
 0x20a   : > { %v2300_v56 = vpop.eup %2299 }
 0x20b   : > { %v2302_v58 = vpop.eup %2301  ;;  %v906_v60 = vmul.f32 %v2300_v56, %v2292_v51 }
 0x20c   : > { %v2304_v61 = vpop.eup %2303  ;;  %v904_v62 = vmul.f32 %v2302_v58, %v435_v55  ;;  %v988_v58 = vld [vmem:[#allocation3 + $0x18] sm:$0xff] }
 0x20d   : > { %v2306_v63 = vpop.eup %2305  ;;  %v907_v0 = vmul.f32 %v2304_v61, %v2296_v53 }
 0x20e   : > { %v905_v2 = vmul.f32 %v2306_v63, %v436_v59  ;;  %v908_v3 = vadd.f32 %v906_v60, %v904_v62 }
 0x20f   : > { %v2308_v5 = vpop.eup %2307 }
 0x210   : > { %2309 = vtanh.f32 %v908_v3  ;;  %916 = vst [vmem:[#allocation3] sm:$0xff] %v908_v3  ;;  %v909_v4 = vadd.f32 %v907_v0, %v905_v2 }
 0x211   : > { %2311 = vrcp.f32 %v899_v1 }
 0x212   : > { %2313 = vtanh.f32 %v909_v4  ;;  %917 = vst [vmem:[#allocation3 + $0x8] sm:$0xff] %v909_v4 }
 0x219   : > { %v1483_v15 = vld [vmem:[#allocation3 + $0x8] sm:$0xff] (!%p1901_p1) }
 0x21a   : > { %v2310_v6 = vpop.eup %2309  ;;  %1487 = vst [vmem:[%s2930_s11 + $0x8] sm:$0xff] (!%p1901_p1), %v1483_v15 }
 0x21b   : > { %v2312_v7 = vpop.eup %2311  ;;  %v912_v8 = vmul.f32 %v2310_v6, %v2308_v5 }
 0x21c   : > { %v2314_v9 = vpop.eup %2313 }
 0x21d   : > { %v913_v10 = vmul.f32 %v2314_v9, %v2312_v7  ;;  %914 = vst [vmem:[#allocation2] sm:$0xff] %v912_v8 }
 0x21f   : > { %915 = vst [vmem:[#allocation2 + $0x8] sm:$0xff] %v913_v10  ;;  %v989_v13 = vpack.c.bf16 %v913_v10, %v912_v8 }
 0x221   : > { %1365 = vmatmul.mubr.bf16.vlgmr.msra.gmra.mrb[4].mxu0 %v989_v13  ;;  %1408 = vmatmul.mubr.bf16.vlgmr.msra.gmra.mrb[4].mxu1 %v989_v13  ;;  %v1482_v13 = vld [vmem:[#allocation3] sm:$0xff] (!%p1901_p1) }
 0x222   : > { %1486 = vst [vmem:[%s2930_s11] sm:$0xff] (!%p1901_p1), %v1482_v13 }
 0x224   : > { %v1474_v7 = vld [vmem:[#allocation2] sm:$0xff] (!%p1901_p1) }
 0x225   : > { %1478 = vst [vmem:[%s2928_s16] sm:$0xff] (!%p1901_p1), %v1474_v7 }
 0x226   : > { %v1475_v8 = vld [vmem:[#allocation2 + $0x8] sm:$0xff] (!%p1901_p1) }
 0x227   : > { %1479 = vst [vmem:[%s2928_s16 + $0x8] sm:$0xff] (!%p1901_p1), %v1475_v8 }
 0x2f4   : > { %v1366_v19 = vpop.f32.mrb[4].mxu0  ;;  %v1409_v20 = vpop.f32.mrb[4].mxu1 }
 0x2f5   : > { %v1367_v21 = vadd.f32 %v1366_v19, %v995_v16  ;;  %v1368_v22 = vpop.f32.mrb[5].mxu0  ;;  %v1411_v24 = vpop.f32.mrb[5].mxu1  ;;  %v1410_v37 = vadd.f32 %v1409_v20, %v1003_v35 }
 0x2f6   : > { %v1369_v25 = vadd.f32 %v1368_v22, %v999_v18  ;;  %v1370_v26 = vpop.f32.mrb[6].mxu0  ;;  %v1413_v27 = vpop.f32.mrb[6].mxu1  ;;  %v1412_v36 = vadd.f32 %v1411_v24, %v1007_v33 }
 0x2f7   : > { %v1895_v28 = vmul.f32 -1.442695, %v1367_v21  ;;  %v1371_v29 = vadd.f32 %v1370_v26, %v995_v16  ;;  %v1372_v30 = vpop.f32.mrb[7].mxu0  ;;  %v1415_v31 = vpop.f32.mrb[7].mxu1  ;;  %v1414_v40 = vadd.f32 %v1413_v27, %v1003_v35 }
 0x2f8   : > { %v1897_v32 = vmul.f32 -1.442695, %v1369_v25  ;;  %v1373_v12 = vadd.f32 %v1372_v30, %v999_v18  ;;  %v1899_v38 = vmul.f32 -1.442695, %v1412_v36  ;;  %v1416_v39 = vadd.f32 %v1415_v31, %v1007_v33 }
 0x2f9   : > { %2315 = vpow2.f32 %v1895_v28  ;;  %v1896_v34 = vmul.f32 -1.442695, %v1371_v29 }
 0x2fa   : > { %2317 = vpow2.f32 %v1897_v32  ;;  %v1898_v14 = vmul.f32 -1.442695, %v1373_v12  ;;  %v1900_v17 = vmul.f32 -1.442695, %v1416_v39 }
 0x2fb   : > { %2319 = vpow2.f32 %v1896_v34 }
 0x2fc   : > { %2321 = vpow2.f32 %v1898_v14 }
 0x2fd   : > { %2323 = vtanh.f32 %v1410_v37 }
 0x2fe   : > { %2325 = vpow2.f32 %v1899_v38 }
 0x2ff   : > { %2327 = vtanh.f32 %v1414_v40 }
 0x303   : > { %v2316_v41 = vpop.eup %2315 }
 0x304   : > { %v2318_v42 = vpop.eup %2317  ;;  %v1424_v43 = vadd.f32 1.0, %v2316_v41 }
 0x305   : > { %v1436_v44 = vadd.f32 1.0, %v2318_v42  ;;  %v2320_v45 = vpop.eup %2319 }
 0x306   : > { %2329 = vrcp.f32 %v1424_v43  ;;  %v1425_v11 = vadd.f32 1.0, %v2320_v45  ;;  %v2322_v23 = vpop.eup %2321 }
 0x307   : > { %2331 = vrcp.f32 %v1436_v44  ;;  %v1437_v46 = vadd.f32 1.0, %v2322_v23  ;;  %v2324_v47 = vpop.eup %2323 }
 0x308   : > { %2333 = vpow2.f32 %v1900_v17  ;;  %v2326_v48 = vpop.eup %2325 }
 0x309   : > { %2335 = vrcp.f32 %v1425_v11  ;;  %v2328_v49 = vpop.eup %2327  ;;  %v1450_v54 = vadd.f32 1.0, %v2326_v48 }
 0x30a   : > { %2337 = vrcp.f32 %v1437_v46 }
 0x30b   : > { %2339 = vrcp.f32 %v1450_v54 }
 0x310   : > { %v2330_v51 = vpop.eup %2329 }
 0x311   : > { %v2332_v52 = vpop.eup %2331  ;;  %v1458_v53 = vmul.f32 %v2330_v51, %v2324_v47 }
 0x312   : > { %v2334_v55 = vpop.eup %2333  ;;  %v1456_v56 = vmul.f32 %v2332_v52, %v987_v50 }
 0x313   : > { %v2336_v57 = vpop.eup %2335  ;;  %v1451_v62 = vadd.f32 1.0, %v2334_v55 }
 0x314   : > { %v1460_v59 = vadd.f32 %v1458_v53, %v1456_v56  ;;  %v1459_v60 = vmul.f32 %v2336_v57, %v2328_v49  ;;  %v2338_v61 = vpop.eup %2337 }
 0x315   : > { %v1457_v63 = vmul.f32 %v2338_v61, %v988_v58  ;;  %v2340_v1 = vpop.eup %2339 }
 0x316   : > { %2341 = vtanh.f32 %v1460_v59  ;;  %1468 = vst [vmem:[#allocation3 + $0x10] sm:$0xff] %v1460_v59 }
 0x317   : > { %v1461_v0 = vadd.f32 %v1459_v60, %v1457_v63  ;;  %2343 = vrcp.f32 %v1451_v62 }
 0x319   : > { %2345 = vtanh.f32 %v1461_v0  ;;  %1469 = vst [vmem:[#allocation3 + $0x18] sm:$0xff] %v1461_v0 }
 0x31d   : > { %v1484_v16 = vld [vmem:[#allocation3 + $0x10] sm:$0xff] (!%p1901_p1) }
 0x31e   : > { %1488 = vst [vmem:[%s2930_s11 + $0x10] sm:$0xff] (!%p1901_p1), %v1484_v16 }
 0x320   : > { %v2342_v2 = vpop.eup %2341  ;;  %1473 = sbr.rel (%p1901_p1) target bundleno = 815 (0x32f), region = 68  ;;  %v1485_v18 = vld [vmem:[#allocation3 + $0x18] sm:$0xff] (!%p1901_p1) }
 0x321   : > { %v1464_v3 = vmul.f32 %v2342_v2, %v2340_v1  ;;  %v2344_v4 = vpop.eup %2343  ;;  %1489 = vst [vmem:[%s2930_s11 + $0x18] sm:$0xff] (!%p1901_p1), %v1485_v18 }
 0x323   : > { %1466 = vst [vmem:[#allocation2 + $0x10] sm:$0xff] %v1464_v3  ;;  %v2346_v5 = vpop.eup %2345 }
 0x324   : > { %v1465_v6 = vmul.f32 %v2346_v5, %v2344_v4 }
 0x326   : > { %1467 = vst [vmem:[#allocation2 + $0x18] sm:$0xff] %v1465_v6 }
 0x32a   : > { %v1476_v9 = vld [vmem:[#allocation2 + $0x10] sm:$0xff] }
 0x32b   : > { %1480 = vst [vmem:[%s2928_s16 + $0x10] sm:$0xff] %v1476_v9 }
 0x32d   : > { %v1477_v10 = vld [vmem:[#allocation2 + $0x18] sm:$0xff] }
 0x32e   : > { %1481 = vst [vmem:[%s2928_s16 + $0x18] sm:$0xff] %v1477_v10 }
 0x32f PF: > { %s1491_s19 = scalar_lea.sflag [#allocation6], %s2925_s14  ;;  %s1496_s4 = scalar_lea.sflag [#allocation15], %s2925_s14 }
 0x330   : > { %s3093_s8 = sld [smem:[#allocation27_spill]]  ;;  %s3094_s27 = sld [smem:[#allocation28_spill]] }
 0x331   : > { %s1525_s24 = sshll.u32 %s2928_s16, 4  ;;  %s3095_s18 = sld [smem:[#allocation35_spill]]  ;;  %s1526_s24 = int_to_ptr.vmem [resolvable:$true] %s1525_s24 }
 0x332   : > { %s2607_s12 = smov 256   ;;  %s2608_s1 = smov 512  }
 0x333   : > { %s2609_s2 = smov 2   ;;  %s2610_s3 = smov 128  }
 0x334   : > { %s2611_s15 = smov 8   ;;  %s2612_s16 = smov [#allocation16]  }
 0x335   : > { %s2613_s5 = smov 0  }
 0x336   : > { %s1910_s13 = sshll.u32 %s3093_s8, 8  ;;  %p3096_p4 = scmp.ne.s32.totalorder %s3094_s27, 0 }
 0x337   : > { %s1508_s20 = scalar_lea.hbm %s3095_s18, %s1910_s13 }
 0x338   : > { %1930 = sst [smem:[#allocation17]] (%p3096_p4), %s2607_s12 }
 0x339   : > { %1931 = sst [smem:[#allocation17 + $0x1]] (%p3096_p4), %s2608_s1 }
 0x33a   : > { %1932 = sst [smem:[#allocation17 + $0x2]] (%p3096_p4), %s2609_s2 }
 0x33b   : > { %1933 = sst [smem:[#allocation17 + $0x3]] (%p3096_p4), %s2610_s3 }
 0x33c   : > { %1934 = sst [smem:[#allocation17 + $0x4]] (%p3096_p4), %s2610_s3 }
 0x33d   : > { %1935 = sst [smem:[#allocation17 + $0x5]] (%p3096_p4), %s2611_s15 }
 0x33e   : > { %1936 = dma.general (%p3096_p4), %s1526_s24, 512, %s1508_s20, %s1491_s19, %s2612_s16, [#allocation17], %s2613_s5, 0  }
 0x33f   : > { %s3097_s6 = sld [smem:[#allocation36_spill]]  ;;  %s1570_s18 = sshll.u32 %s2930_s11, 4  ;;  %s1571_s18 = int_to_ptr.vmem [resolvable:$true] %s1570_s18 }
 0x340   : > { %s2614_s12 = smov 256   ;;  %s2615_s1 = smov 512  }
 0x341   : > { %1937 = sst [smem:[#allocation19]] (%p3096_p4), %s2614_s12  ;;  %s2616_s19 = smov 2  }
 0x342   : > { %1938 = sst [smem:[#allocation19 + $0x1]] (%p3096_p4), %s2615_s1  ;;  %s2617_s24 = smov 128  }
 0x343   : > { %1939 = sst [smem:[#allocation19 + $0x2]] (%p3096_p4), %s2616_s19  ;;  %s2618_s20 = smov 8  }
 0x344   : > { %1940 = sst [smem:[#allocation19 + $0x3]] (%p3096_p4), %s2617_s24  ;;  %s2620_s11 = smov 0  }
 0x345   : > { %s1553_s28 = scalar_lea.hbm %s3097_s6, %s1910_s13  ;;  %1941 = sst [smem:[#allocation19 + $0x4]] (%p3096_p4), %s2617_s24 }
 0x346   : > { %1942 = sst [smem:[#allocation19 + $0x5]] (%p3096_p4), %s2618_s20  ;;  %s2619_s13 = smov [#allocation18]  }
 0x347   : > { %1943 = dma.general (%p3096_p4), %s1571_s18, 512, %s1553_s28, %s1496_s4, %s2619_s13, [#allocation19], %s2620_s11, 0  }
 0x348 PF: > { %s3098_s2 = sld [smem:[#allocation25_spill]]  ;;  %s3099_s3 = sld [smem:[#allocation29_spill]] }
 0x349   : > { %p1979_p6 = scmp.ge.s32.totalorder %s2595_s7, 2 }
 0x34e   : > { %s1598_s15 = sand.u32 1, %s3098_s2   ;;  %p3100_p13 = scmp.ne.s32.totalorder %s3099_s3, 0 }
 0x34f   : > { %s1599_s16 = scalar_lea.sflag [#allocation6], %s1598_s15 }
 0x350   : > { %p1964_p10 = pnand %p1979_p6, %p3100_p13 }
 0x352   : > { %2546 = dma.done.wait (!%p1964_p10), %s1599_s16, 512  }
 0x353   : > { %2548 = vsyncadd (!%p1964_p10), %s1599_s16, 4294966784  ;;  %s1608_s5 = scalar_lea.sflag [#allocation15], %s1598_s15 }
 0x354   : > { %2550 = dma.done.wait (!%p1964_p10), %s1608_s5, 512  }
 0x355   : > { %2552 = vsyncadd (!%p1964_p10), %s1608_s5, 4294966784  ;;  %s28_s7 = sadd.s32 1, %s2595_s7   ;;  %s3101_s14 = smov %s2857_s21 }
 0x356   : > { %p25_p11 = scmp.ge.s32.totalorder %s28_s7, 14   ;;  %s3102_s4 = sld [smem:[#allocation30_spill]] }
 0x357   : > { %s3103_s21 = smov %s2559_s22  ;;  %s3104_s22 = smov %s2563_s23 }
 0x358   : > { %s3105_s23 = smov %s3101_s14  ;;  %s3106_s24 = smov %s2571_s25 }
 0x359   : > { %s3107_s25 = smov %s2575_s26  ;;  %s3108_s26 = smov %s2860_s9 }
 0x35a   : > { %s3109_s27 = smov %s2587_s29  ;;  %s3110_s28 = smov %s2591_s30 }
 0x35b   : > { %s3112_s30 = smov %s3118_s17  ;;  %27 = sbr.rel (!%p25_p11) target bundleno = 20 (0x14), region = 138 }
 0x35c   : > { %s3111_s29 = smov %s3102_s4 }
 0x362   :  { %1613 = vsyncpa [#allocation5], 1 }
 0x363   :  { %1615 = vsyncpa [#allocation5 + $0x1], 1 }
 0x364   :  { %1616 = vsyncpa [#allocation8], 1 }
 0x365   :  { %1617 = vsyncpa [#allocation11], 1 }
 0x366   :  { %1618 = vsyncpa [#allocation6], 1 }
 0x367   :  { %1620 = vsyncpa [#allocation6 + $0x1], 1 }
 0x368   :  { %1621 = vsyncpa [#allocation15], 1 }
 0x369   :  { %1623 = vsyncpa [#allocation15 + $0x1], 1 }

// kernel: _hier_forward_jit.5
= control target key start
LH: loop header
LB: loop body
LE: loop exit
PB: predicated region body
PF: predicated region fallthrough
CT: control target
= control target key end

     0   :  { %s3568_s0 = inlined_call_operand.hbm [shape: s32[7], index: 0, kind: input, shape index: {}]   ;;  %s3569_s1 = inlined_call_operand.hbm [shape: f32[7,8,128], index: 1, kind: input, shape index: {}]   ;;  %s3570_s2 = inlined_call_operand.hbm [shape: f32[2,8,128], index: 2, kind: input, shape index: {}]   ;;  %s3571_s3 = inlined_call_operand.hbm [shape: f32[2,8,128], index: 3, kind: input, shape index: {}]   ;;  %s3572_s4 = inlined_call_operand.hbm [shape: f32[256,128], index: 4, kind: input, shape index: {}]   ;;  %s3573_s5 = inlined_call_operand.hbm [shape: bf16[128,256], index: 5, kind: input, shape index: {}]   ;;  %s3574_s6 = inlined_call_operand.hbm [shape: f32[1,256], index: 6, kind: input, shape index: {}]   ;;  %s3575_s7 = inlined_call_operand.hbm [shape: bf16[256,512], index: 7, kind: input, shape index: {}]   ;;  %s3576_s8 = inlined_call_operand.hbm [shape: f32[1,512], index: 8, kind: input, shape index: {}]   ;;  %s3577_s9 = inlined_call_operand.hbm [shape: bf16[256,512], index: 9, kind: input, shape index: {}]   ;;  %s3578_s10 = inlined_call_operand.hbm [shape: f32[1,512], index: 10, kind: input, shape index: {}]   ;;  %s3579_s11 = inlined_call_operand.hbm [shape: f32[7,8,256], index: 11, kind: output, shape index: {}]  }
   0x1   :  { %3587 = sst [smem:[#allocation34_spill]] %s3570_s2  ;;  %s2663_s19 = scalar_lea.hbm %s3568_s0, 16 }
   0x2   :  { %3588 = sst [smem:[#allocation35_spill]] %s3571_s3  ;;  %p2664_p0 = scmp.ne.s32.totalorder %s3568_s0, %s2663_s19 }
   0x3   :  { %3589 = sst [smem:[#allocation36_spill]] %s3579_s11  ;;  %p2667_p1 = scmp.lt.u32.totalorder %s2663_s19, %s3568_s0 }
   0x5   :  { %p2669_p2 = pnand %p2667_p1, %p2664_p0 }
   0x7   :  { %2672 = shalt.err (!%p2669_p2)  }
   0x8   :  { %s3045_s24 = smov [#allocation6]  }
   0x9   :  { %17 = dma.hbm_to_smem %s3568_s0, 16, %s3045_s24, [#allocation5] }
   0xa   :  { %2999 = dma.done.wait [#allocation5], 16 }
   0xb   :  { %3000 = vsyncadd [#allocation5], 4294967280 }
   0xc   :  { %19 = sfence }
   0xd   :  { %20 = vsyncpa [#allocation8], 0 }
   0xe   :  { %22 = vsyncpa [#allocation8 + $0x1], 0 }
   0xf   :  { %23 = vsyncpa [#allocation11], 0 }
  0x10   :  { %24 = vsyncpa [#allocation14], 0 }
  0x11   :  { %25 = vsyncpa [#allocation17], 0 }
  0x12   :  { %26 = vsyncpa [#allocation20], 0 }
  0x13   :  { %27 = vsyncpa [#allocation23], 0 }
  0x14   :  { %28 = vsyncpa [#allocation9], 0 }
  0x15   :  { %30 = vsyncpa [#allocation9 + $0x1], 0  ;;  %s3136_s27 = smov 0   ;;  %s3138_s28 = smov 0  }
  0x16   :  { %s3140_s29 = smov 0   ;;  %s3142_s30 = smov 0  }
  0x17 LB: > { %s3046_s0 = smov [#allocation10]   ;;  %s3157_s13 = sadd.s32 4294967295, %s3043_s30   ;;  %s3043_s30 = sphi %s3142_s30, %s3621_s30   ;;  %s3039_s29 = sphi %s3140_s29, %s3620_s29   ;;  %s3035_s28 = sphi %s3138_s28, %s3619_s28   ;;  %s3031_s27 = sphi %s3136_s27, %s3618_s27  }
  0x18   : > { %s294_s12 = sshll.u32 %s3046_s0, 4  ;;  %p2017_p3 = scmp.ge.s32.totalorder %s3043_s30, 1  ;;  %s3163_s12 = int_to_ptr.vmem [resolvable:$true] %s294_s12 }
  0x19   : > { %p3584_p4 = scmp.eq.s32.totalorder %s3157_s13, 0  ;;  %p282_p5 = scmp.lt.s32.totalorder %s3043_s30, 8 }
  0x1a   : > { %s3047_s15 = smov [#allocation13]   ;;  %s3048_s18 = smov [#allocation16]  }
  0x1b   : > { %p3165_p7 = pnand %p2017_p3, %p282_p5  ;;  %s320_s16 = sshll.u32 %s3047_s15, 4  ;;  %s3177_s16 = int_to_ptr.vmem [resolvable:$true] %s320_s16 }
  0x1c   : > { %s347_s19 = sshll.u32 %s3048_s18, 4  ;;  %s3593_s2 = sld [smem:[#allocation34_spill]]  ;;  %s3179_s19 = int_to_ptr.vmem [resolvable:$true] %s347_s19 }
  0x1d   : > { %s3590_s14 = scalar_select %p3165_p7, 1, 0 }
  0x1e   : > { %p2310_p8 = pneg %p3165_p7 }
  0x1f   : > { %3591 = sst [smem:[#allocation33_spill]] %s3590_s14 }
  0x20   : > { %p3173_p9 = pnand %p2310_p8, %p3584_p4 }
  0x22   : > { %s2673_s22 = scalar_lea.hbm %s3593_s2, 256  ;;  %p3189_p11 = pneg %p3173_p9 }
  0x23   : > { %p2674_p10 = scmp.ne.s32.totalorder %s3593_s2, %s2673_s22  ;;  %p2680_p0 = scmp.lt.u32.totalorder %s2673_s22, %s3593_s2 }
  0x25   : > { %p2676_p12 = pnand %p3189_p11, %p2674_p10 }
  0x27   : > { %p2677_p13 = pneg %p2676_p12 }
  0x29   : > { %p2682_p1 = pnand %p2680_p0, %p2677_p13 }
  0x2b   : > { %2685 = shalt.err (!%p2682_p1)
}
  0x2c   : > { %s2686_s15 = scalar_lea.vmem %s3163_s12, 256  ;;  %p2694_p8 = scmp.lt.s32.totalorder %s3163_s12, %s3163_s12 }
  0x2d   : > { %p2687_p2 = scmp.ne.s32.totalorder %s3163_s12, %s2686_s15  ;;  %p2695_p6 = scmp.lt.s32.totalorder %s2686_s15, %s2686_s15 }
  0x2f   : > { %p2689_p3 = pnand %p2687_p2, %p3189_p11  ;;  %p2696_p10 = por %p2695_p6, %p2694_p8 }
  0x31   : > { %p2690_p5 = pneg %p2689_p3 }
  0x33   : > { %p2697_p12 = pnand %p2696_p10, %p2690_p5 }
  0x35   : > { %2700 = shalt.err (!%p2697_p12)
}
  0x36   : > { %s3582_s18 = smov 128   ;;  %s3050_s20 = smov 8  }
  0x37   : > { %2313 = dma.hbm_to_vmem [thread:$0]  (!%p3173_p9), %s3593_s2, 256, %s3163_s12, [#allocation11], %s3582_s18, %s3582_s18, %s3050_s20  }
  0x38   : > { %s2701_s26 = scalar_lea.hbm %s3572_s4, 4096 }
  0x39   : > { %p2702_p6 = scmp.ne.s32.totalorder %s3572_s4, %s2701_s26  ;;  %p2708_p1 = scmp.lt.u32.totalorder %s2701_s26, %s3572_s4 }
  0x3b   : > { %p2704_p13 = pnand %p2702_p6, %p3189_p11 }
  0x3d   : > { %p2705_p0 = pneg %p2704_p13 }
  0x3f   : > { %p2710_p2 = pnand %p2708_p1, %p2705_p0 }
  0x41   : > { %2713 = shalt.err (!%p2710_p2)
}
  0x42   : > { %s2714_s12 = scalar_lea.vmem %s3177_s16, 4096  ;;  %p2722_p10 = scmp.lt.s32.totalorder %s3177_s16, %s3177_s16 }
  0x43   : > { %p2715_p3 = scmp.ne.s32.totalorder %s3177_s16, %s2714_s12  ;;  %p2723_p12 = scmp.lt.s32.totalorder %s2714_s12, %s2714_s12 }
  0x45   : > { %p2717_p5 = pnand %p2715_p3, %p3189_p11  ;;  %p2724_p6 = por %p2723_p12, %p2722_p10 }
  0x47   : > { %p2718_p8 = pneg %p2717_p5 }
  0x49   : > { %p2725_p13 = pnand %p2724_p6, %p2718_p8 }
  0x4b   : > { %2728 = shalt.err (!%p2725_p13)
}
  0x4c   : > { %2319 = dma.hbm_to_vmem [thread:$0]  (!%p3173_p9), %s3572_s4, 4096, %s3177_s16, [#allocation14], %s3582_s18, %s3582_s18, %s3050_s20  }
  0x4d   : > { %s2729_s23 = scalar_lea.hbm %s3574_s6, 32 }
  0x4e   : > { %p2730_p0 = scmp.ne.s32.totalorder %s3574_s6, %s2729_s23  ;;  %p2736_p3 = scmp.lt.u32.totalorder %s2729_s23, %s3574_s6 }
  0x50   : > { %p2732_p1 = pnand %p2730_p0, %p3189_p11 }
  0x52   : > { %p2733_p2 = pneg %p2732_p1 }
  0x54   : > { %p2738_p5 = pnand %p2736_p3, %p2733_p2 }
  0x56   : > { %2741 = shalt.err (!%p2738_p5)
}
  0x57   : > { %s2742_s16 = scalar_lea.vmem %s3179_s19, 32  ;;  %p2750_p6 = scmp.lt.s32.totalorder %s3179_s19, %s3179_s19 }
  0x58   : > { %p2743_p8 = scmp.ne.s32.totalorder %s3179_s19, %s2742_s16  ;;  %p2751_p13 = scmp.lt.s32.totalorder %s2742_s16, %s2742_s16 }
  0x5a   : > { %p2745_p10 = pnand %p2743_p8, %p3189_p11  ;;  %p2752_p0 = por %p2751_p13, %p2750_p6 }
  0x5c   : > { %p2746_p12 = pneg %p2745_p10 }
  0x5e   : > { %p2753_p1 = pnand %p2752_p0, %p2746_p12 }
  0x60   : > { %2756 = shalt.err (!%p2753_p1)
}
  0x61   : > { %2325 = dma.hbm_to_vmem [thread:$0]  (!%p3173_p9), %s3574_s6, 32, %s3179_s19, [#allocation17]  }
  0x62   : > { %s3051_s14 = smov [#allocation19]   ;;  %s3052_s22 = smov [#allocation12]  }
  0x63   : > { %s371_s21 = sshll.u32 %s3051_s14, 4  ;;  %s307_s23 = sshll.u32 %s3052_s22, 4  ;;  %s372_s21 = int_to_ptr.vmem [resolvable:$true] %s371_s21  ;;  %s308_s23 = int_to_ptr.vmem [resolvable:$true] %s307_s23 }
  0x64   : > { %s2757_s0 = scalar_lea.hbm %s3576_s8, 64 }
  0x65   : > { %p2758_p2 = scmp.ne.s32.totalorder %s3576_s8, %s2757_s0  ;;  %p2764_p8 = scmp.lt.u32.totalorder %s2757_s0, %s3576_s8 }
  0x67   : > { %p2760_p3 = pnand %p2758_p2, %p3189_p11 }
  0x69   : > { %p2761_p5 = pneg %p2760_p3 }
  0x6b   : > { %p2766_p10 = pnand %p2764_p8, %p2761_p5 }
  0x6d   : > { %2769 = shalt.err (!%p2766_p10)
}
  0x6e   : > { %s2770_s19 = scalar_lea.vmem %s372_s21, 64  ;;  %p2778_p0 = scmp.lt.s32.totalorder %s372_s21, %s372_s21 }
  0x6f   : > { %p2771_p12 = scmp.ne.s32.totalorder %s372_s21, %s2770_s19  ;;  %p2779_p1 = scmp.lt.s32.totalorder %s2770_s19, %s2770_s19 }
  0x71   : > { %p2773_p6 = pnand %p2771_p12, %p3189_p11  ;;  %p2780_p4 = por %p2779_p1, %p2778_p0 }
  0x73   : > { %p2774_p13 = pneg %p2773_p6 }
  0x75   : > { %p2781_p7 = pnand %p2780_p4, %p2774_p13 }
  0x77   : > { %2784 = shalt.err (!%p2781_p7)
}
  0x78   : > { %2331 = dma.hbm_to_vmem [thread:$0]  (!%p3173_p9), %s3576_s8, 64, %s372_s21, [#allocation20]  }
  0x79   : > { %s3595_s3 = sld [smem:[#allocation35_spill]] }
  0x7f   : > { %s2785_s24 = scalar_lea.hbm %s3595_s3, 256 }
  0x80   : > { %p2786_p2 = scmp.ne.s32.totalorder %s3595_s3, %s2785_s24  ;;  %p2792_p7 = scmp.lt.u32.totalorder %s2785_s24, %s3595_s3 }
  0x82   : > { %p2788_p3 = pnand %p2786_p2, %p3189_p11 }
  0x84   : > { %p2789_p4 = pneg %p2788_p3 }
  0x86   : > { %p2794_p5 = pnand %p2792_p7, %p2789_p4 }
  0x88   : > { %2797 = shalt.err (!%p2794_p5)
}
  0x89   : > { %s2798_s12 = scalar_lea.vmem %s308_s23, 256  ;;  %p2806_p6 = scmp.lt.s32.totalorder %s308_s23, %s308_s23 }
  0x8a   : > { %p2799_p8 = scmp.ne.s32.totalorder %s308_s23, %s2798_s12  ;;  %p2807_p13 = scmp.lt.s32.totalorder %s2798_s12, %s2798_s12 }
  0x8c   : > { %p2801_p10 = pnand %p2799_p8, %p3189_p11  ;;  %p2808_p0 = por %p2807_p13, %p2806_p6 }
  0x8e   : > { %p2802_p12 = pneg %p2801_p10 }
  0x90   : > { %p2809_p1 = pnand %p2808_p0, %p2802_p12 }
  0x92   : > { %2812 = shalt.err (!%p2809_p1)
}
  0x93   : > { %s3596_s21 = smov 128   ;;  %s3053_s14 = smov [#allocation15]  }
  0x94   : > { %2316 = dma.hbm_to_vmem [thread:$0]  (!%p3173_p9), %s3595_s3, 256, %s308_s23, [#allocation11], %s3596_s21, %s3596_s21, %s3050_s20  }
  0x95   : > { %s333_s18 = sshll.u32 %s3053_s14, 4  ;;  %s3054_s22 = smov [#allocation18]   ;;  %s334_s18 = int_to_ptr.vmem [resolvable:$true] %s333_s18 }
  0x96   : > { %s357_s24 = sshll.u32 %s3054_s22, 4  ;;  %s2813_s15 = scalar_lea.hbm %s3573_s5, 2048  ;;  %s358_s24 = int_to_ptr.vmem [resolvable:$true] %s357_s24 }
  0x97   : > { %p2814_p2 = scmp.ne.s32.totalorder %s3573_s5, %s2813_s15  ;;  %p2820_p7 = scmp.lt.u32.totalorder %s2813_s15, %s3573_s5 }
  0x99   : > { %p2816_p3 = pnand %p2814_p2, %p3189_p11 }
  0x9b   : > { %p2817_p4 = pneg %p2816_p3 }
  0x9d   : > { %p2822_p5 = pnand %p2820_p7, %p2817_p4 }
  0x9f   : > { %2825 = shalt.err (!%p2822_p5)
}
  0xa0   : > { %s2826_s23 = scalar_lea.vmem %s334_s18, 2048  ;;  %p2834_p6 = scmp.lt.s32.totalorder %s334_s18, %s334_s18 }
  0xa1   : > { %p2827_p8 = scmp.ne.s32.totalorder %s334_s18, %s2826_s23  ;;  %p2835_p13 = scmp.lt.s32.totalorder %s2826_s23, %s2826_s23 }
  0xa3   : > { %p2829_p10 = pnand %p2827_p8, %p3189_p11  ;;  %p2836_p0 = por %p2835_p13, %p2834_p6 }
  0xa5   : > { %p2830_p12 = pneg %p2829_p10 }
  0xa7   : > { %p2837_p1 = pnand %p2836_p0, %p2830_p12 }
  0xa9   : > { %2840 = shalt.err (!%p2837_p1)
}
  0xaa   : > { %2322 = dma.hbm_to_vmem [thread:$0]  (!%p3173_p9), %s3573_s5, 2048, %s334_s18, [#allocation14], %s3596_s21, %s3596_s21, %s3050_s20  }
  0xab   : > { %s2841_s26 = scalar_lea.hbm %s3575_s7, 8192 }
  0xac   : > { %p2842_p2 = scmp.ne.s32.totalorder %s3575_s7, %s2841_s26  ;;  %p2848_p7 = scmp.lt.u32.totalorder %s2841_s26, %s3575_s7 }
  0xae   : > { %p2844_p3 = pnand %p2842_p2, %p3189_p11 }
  0xb0   : > { %p2845_p4 = pneg %p2844_p3 }
  0xb2   : > { %p2850_p5 = pnand %p2848_p7, %p2845_p4 }
  0xb4   : > { %2853 = shalt.err (!%p2850_p5)
}
  0xb5   : > { %s2854_s19 = scalar_lea.vmem %s358_s24, 8192  ;;  %p2862_p6 = scmp.lt.s32.totalorder %s358_s24, %s358_s24 }
  0xb6   : > { %p2855_p8 = scmp.ne.s32.totalorder %s358_s24, %s2854_s19  ;;  %p2863_p13 = scmp.lt.s32.totalorder %s2854_s19, %s2854_s19 }
  0xb8   : > { %p2857_p10 = pnand %p2855_p8, %p3189_p11  ;;  %p2864_p0 = por %p2863_p13, %p2862_p6 }
  0xba   : > { %p2858_p12 = pneg %p2857_p10 }
  0xbc   : > { %p2865_p1 = pnand %p2864_p0, %p2858_p12 }
  0xbe   : > { %2868 = shalt.err (!%p2865_p1)
}
  0xbf   : > { %s3055_s20 = smov 256   ;;  %s3056_s21 = smov 16  }
  0xc0   : > { %2328 = dma.hbm_to_vmem [thread:$0]  (!%p3173_p9), %s3575_s7, 8192, %s358_s24, [#allocation17], %s3055_s20, %s3055_s20, %s3056_s21  }
  0xc1   : > { %s3057_s2 = smov [#allocation21]   ;;  %s3058_s14 = smov [#allocation22]  }
  0xc2   : > { %s381_s11 = sshll.u32 %s3057_s2, 4  ;;  %s395_s22 = sshll.u32 %s3058_s14, 4  ;;  %s382_s11 = int_to_ptr.vmem [resolvable:$true] %s381_s11  ;;  %s396_s22 = int_to_ptr.vmem [resolvable:$true] %s395_s22 }
  0xc3   : > { %s2869_s15 = scalar_lea.hbm %s3577_s9, 8192 }
  0xc4   : > { %p2870_p2 = scmp.ne.s32.totalorder %s3577_s9, %s2869_s15  ;;  %p2876_p7 = scmp.lt.u32.totalorder %s2869_s15, %s3577_s9 }
  0xc6   : > { %p2872_p3 = pnand %p2870_p2, %p3189_p11 }
  0xc8   : > { %p2873_p4 = pneg %p2872_p3 }
  0xca   : > { %p2878_p5 = pnand %p2876_p7, %p2873_p4 }
  0xcc   : > { %2881 = shalt.err (!%p2878_p5)
}
  0xcd   : > { %s2882_s24 = scalar_lea.vmem %s382_s11, 8192  ;;  %p2890_p6 = scmp.lt.s32.totalorder %s382_s11, %s382_s11 }
  0xce   : > { %p2883_p8 = scmp.ne.s32.totalorder %s382_s11, %s2882_s24  ;;  %p2891_p13 = scmp.lt.s32.totalorder %s2882_s24, %s2882_s24 }
  0xd0   : > { %p2885_p10 = pnand %p2883_p8, %p3189_p11  ;;  %p2892_p0 = por %p2891_p13, %p2890_p6 }
  0xd2   : > { %p2886_p12 = pneg %p2885_p10 }
  0xd4   : > { %p2893_p1 = pnand %p2892_p0, %p2886_p12 }
  0xd6   : > { %2896 = shalt.err (!%p2893_p1)
}
  0xd7   : > { %2334 = dma.hbm_to_vmem [thread:$0]  (!%p3173_p9), %s3577_s9, 8192, %s382_s11, [#allocation20], %s3055_s20, %s3055_s20, %s3056_s21  }
  0xd8   : > { %s2897_s14 = scalar_lea.hbm %s3578_s10, 64 }
  0xd9   : > { %p2898_p2 = scmp.ne.s32.totalorder %s3578_s10, %s2897_s14  ;;  %p2904_p7 = scmp.lt.u32.totalorder %s2897_s14, %s3578_s10 }
  0xdb   : > { %p2900_p3 = pnand %p2898_p2, %p3189_p11 }
  0xdd   : > { %p2901_p4 = pneg %p2900_p3 }
  0xdf   : > { %p2906_p5 = pnand %p2904_p7, %p2901_p4 }
  0xe1   : > { %2909 = shalt.err (!%p2906_p5)
}
  0xe2   : > { %s2910_s12 = scalar_lea.vmem %s396_s22, 64  ;;  %p2918_p6 = scmp.lt.s32.totalorder %s396_s22, %s396_s22 }
  0xe3   : > { %p2911_p8 = scmp.ne.s32.totalorder %s396_s22, %s2910_s12  ;;  %p2919_p13 = scmp.lt.s32.totalorder %s2910_s12, %s2910_s12 }
  0xe5   : > { %p2913_p10 = pnand %p2911_p8, %p3189_p11  ;;  %p2920_p0 = por %p2919_p13, %p2918_p6 }
  0xe7   : > { %p2914_p12 = pneg %p2913_p10 }
  0xe9   : > { %p2921_p1 = pnand %p2920_p0, %p2914_p12 }
  0xeb   : > { %2924 = shalt.err (!%p2921_p1)
}
  0xec   : > { %2337 = dma.hbm_to_vmem [thread:$0]  (!%p3173_p9), %s3578_s10, 64, %s396_s22, [#allocation23]  }
  0xed   : > { %s2016_s25 = sadd.s32 4294967294, %s3043_s30   ;;  %s3378_s17 = sadd.s32 1, %s3043_s30  }
  0xee   : > { %s43_s11 = sadd.s32 1, %s3039_s29  ;;  %s40_s19 = ssub.s32 %s3043_s30, %s3378_s17 }
  0xef   : > { %p50_p11 = scmp.ne.s32.totalorder %s3039_s29, %s3035_s28  ;;  %p41_p2 = scmp.eq.s32.totalorder %s40_s19, 0 }
  0xf0   : > { %p51_p3 = scmp.eq.s32.totalorder %s3043_s30, 0  ;;  %p56_p4 = scmp.ne.s32.totalorder %s3035_s28, %s3031_s27 }
  0xf1   : > { %p269_p7 = scmp.eq.s32.totalorder %s3157_s13, 6  ;;  %p3597_p8 = scmp.eq.s32.totalorder %s3157_s13, 0 }
  0xf2   : > { %s3390_s24 = scalar_select %p41_p2, %s3039_s29, %s43_s11  }
  0xf3   : > { %p52_p5 = por %p51_p3, %p50_p11  ;;  %p3394_p10 = por %p3597_p8, %p56_p4 }
  0xf4   : > { %p3398_p9 = por %p269_p7, %p50_p11  ;;  %p275_p12 = scmp.eq.s32.totalorder %s2016_s25, 6 }
  0xf5   : > { %p2355_p6 = scmp.lt.s32.totalorder %s3043_s30, 7  ;;  %s406_s23 = sand.u32 1, %s3039_s29  }
  0xf6   : > { %s3599_s22 = scalar_select %p3398_p9, 1, 0 }
  0xf7   : > { %p3404_p13 = por %p275_p12, %p56_p4  ;;  %s2028_s2 = sshll.u32 %s406_s23, 3 }
  0xf8   : > { %s2029_s14 = sshll.u32 %s3043_s30, 7  ;;  %s410_s16 = scalar_lea.vmem [#allocation7], %s2028_s2 }
  0xf9   : > { %s3600_s3 = scalar_select %p3404_p13, 1, 0 }
  0xfa   : > { %s3412_s15 = scalar_lea.hbm %s3569_s1, %s2029_s14  ;;  %s417_s12 = sshll.u32 %s410_s16, 4  ;;  %s3418_s12 = int_to_ptr.vmem [resolvable:$true] %s417_s12 }
  0xfb   : > { %p3414_p0 = pnand %p2355_p6, %p52_p5  ;;  %s407_s21 = scalar_lea.sflag [#allocation8], %s406_s23 }
  0xfc   : > { %s2925_s25 = scalar_lea.hbm %s3412_s15, 128  ;;  %s2930_s2 = scalar_lea.hbm %s3569_s1, 896 }
  0xfd   : > { %p2926_p1 = scmp.ne.s32.totalorder %s3412_s15, %s2925_s25  ;;  %p2927_p11 = pneg %p3414_p0 }
  0xfe   : > { %p2931_p4 = scmp.lt.u32.totalorder %s3412_s15, %s3569_s1  ;;  %p2932_p7 = scmp.lt.u32.totalorder %s2930_s2, %s2925_s25 }
  0xff   : > { %p2928_p2 = pnand %p2927_p11, %p2926_p1  ;;  %p2934_p8 = scmp.lt.u32.totalorder %s2925_s25, %s3412_s15 }
 0x100   : > { %p2933_p5 = por %p2932_p7, %p2931_p4 }
 0x101   : > { %p2929_p3 = pneg %p2928_p2 }
 0x102   : > { %p2935_p12 = por %p2934_p8, %p2933_p5 }
 0x104   : > { %p2936_p6 = pnand %p2935_p12, %p2929_p3 }
 0x106   : > { %2939 = shalt.err (!%p2936_p6)
}
 0x107   : > { %s2940_s23 = scalar_lea.vmem %s3418_s12, 128  ;;  %s3059_s0 = smov [#allocation7]  }
 0x108   : > { %p2941_p1 = scmp.ne.s32.totalorder %s3418_s12, %s2940_s23  ;;  %s2945_s16 = sshll.u32 %s3059_s0, 4  ;;  %s2946_s16 = int_to_ptr.vmem [resolvable:$false] %s2945_s16 }
 0x109   : > { %s2947_s11 = scalar_lea.vmem %s2946_s16, 256  ;;  %p2948_p9 = scmp.lt.s32.totalorder %s3418_s12, %s2946_s16 }
 0x10a   : > { %p2943_p2 = pnand %p2941_p1, %p2927_p11  ;;  %p2949_p4 = scmp.lt.s32.totalorder %s2947_s11, %s2940_s23 }
 0x10c   : > { %p2944_p13 = pneg %p2943_p2  ;;  %p2950_p7 = por %p2949_p4, %p2948_p9 }
 0x10e   : > { %p2951_p5 = pnand %p2950_p7, %p2944_p13 }
 0x110   : > { %2954 = shalt.err (!%p2951_p5)
}
 0x111   : > { %2341 = dma.hbm_to_vmem [thread:$0]  (!%p3414_p0), %s3412_s15, 128, %s3418_s12, %s407_s21  }
 0x112   : > { %s3602_s25 = sld [smem:[#allocation33_spill]] }
 0x118   : > { %p3603_p3 = scmp.ne.s32.totalorder %s3602_s25, 0 }
 0x119   : > { %s3448_s19 = sand.u32 (!%p3603_p3), 1, %s3035_s28  }
 0x11a   : > { %426 = sbr.rel (%p3603_p3) target bundleno = 1622 (0x656), region = 60  ;;  %s2031_s2 = sshll.u32 (!%p3603_p3), %s3448_s19, 3 }
 0x11b   : > { %s429_s14 = scalar_lea.sflag (!%p3603_p3), [#allocation8], %s3448_s19  ;;  %s3452_s26 = scalar_lea.vmem (!%p3603_p3), [#allocation7], %s2031_s2 }
 0x121   : > { %3002 = dma.done.wait (%p3394_p10), %s429_s14, 128  }
 0x122   : > { %3004 = vsyncadd (%p3394_p10), %s429_s14, 4294967168  ;;  %p3604_p9 = scmp.eq.s32.totalorder %s3157_s13, 0 }
 0x124   : > { %3006 = dma.done.wait (%p3604_p9), [#allocation11], 512   ;;  %p3605_p13 = pmov %p3604_p9 }
 0x125   : > { %p3606_p0 = pmov %p3604_p9 }
 0x126   : > { %3008 = vsyncadd (%p3605_p13), [#allocation11], 4294966784 }
 0x127   : > { %3010 = dma.done.wait (%p3606_p0), [#allocation14], 6144   ;;  %p3607_p11 = pmov %p3606_p0 }
 0x128   : > { %p3608_p8 = pmov %p3606_p0 }
 0x129   : > { %3012 = vsyncadd (%p3607_p11), [#allocation14], 4294961152 }
 0x12a   : > { %3014 = dma.done.wait (%p3608_p8), [#allocation17], 8224   ;;  %p3609_p12 = pmov %p3606_p0 }
 0x12b   : > { %p3610_p10 = pmov %p3606_p0 }
 0x12c   : > { %3016 = vsyncadd (%p3609_p12), [#allocation17], 4294959072 }
 0x12d   : > { %3018 = dma.done.wait (%p3610_p10), [#allocation20], 8256   ;;  %p3611_p6 = pmov %p3606_p0 }
 0x12e   : > { %p3612_p1 = pmov %p3606_p0 }
 0x12f   : > { %3020 = vsyncadd (%p3611_p6), [#allocation20], 4294959040 }
 0x130   : > { %3022 = dma.done.wait (%p3612_p1), [#allocation23], 64   ;;  %p3613_p2 = pmov %p3606_p0 }
 0x131   : > { %s2041_s18 = sshll.u32 %s3448_s19, 4  ;;  %p3614_p4 = scmp.ne.s32.totalorder %s3157_s13, 0 }
 0x132   : > { %3024 = vsyncadd (%p3613_p2), [#allocation23], 4294967232  ;;  %s3479_s15 = scalar_lea.vmem [#allocation24], %s2041_s18  ;;  %v510_v0 = vld [vmem:[#allocation10] sm:$0xff] (!%p3614_p4)  ;;  %v511_v1 = vld [vmem:[#allocation10 + $0x8] sm:$0xff] (!%p3614_p4)  ;;  %v3060_v4 = vmov (!%p3614_p4), 0.0  }
 0x133   : > { %509 = sbr.rel (%p3614_p4) target bundleno = 314 (0x13a), region = 104  ;;  %v514_v2 = vld [vmem:[#allocation12] sm:$0xff] (!%p3614_p4)  ;;  %512 = vst [vmem:[#allocation2] sm:$0xff] (!%p3614_p4), %v510_v0  ;;  %513 = vst [vmem:[#allocation2 + $0x8] sm:$0xff] (!%p3614_p4), %v511_v1  ;;  %v515_v3 = vld [vmem:[#allocation12 + $0x8] sm:$0xff] (!%p3614_p4) }
 0x134   : > { %516 = vst [vmem:[#allocation3] sm:$0xff] (!%p3614_p4), %v514_v2  ;;  %518 = vst [vmem:[#allocation4] sm:$0xff] (!%p3614_p4), %v3060_v4 }
 0x135   : > { %517 = vst [vmem:[#allocation3 + $0x8] sm:$0xff] (!%p3614_p4), %v515_v3 }
 0x13a PF: > { %v2415_v5 = vld [vmem:[#allocation18 + $0x4] ss:$16 sps:$4 sm:$0xff]   ;;  %v2417_v6 = vld [vmem:[#allocation18] ss:$16 sps:$4 sm:$0xff]   ;;  %v2426_v10 = vld [vmem:[#allocation18 + $0xc] ss:$16 sps:$4 sm:$0xff]  }
 0x13b   : > { %941 = vmatprep.subr.bf16.mxu0 %v2415_v5  ;;  %v2418_v7 = vld [vmem:[#allocation18 + $0x24] ss:$16 sps:$4 sm:$0xff]   ;;  %v2420_v8 = vld [vmem:[#allocation18 + $0x20] ss:$16 sps:$4 sm:$0xff]   ;;  %v2429_v11 = vld [vmem:[#allocation18 + $0x8] ss:$16 sps:$4 sm:$0xff]   ;;  %982 = vmatprep.subr.bf16.mxu1 %v2426_v10 }
 0x13c   : > { %942 = vmatpush1.bf16.msra.mxu0 %v2417_v6  ;;  %v2421_v9 = vld [vmem:[#allocation18 + $0x44] ss:$16 sps:$4 sm:$0xff]   ;;  %v2423_v12 = vld [vmem:[#allocation18 + $0x40] ss:$16 sps:$4 sm:$0xff]   ;;  %983 = vmatpush1.bf16.msra.mxu1 %v2429_v11  ;;  %v2432_v14 = vld [vmem:[#allocation18 + $0x2c] ss:$16 sps:$4 sm:$0xff]  }
 0x13d   : > { %943 = vmatprep.subr.bf16.mxu0 %v2418_v7  ;;  %v2424_v13 = vld [vmem:[#allocation18 + $0x64] ss:$16 sps:$4 sm:$0xff]   ;;  %v2435_v15 = vld [vmem:[#allocation18 + $0x28] ss:$16 sps:$4 sm:$0xff]   ;;  %984 = vmatprep.subr.bf16.mxu1 %v2432_v14  ;;  %v2428_v16 = vld [vmem:[#allocation18 + $0x60] ss:$16 sps:$4 sm:$0xff]  }
 0x13e   : > { %v2430_v17 = vld [vmem:[#allocation18 + $0x84] ss:$16 sps:$4 sm:$0xff]   ;;  %v2438_v18 = vld [vmem:[#allocation18 + $0x4c] ss:$16 sps:$4 sm:$0xff]   ;;  %v2441_v19 = vld [vmem:[#allocation18 + $0x48] ss:$16 sps:$4 sm:$0xff]  }
 0x13f   : > { %v2444_v20 = vld [vmem:[#allocation18 + $0x6c] ss:$16 sps:$4 sm:$0xff]   ;;  %v2434_v21 = vld [vmem:[#allocation18 + $0x80] ss:$16 sps:$4 sm:$0xff]   ;;  %v2436_v22 = vld [vmem:[#allocation18 + $0xa4] ss:$16 sps:$4 sm:$0xff]  }
 0x140   : > { %944 = vmatpush1.bf16.msra.mxu0 %v2420_v8  ;;  %985 = vmatpush1.bf16.msra.mxu1 %v2435_v15  ;;  %v2447_v23 = vld [vmem:[#allocation18 + $0x68] ss:$16 sps:$4 sm:$0xff]   ;;  %v2450_v24 = vld [vmem:[#allocation18 + $0x8c] ss:$16 sps:$4 sm:$0xff]   ;;  %v2440_v25 = vld [vmem:[#allocation18 + $0xa0] ss:$16 sps:$4 sm:$0xff]  }
 0x141   : > { %945 = vmatprep.subr.bf16.mxu0 %v2421_v9  ;;  %986 = vmatprep.subr.bf16.mxu1 %v2438_v18  ;;  %v2442_v26 = vld [vmem:[#allocation18 + $0xc4] ss:$16 sps:$4 sm:$0xff]   ;;  %v2453_v27 = vld [vmem:[#allocation18 + $0x88] ss:$16 sps:$4 sm:$0xff]   ;;  %v2456_v28 = vld [vmem:[#allocation18 + $0xac] ss:$16 sps:$4 sm:$0xff]  }
 0x142   : > { %v2446_v29 = vld [vmem:[#allocation18 + $0xc0] ss:$16 sps:$4 sm:$0xff]   ;;  %v2448_v30 = vld [vmem:[#allocation18 + $0xe4] ss:$16 sps:$4 sm:$0xff]   ;;  %v2459_v31 = vld [vmem:[#allocation18 + $0xa8] ss:$16 sps:$4 sm:$0xff]  }
 0x143   : > { %v2462_v32 = vld [vmem:[#allocation18 + $0xcc] ss:$16 sps:$4 sm:$0xff]   ;;  %v2452_v33 = vld [vmem:[#allocation18 + $0xe0] ss:$16 sps:$4 sm:$0xff]   ;;  %v2454_v34 = vld [vmem:[#allocation18 + $0x104] ss:$16 sps:$4 sm:$0xff]  }
 0x144   : > { %946 = vmatpush1.bf16.msra.mxu0 %v2423_v12  ;;  %987 = vmatpush1.bf16.msra.mxu1 %v2441_v19  ;;  %s519_s12 = sld [smem:[#allocation6 + %s3157_s13]]  ;;  %v2465_v35 = vld [vmem:[#allocation18 + $0xc8] ss:$16 sps:$4 sm:$0xff]   ;;  %v2468_v36 = vld [vmem:[#allocation18 + $0xec] ss:$16 sps:$4 sm:$0xff]   ;;  %s2202_s0 = sshll.u32 %s3157_s13, 8 }
 0x145   : > { %947 = vmatprep.subr.bf16.mxu0 %v2424_v13  ;;  %988 = vmatprep.subr.bf16.mxu1 %v2444_v20  ;;  %v2458_v37 = vld [vmem:[#allocation18 + $0x100] ss:$16 sps:$4 sm:$0xff]   ;;  %v2460_v38 = vld [vmem:[#allocation18 + $0x124] ss:$16 sps:$4 sm:$0xff]   ;;  %v2471_v39 = vld [vmem:[#allocation18 + $0xe8] ss:$16 sps:$4 sm:$0xff]  }
 0x146   : > { %v2474_v40 = vld [vmem:[#allocation18 + $0x10c] ss:$16 sps:$4 sm:$0xff]   ;;  %v2464_v41 = vld [vmem:[#allocation18 + $0x120] ss:$16 sps:$4 sm:$0xff]   ;;  %v2466_v42 = vld [vmem:[#allocation18 + $0x144] ss:$16 sps:$4 sm:$0xff]  }
 0x147   : > { %v2477_v43 = vld [vmem:[#allocation18 + $0x108] ss:$16 sps:$4 sm:$0xff]   ;;  %v2480_v44 = vld [vmem:[#allocation18 + $0x12c] ss:$16 sps:$4 sm:$0xff]   ;;  %v2470_v46 = vld [vmem:[#allocation18 + $0x140] ss:$16 sps:$4 sm:$0xff]  }
 0x148   : > { %948 = vmatpush1.bf16.msra.mxu0 %v2428_v16  ;;  %989 = vmatpush1.bf16.msra.mxu1 %v2447_v23  ;;  %v596_v45 = vld [vmem:[#allocation2] sm:$0xff]  ;;  %v2476_v51 = vld [vmem:[#allocation18 + $0x160] ss:$16 sps:$4 sm:$0xff]   ;;  %s1860_s16 = sshll.u32 %s3479_s15, 4  ;;  %s3615_s2 = sld [smem:[#allocation36_spill]]  ;;  %s1861_s16 = int_to_ptr.vmem [resolvable:$true] %s1860_s16 }
 0x149   : > { %949 = vmatprep.subr.bf16.mxu0 %v2430_v17  ;;  %990 = vmatprep.subr.bf16.mxu1 %v2450_v24  ;;  %v599_v47 = vpack.c.bf16 %v596_v45, %v596_v45  ;;  %v2472_v48 = vld [vmem:[#allocation18 + $0x164] ss:$16 sps:$4 sm:$0xff]   ;;  %v2483_v49 = vld [vmem:[#allocation18 + $0x128] ss:$16 sps:$4 sm:$0xff]   ;;  %v2486_v50 = vld [vmem:[#allocation18 + $0x14c] ss:$16 sps:$4 sm:$0xff]  }
 0x14a   : > { %p520_p7 = scmp.ne.s32.totalorder %s519_s12, 0  ;;  %v2478_v52 = vld [vmem:[#allocation18 + $0x184] ss:$16 sps:$4 sm:$0xff]   ;;  %v2489_v53 = vld [vmem:[#allocation18 + $0x148] ss:$16 sps:$4 sm:$0xff]   ;;  %s2955_s18 = scalar_lea.vmem %s1861_s16, 256 }
 0x14b   : > { %973 = vmatprep.mubr.bf16.mxu0 %v599_v47  ;;  %1014 = vmatprep.mubr.bf16.mxu1 %v599_v47  ;;  %v2492_v54 = vld [vmem:[#allocation18 + $0x16c] ss:$16 sps:$4 sm:$0xff]   ;;  %v2482_v55 = vld [vmem:[#allocation18 + $0x180] ss:$16 sps:$4 sm:$0xff]   ;;  %v2484_v56 = vld [vmem:[#allocation18 + $0x1a4] ss:$16 sps:$4 sm:$0xff]   ;;  %p2956_p5 = scmp.ne.s32.totalorder %s1861_s16, %s2955_s18 }
 0x14c   : > { %950 = vmatpush1.bf16.msra.mxu0 %v2434_v21  ;;  %991 = vmatpush1.bf16.msra.mxu1 %v2453_v27  ;;  %s3484_s20 = scalar_select %p520_p7, 1, 0  ;;  %v2495_v57 = vld [vmem:[#allocation18 + $0x168] ss:$16 sps:$4 sm:$0xff]   ;;  %v2498_v58 = vld [vmem:[#allocation18 + $0x18c] ss:$16 sps:$4 sm:$0xff]  }
 0x14d   : > { %951 = vmatprep.subr.bf16.mxu0 %v2436_v22  ;;  %992 = vmatprep.subr.bf16.mxu1 %v2456_v28  ;;  %v2488_v59 = vld [vmem:[#allocation18 + $0x1a0] ss:$16 sps:$4 sm:$0xff]   ;;  %v527_v62 = vld [vmem:[#allocation4] sm:$0xff]  ;;  %p3616_p3 = scmp.ne.s32.totalorder %s3599_s22, 0  ;;  %s3063_s12 = smov [#allocation24]  }
 0x14e   : > { %s522_s21 = scvt.s32.f32 %s3484_s20  ;;  %v523_v60 = vld [vmem:[%s3452_s26] sm:$0xff]  ;;  %s3531_s14 = scalar_lea.hbm %s3615_s2, %s2202_s0 }
 0x14f   : > { %v2490_v0 = vld [vmem:[#allocation18 + $0x1c4] ss:$16 sps:$4 sm:$0xff]   ;;  %v2501_v1 = vld [vmem:[#allocation18 + $0x188] ss:$16 sps:$4 sm:$0xff]   ;;  %v2494_v2 = vld [vmem:[#allocation18 + $0x1c0] ss:$16 sps:$4 sm:$0xff]   ;;  %p2957_p9 = pnand %p2956_p5, %p3616_p3 }
 0x150   : > { %952 = vmatpush1.bf16.msra.mxu0 %v2440_v25  ;;  %993 = vmatpush1.bf16.msra.mxu1 %v2459_v31  ;;  %s526_s23 = ssub.f32 1.0, %s522_s21  ;;  %v524_v61 = vstv %s522_s21  ;;  %v2502_v3 = vld [vmem:[#allocation18 + $0x1ac] ss:$16 sps:$4 sm:$0xff]   ;;  %v2496_v4 = vld [vmem:[#allocation18 + $0x1e4] ss:$16 sps:$4 sm:$0xff]   ;;  %s1846_s26 = scalar_lea.sflag [#allocation9], %s3448_s19 }
 0x151   : > { %953 = vmatprep.subr.bf16.mxu0 %v2442_v26  ;;  %994 = vmatprep.subr.bf16.mxu1 %v2462_v32  ;;  %v525_v5 = vmul.f32 %v524_v61, %v523_v60  ;;  %v2504_v7 = vld [vmem:[#allocation18 + $0x1a8] ss:$16 sps:$4 sm:$0xff]   ;;  %v2505_v8 = vld [vmem:[#allocation18 + $0x1cc] ss:$16 sps:$4 sm:$0xff]   ;;  %v2500_v9 = vld [vmem:[#allocation18 + $0x1e0] ss:$16 sps:$4 sm:$0xff]   ;;  %p2958_p13 = pneg %p2957_p9 }
 0x152   : > { %v528_v63 = vstv %s526_s23  ;;  %v2507_v11 = vld [vmem:[#allocation18 + $0x1c8] ss:$16 sps:$4 sm:$0xff]   ;;  %v2508_v13 = vld [vmem:[#allocation18 + $0x1ec] ss:$16 sps:$4 sm:$0xff]   ;;  %v2511_v14 = vld [vmem:[#allocation21] ss:$16 sps:$4 sm:$0xff]  }
 0x153   : > { %v529_v6 = vmul.f32 %v528_v63, %v527_v62  ;;  %v2513_v12 = vld [vmem:[#allocation21 + $0x4] ss:$16 sps:$4 sm:$0xff]   ;;  %v2516_v18 = vld [vmem:[#allocation21 + $0xc] ss:$16 sps:$4 sm:$0xff]   ;;  %v2517_v19 = vld [vmem:[#allocation21 + $0x20] ss:$16 sps:$4 sm:$0xff]  }
 0x154   : > { %954 = vmatpush1.bf16.msra.mxu0 %v2446_v29  ;;  %995 = vmatpush1.bf16.msra.mxu1 %v2465_v35  ;;  %v2510_v16 = vld [vmem:[#allocation18 + $0x1e8] ss:$16 sps:$4 sm:$0xff]   ;;  %v2514_v20 = vld [vmem:[#allocation21 + $0x8] ss:$16 sps:$4 sm:$0xff]   ;;  %v2522_v22 = vld [vmem:[#allocation21 + $0x2c] ss:$16 sps:$4 sm:$0xff]  }
 0x155   : > { %955 = vmatprep.subr.bf16.mxu0 %v2448_v30  ;;  %996 = vmatprep.subr.bf16.mxu1 %v2468_v36  ;;  %v530_v10 = vadd.f32 %v529_v6, %v525_v5  ;;  %v2519_v17 = vld [vmem:[#allocation21 + $0x24] ss:$16 sps:$4 sm:$0xff]   ;;  %v2523_v23 = vld [vmem:[#allocation21 + $0x40] ss:$16 sps:$4 sm:$0xff]   ;;  %v2520_v24 = vld [vmem:[#allocation21 + $0x28] ss:$16 sps:$4 sm:$0xff]  }
 0x156   : > { %v2525_v21 = vld [vmem:[#allocation21 + $0x44] ss:$16 sps:$4 sm:$0xff]   ;;  %v2528_v26 = vld [vmem:[#allocation21 + $0x4c] ss:$16 sps:$4 sm:$0xff]   ;;  %v2529_v27 = vld [vmem:[#allocation21 + $0x60] ss:$16 sps:$4 sm:$0xff]  }
 0x157   : > { %v598_v15 = vpack.c.bf16 %v530_v10, %v530_v10  ;;  %v2531_v25 = vld [vmem:[#allocation21 + $0x64] ss:$16 sps:$4 sm:$0xff]   ;;  %v2526_v28 = vld [vmem:[#allocation21 + $0x48] ss:$16 sps:$4 sm:$0xff]   ;;  %v2534_v29 = vld [vmem:[#allocation21 + $0x6c] ss:$16 sps:$4 sm:$0xff]  }
 0x158   : > { %956 = vmatpush1.bf16.msra.mxu0 %v2452_v33  ;;  %997 = vmatpush1.bf16.msra.mxu1 %v2471_v39  ;;  %v2532_v30 = vld [vmem:[#allocation21 + $0x68] ss:$16 sps:$4 sm:$0xff]   ;;  %v2537_v31 = vld [vmem:[#allocation21 + $0x84] ss:$16 sps:$4 sm:$0xff]   ;;  %v2540_v32 = vld [vmem:[#allocation21 + $0x8c] ss:$16 sps:$4 sm:$0xff]  }
 0x159   : > { %957 = vmatprep.subr.bf16.mxu0 %v2454_v34  ;;  %998 = vmatprep.subr.bf16.mxu1 %v2474_v40  ;;  %v2535_v33 = vld [vmem:[#allocation21 + $0x80] ss:$16 sps:$4 sm:$0xff]   ;;  %v2538_v34 = vld [vmem:[#allocation21 + $0x88] ss:$16 sps:$4 sm:$0xff]   ;;  %v2543_v35 = vld [vmem:[#allocation21 + $0xa4] ss:$16 sps:$4 sm:$0xff]  }
 0x15a   : > { %v2546_v36 = vld [vmem:[#allocation21 + $0xac] ss:$16 sps:$4 sm:$0xff]   ;;  %v2549_v39 = vld [vmem:[#allocation21 + $0xc4] ss:$16 sps:$4 sm:$0xff]   ;;  %v2553_v45 = vld [vmem:[#allocation21 + $0xe0] ss:$16 sps:$4 sm:$0xff]  }
 0x15b   : > { %v2552_v40 = vld [vmem:[#allocation21 + $0xcc] ss:$16 sps:$4 sm:$0xff]   ;;  %v2561_v47 = vld [vmem:[#allocation21 + $0x104] ss:$16 sps:$4 sm:$0xff]   ;;  %v2577_v61 = vld [vmem:[#allocation21 + $0x160] ss:$16 sps:$4 sm:$0xff]  }
 0x15c   : > { %958 = vmatpush1.bf16.msra.mxu0 %v2458_v37  ;;  %999 = vmatpush1.bf16.msra.mxu1 %v2477_v43  ;;  %v2541_v37 = vld [vmem:[#allocation21 + $0xa0] ss:$16 sps:$4 sm:$0xff]   ;;  %v2555_v43 = vld [vmem:[#allocation21 + $0xe4] ss:$16 sps:$4 sm:$0xff]   ;;  %v2582_v60 = vld [vmem:[#allocation21 + $0x16c] ss:$16 sps:$4 sm:$0xff]  }
 0x15d   : > { %959 = vmatprep.subr.bf16.mxu0 %v2460_v38  ;;  %1000 = vmatprep.subr.bf16.mxu1 %v2480_v44  ;;  %v2544_v38 = vld [vmem:[#allocation21 + $0xa8] ss:$16 sps:$4 sm:$0xff]   ;;  %v2558_v44 = vld [vmem:[#allocation21 + $0xec] ss:$16 sps:$4 sm:$0xff]   ;;  %v2585_v63 = vld [vmem:[#allocation21 + $0x184] ss:$16 sps:$4 sm:$0xff]  }
 0x15e   : > { %v2580_v62 = vld [vmem:[#allocation21 + $0x168] ss:$16 sps:$4 sm:$0xff]   ;;  %v2594_v6 = vld [vmem:[#allocation21 + $0x1ac] ss:$16 sps:$4 sm:$0xff]   ;;  %s2959_s20 = sshll.u32 %s3063_s12, 4  ;;  %s2960_s20 = int_to_ptr.vmem [resolvable:$false] %s2959_s20 }
 0x15f   : > { %v2592_v5 = vld [vmem:[#allocation21 + $0x1a8] ss:$16 sps:$4 sm:$0xff]   ;;  %s2961_s21 = scalar_lea.vmem %s2960_s20, 512  ;;  %p2962_p0 = scmp.lt.s32.totalorder %s1861_s16, %s2960_s20 }
 0x160   : > { %960 = vmatpush1.bf16.msra.mxu0 %v2464_v41  ;;  %1001 = vmatpush1.bf16.msra.mxu1 %v2483_v49  ;;  %v2547_v41 = vld [vmem:[#allocation21 + $0xc0] ss:$16 sps:$4 sm:$0xff]   ;;  %v2598_v10 = vld [vmem:[#allocation21 + $0x1c8] ss:$16 sps:$4 sm:$0xff]   ;;  %p2963_p11 = scmp.lt.s32.totalorder %s2961_s21, %s2955_s18 }
 0x161   : > { %961 = vmatprep.subr.bf16.mxu0 %v2466_v42  ;;  %1002 = vmatprep.subr.bf16.mxu1 %v2486_v50  ;;  %v2550_v42 = vld [vmem:[#allocation21 + $0xc8] ss:$16 sps:$4 sm:$0xff]   ;;  %v2559_v49 = vld [vmem:[#allocation21 + $0x100] ss:$16 sps:$4 sm:$0xff]  }
 0x162   : > { %v2562_v50 = vld [vmem:[#allocation21 + $0x108] ss:$16 sps:$4 sm:$0xff]   ;;  %p2964_p8 = por %p2963_p11, %p2962_p0 }
 0x164   : > { %962 = vmatpush1.bf16.msra.mxu0 %v2470_v46  ;;  %1003 = vmatpush1.bf16.msra.mxu1 %v2489_v53  ;;  %v2556_v46 = vld [vmem:[#allocation21 + $0xe8] ss:$16 sps:$4 sm:$0xff]   ;;  %v2565_v53 = vld [vmem:[#allocation21 + $0x120] ss:$16 sps:$4 sm:$0xff]   ;;  %p2965_p12 = pnand %p2964_p8, %p2958_p13 }
 0x165   : > { %963 = vmatprep.subr.bf16.mxu0 %v2472_v48  ;;  %1004 = vmatprep.subr.bf16.mxu1 %v2492_v54  ;;  %v2564_v48 = vld [vmem:[#allocation21 + $0x10c] ss:$16 sps:$4 sm:$0xff]   ;;  %v2568_v54 = vld [vmem:[#allocation21 + $0x128] ss:$16 sps:$4 sm:$0xff]  }
 0x168   : > { %964 = vmatpush1.bf16.msra.mxu0 %v2476_v51  ;;  %1005 = vmatpush1.bf16.msra.mxu1 %v2495_v57  ;;  %v2567_v51 = vld [vmem:[#allocation21 + $0x124] ss:$16 sps:$4 sm:$0xff]   ;;  %v2571_v57 = vld [vmem:[#allocation21 + $0x140] ss:$16 sps:$4 sm:$0xff]  }
 0x169   : > { %965 = vmatprep.subr.bf16.mxu0 %v2478_v52  ;;  %1006 = vmatprep.subr.bf16.mxu1 %v2498_v58  ;;  %v2570_v52 = vld [vmem:[#allocation21 + $0x12c] ss:$16 sps:$4 sm:$0xff]   ;;  %v2574_v58 = vld [vmem:[#allocation21 + $0x148] ss:$16 sps:$4 sm:$0xff]  }
 0x16c   : > { %966 = vmatpush1.bf16.msra.mxu0 %v2482_v55  ;;  %1007 = vmatpush1.bf16.msra.mxu1 %v2501_v1  ;;  %v2573_v55 = vld [vmem:[#allocation21 + $0x144] ss:$16 sps:$4 sm:$0xff]   ;;  %v2583_v1 = vld [vmem:[#allocation21 + $0x180] ss:$16 sps:$4 sm:$0xff]  }
 0x16d   : > { %967 = vmatprep.subr.bf16.mxu0 %v2484_v56  ;;  %1008 = vmatprep.subr.bf16.mxu1 %v2502_v3  ;;  %v2576_v56 = vld [vmem:[#allocation21 + $0x14c] ss:$16 sps:$4 sm:$0xff]   ;;  %v2589_v3 = vld [vmem:[#allocation21 + $0x1a0] ss:$16 sps:$4 sm:$0xff]  }
 0x170   : > { %968 = vmatpush1.bf16.msra.mxu0 %v2488_v59  ;;  %1009 = vmatpush1.bf16.msra.mxu1 %v2504_v7  ;;  %v2579_v59 = vld [vmem:[#allocation21 + $0x164] ss:$16 sps:$4 sm:$0xff]  }
 0x171   : > { %969 = vmatprep.subr.bf16.mxu0 %v2490_v0  ;;  %1010 = vmatprep.subr.bf16.mxu1 %v2505_v8  ;;  %v2588_v0 = vld [vmem:[#allocation21 + $0x18c] ss:$16 sps:$4 sm:$0xff]   ;;  %v2597_v7 = vld [vmem:[#allocation21 + $0x1c4] ss:$16 sps:$4 sm:$0xff]  }
 0x172   : > { %v2600_v8 = vld [vmem:[#allocation21 + $0x1cc] ss:$16 sps:$4 sm:$0xff]  }
 0x174   : > { %970 = vmatpush1.bf16.msra.mxu0 %v2494_v2  ;;  %1011 = vmatpush1.bf16.msra.mxu1 %v2507_v11  ;;  %v2586_v2 = vld [vmem:[#allocation21 + $0x188] ss:$16 sps:$4 sm:$0xff]  }
 0x175   : > { %971 = vmatprep.subr.bf16.mxu0 %v2496_v4  ;;  %1012 = vmatprep.subr.bf16.mxu1 %v2508_v13  ;;  %v2591_v4 = vld [vmem:[#allocation21 + $0x1a4] ss:$16 sps:$4 sm:$0xff]   ;;  %v1115_v11 = vld [vmem:[#allocation2 + $0x8] sm:$0xff] }
 0x176   : > { %v2606_v13 = vld [vmem:[#allocation21 + $0x1ec] ss:$16 sps:$4 sm:$0xff]  }
 0x178   : > { %972 = vmatpush1.bf16.msra.mxu0 %v2500_v9  ;;  %1013 = vmatpush1.bf16.msra.mxu1 %v2510_v16  ;;  %v2595_v9 = vld [vmem:[#allocation21 + $0x1c0] ss:$16 sps:$4 sm:$0xff]   ;;  %v2604_v16 = vld [vmem:[#allocation21 + $0x1e8] ss:$16 sps:$4 sm:$0xff]  }
 0x179   : > { %1461 = vmatprep.subr.bf16.mxu0 %v2513_v12  ;;  %1502 = vmatprep.subr.bf16.mxu1 %v2516_v18  ;;  %v2603_v12 = vld [vmem:[#allocation21 + $0x1e4] ss:$16 sps:$4 sm:$0xff]  }
 0x17b   : > { %974 = vmatmul.mubr.bf16.vlgmr.msra.gmra.mrb[0].mxu0 %v598_v15  ;;  %1015 = vmatmul.mubr.bf16.vlgmr.msra.gmra.mrb[0].mxu1 %v598_v15  ;;  %v2601_v15 = vld [vmem:[#allocation21 + $0x1e0] ss:$16 sps:$4 sm:$0xff]  }
 0x17c   : > { %1462 = vmatpush1.bf16.msra.mxu0 %v2511_v14  ;;  %1503 = vmatpush1.bf16.msra.mxu1 %v2514_v20  ;;  %v1119_v14 = vpack.c.bf16 %v1115_v11, %v1115_v11  ;;  %v595_v20 = vld [vmem:[#allocation19] sm:$0xf]  ;;  %v2630_v11 = vld [vmem:[#allocation15 + $0x74] ss:$8 sps:$4 sm:$0xff]  }
 0x17d   : > { %1463 = vmatprep.subr.bf16.mxu0 %v2519_v17  ;;  %1504 = vmatprep.subr.bf16.mxu1 %v2522_v22  ;;  %v601_v17 = vlaneseq }
 0x17e   : > { %1493 = vmatprep.mubr.bf16.mxu0 %v1119_v14  ;;  %1534 = vmatprep.mubr.bf16.mxu1 %v1119_v14 }
 0x17f   : > { %v3489_v18 = vshrl.u32 %v601_v17, 7 }
 0x180   : > { %1464 = vmatpush1.bf16.msra.mxu0 %v2517_v19  ;;  %1505 = vmatpush1.bf16.msra.mxu1 %v2520_v24 }
 0x181   : > { %1465 = vmatprep.subr.bf16.mxu0 %v2525_v21  ;;  %1506 = vmatprep.subr.bf16.mxu1 %v2528_v26  ;;  %v3492_v19 = vsub.s32 0, %v3489_v18  ;;  %v3495_v21 = vsub.s32 1, %v3489_v18  ;;  %v615_v24 = vsub.s32 3, %v3489_v18 }
 0x183   : > { %v604_v22 = vrot.slane %v595_v20, %v3492_v19 }
 0x184   : > { %1466 = vmatpush1.bf16.msra.mxu0 %v2523_v23  ;;  %1507 = vmatpush1.bf16.msra.mxu1 %v2526_v28  ;;  %v608_v23 = vrot.slane %v595_v20, %v3495_v21 }
 0x185   : > { %1467 = vmatprep.subr.bf16.mxu0 %v2531_v25  ;;  %1508 = vmatprep.subr.bf16.mxu1 %v2534_v29 }
 0x188   : > { %1468 = vmatpush1.bf16.msra.mxu0 %v2529_v27  ;;  %1509 = vmatpush1.bf16.msra.mxu1 %v2532_v30 }
 0x189   : > { %1469 = vmatprep.subr.bf16.mxu0 %v2537_v31  ;;  %1510 = vmatprep.subr.bf16.mxu1 %v2540_v32  ;;  %v616_v32 = vrot.slane %v595_v20, %v615_v24 }
 0x18c   : > { %1470 = vmatpush1.bf16.msra.mxu0 %v2535_v33  ;;  %1511 = vmatpush1.bf16.msra.mxu1 %v2538_v34  ;;  %v611_v34 = vsub.s32 2, %v3489_v18 }
 0x18d   : > { %1471 = vmatprep.subr.bf16.mxu0 %v2543_v35  ;;  %1512 = vmatprep.subr.bf16.mxu1 %v2546_v36 }
 0x190   : > { %1472 = vmatpush1.bf16.msra.mxu0 %v2541_v37  ;;  %1513 = vmatpush1.bf16.msra.mxu1 %v2544_v38 }
 0x191   : > { %1473 = vmatprep.subr.bf16.mxu0 %v2549_v39  ;;  %1514 = vmatprep.subr.bf16.mxu1 %v2552_v40  ;;  %v612_v39 = vrot.slane %v595_v20, %v611_v34 }
 0x194   : > { %1474 = vmatpush1.bf16.msra.mxu0 %v2547_v41  ;;  %1515 = vmatpush1.bf16.msra.mxu1 %v2550_v42 }
 0x195   : > { %1475 = vmatprep.subr.bf16.mxu0 %v2555_v43  ;;  %1516 = vmatprep.subr.bf16.mxu1 %v2558_v44 }
 0x198   : > { %1476 = vmatpush1.bf16.msra.mxu0 %v2553_v45  ;;  %1517 = vmatpush1.bf16.msra.mxu1 %v2556_v46 }
 0x199   : > { %1477 = vmatprep.subr.bf16.mxu0 %v2561_v47  ;;  %1518 = vmatprep.subr.bf16.mxu1 %v2564_v48 }
 0x19c   : > { %1478 = vmatpush1.bf16.msra.mxu0 %v2559_v49  ;;  %1519 = vmatpush1.bf16.msra.mxu1 %v2562_v50  ;;  %v597_v49 = vld [vmem:[#allocation3] sm:$0xff] }
 0x19d   : > { %1479 = vmatprep.subr.bf16.mxu0 %v2567_v51  ;;  %1520 = vmatprep.subr.bf16.mxu1 %v2570_v52 }
 0x1a0   : > { %1480 = vmatpush1.bf16.msra.mxu0 %v2565_v53  ;;  %1521 = vmatpush1.bf16.msra.mxu1 %v2568_v54 }
 0x1a1   : > { %1481 = vmatprep.subr.bf16.mxu0 %v2573_v55  ;;  %1522 = vmatprep.subr.bf16.mxu1 %v2576_v56 }
 0x1a4   : > { %1482 = vmatpush1.bf16.msra.mxu0 %v2571_v57  ;;  %1523 = vmatpush1.bf16.msra.mxu1 %v2574_v58 }
 0x1a5   : > { %1483 = vmatprep.subr.bf16.mxu0 %v2579_v59  ;;  %1524 = vmatprep.subr.bf16.mxu1 %v2582_v60  ;;  %v2609_v60 = vld [vmem:[#allocation15 + $0x4] ss:$8 sps:$4 sm:$0xff]  }
 0x1a8   : > { %1484 = vmatpush1.bf16.msra.mxu0 %v2577_v61  ;;  %1525 = vmatpush1.bf16.msra.mxu1 %v2580_v62  ;;  %v2607_v61 = vld [vmem:[#allocation15] ss:$8 sps:$4 sm:$0xff]   ;;  %v2612_v62 = vld [vmem:[#allocation15 + $0x14] ss:$8 sps:$4 sm:$0xff]  }
 0x1a9   : > { %1485 = vmatprep.subr.bf16.mxu0 %v2585_v63  ;;  %1526 = vmatprep.subr.bf16.mxu1 %v2588_v0  ;;  %v2610_v63 = vld [vmem:[#allocation15 + $0x10] ss:$8 sps:$4 sm:$0xff]   ;;  %v2615_v0 = vld [vmem:[#allocation15 + $0x24] ss:$8 sps:$4 sm:$0xff]  }
 0x1ac   : > { %1486 = vmatpush1.bf16.msra.mxu0 %v2583_v1  ;;  %1527 = vmatpush1.bf16.msra.mxu1 %v2586_v2  ;;  %v2613_v1 = vld [vmem:[#allocation15 + $0x20] ss:$8 sps:$4 sm:$0xff]   ;;  %v2618_v2 = vld [vmem:[#allocation15 + $0x34] ss:$8 sps:$4 sm:$0xff]  }
 0x1ad   : > { %1487 = vmatprep.subr.bf16.mxu0 %v2591_v4  ;;  %1528 = vmatprep.subr.bf16.mxu1 %v2594_v6  ;;  %v2621_v4 = vld [vmem:[#allocation15 + $0x44] ss:$8 sps:$4 sm:$0xff]   ;;  %v2624_v6 = vld [vmem:[#allocation15 + $0x54] ss:$8 sps:$4 sm:$0xff]  }
 0x1b0   : > { %1488 = vmatpush1.bf16.msra.mxu0 %v2589_v3  ;;  %1529 = vmatpush1.bf16.msra.mxu1 %v2592_v5  ;;  %v2616_v3 = vld [vmem:[#allocation15 + $0x30] ss:$8 sps:$4 sm:$0xff]   ;;  %v2619_v5 = vld [vmem:[#allocation15 + $0x40] ss:$8 sps:$4 sm:$0xff]  }
 0x1b1   : > { %1489 = vmatprep.subr.bf16.mxu0 %v2597_v7  ;;  %1530 = vmatprep.subr.bf16.mxu1 %v2600_v8  ;;  %v2622_v7 = vld [vmem:[#allocation15 + $0x50] ss:$8 sps:$4 sm:$0xff]   ;;  %v2627_v8 = vld [vmem:[#allocation15 + $0x64] ss:$8 sps:$4 sm:$0xff]  }
 0x1b4   : > { %1490 = vmatpush1.bf16.msra.mxu0 %v2595_v9  ;;  %1531 = vmatpush1.bf16.msra.mxu1 %v2598_v10  ;;  %v3061_v9 = vmov 0   ;;  %v2625_v10 = vld [vmem:[#allocation15 + $0x60] ss:$8 sps:$4 sm:$0xff]  }
 0x1b5   : > { %1491 = vmatprep.subr.bf16.mxu0 %v2603_v12  ;;  %1532 = vmatprep.subr.bf16.mxu1 %v2606_v13  ;;  %v2628_v12 = vld [vmem:[#allocation15 + $0x70] ss:$8 sps:$4 sm:$0xff]   ;;  %v1113_v13 = vld [vmem:[#allocation22] sm:$0xf] }
 0x1b6   : > { %v1124_v14 = vrot.slane %v1113_v13, %v3492_v19 }
 0x1b8   : > { %1492 = vmatpush1.bf16.msra.mxu0 %v2601_v15  ;;  %1533 = vmatpush1.bf16.msra.mxu1 %v2604_v16  ;;  %v1128_v15 = vrot.slane %v1113_v13, %v3495_v21 }
 0x1b9   : > { %1678 = vmatprep.subr.bf16.mxu0 %v2609_v60 }
 0x24e   : > { %v975_v25 = vpop.f32.mrb[0].mxu0  ;;  %v1016_v35 = vpop.f32.mrb[0].mxu1 }
 0x24f   : > { %v976_v26 = vadd.f32 %v975_v25, %v604_v22  ;;  %v977_v27 = vpop.f32.mrb[1].mxu0  ;;  %v1018_v36 = vpop.f32.mrb[1].mxu1  ;;  %v1017_v42 = vadd.f32 %v1016_v35, %v612_v39 }
 0x250   : > { %v978_v28 = vadd.f32 %v977_v27, %v608_v23  ;;  %v979_v29 = vpop.f32.mrb[2].mxu0  ;;  %v1019_v37 = vadd.f32 %v1018_v36, %v616_v32  ;;  %v1020_v38 = vpop.f32.mrb[2].mxu1  ;;  %v1132_v36 = vrot.slane %v1113_v13, %v611_v34 }
 0x251   : > { %v2107_v30 = vmul.f32 -1.442695, %v976_v26  ;;  %v980_v31 = vpop.f32.mrb[3].mxu0  ;;  %v1021_v40 = vpop.f32.mrb[3].mxu1 }
 0x252   : > { %v2108_v33 = vmul.f32 -1.442695, %v978_v28  ;;  %v2109_v41 = vmul.f32 -1.442695, %v1019_v37 }
 0x253   : > { %2631 = vpow2.f32 %v2107_v30 }
 0x254   : > { %2633 = vpow2.f32 %v2108_v33  ;;  %v1136_v33 = vrot.slane %v1113_v13, %v615_v24  ;;  %v1747_v13 = vld [vmem:[#allocation13 + $0x28] sm:$0xff] }
 0x255   : > { %2635 = vpow2.f32 %v2109_v41 }
 0x256   : > { %2637 = vtanh.f32 %v1017_v42 }
 0x25d   : > { %v2632_v43 = vpop.eup %2631 }
 0x25e   : > { %v2634_v44 = vpop.eup %2633  ;;  %v1026_v45 = vadd.f32 1.0, %v2632_v43 }
 0x25f   : > { %v1032_v46 = vadd.f32 1.0, %v2634_v44  ;;  %v2636_v47 = vpop.eup %2635 }
 0x260   : > { %2639 = vrcp.f32 %v1026_v45  ;;  %v2638_v48 = vpop.eup %2637  ;;  %v1039_v51 = vadd.f32 1.0, %v2636_v47  ;;  %v1117_v45 = vld [vmem:[#allocation3 + $0x8] sm:$0xff] }
 0x261   : > { %2641 = vrcp.f32 %v1032_v46 }
 0x262   : > { %2643 = vrcp.f32 %v1039_v51 }
 0x26a   : > { %v2640_v50 = vpop.eup %2639 }
 0x26b   : > { %v2642_v52 = vpop.eup %2641  ;;  %v1043_v53 = vmul.f32 %v2640_v50, %v2638_v48 }
 0x26c   : > { %v1042_v54 = vmul.f32 %v2642_v52, %v597_v49  ;;  %v2644_v56 = vpop.eup %2643 }
 0x26e   : > { %v1044_v55 = vadd.f32 %v1043_v53, %v1042_v54  ;;  %v1586_v53 = vld [vmem:[#allocation16] sm:$0x3] }
 0x26f   : > { %v1591_v54 = vrot.slane %v1586_v53, %v3492_v19  ;;  %v1759_v19 = vld [vmem:[#allocation13 + $0x88] sm:$0xff] }
 0x270   : > { %2645 = vtanh.f32 %v1044_v55  ;;  %1048 = vst [vmem:[#allocation3] sm:$0xff] %v1044_v55  ;;  %v1595_v55 = vrot.slane %v1586_v53, %v3495_v21 }
 0x27a   : > { %v2646_v57 = vpop.eup %2645 }
 0x27b   : > { %v1046_v58 = vmul.f32 %v2646_v57, %v2644_v56 }
 0x27d   : > { %1047 = vst [vmem:[#allocation2] sm:$0xff] %v1046_v58  ;;  %v1118_v59 = vpack.c.bf16 %v1046_v58, %v1046_v58 }
 0x27f   : > { %1494 = vmatmul.mubr.bf16.vlgmr.msra.gmra.mrb[4].mxu0 %v1118_v59  ;;  %1535 = vmatmul.mubr.bf16.vlgmr.msra.gmra.mrb[4].mxu1 %v1118_v59 }
 0x280   : > { %1679 = vmatpush1.bf16.msra.mxu0 %v2607_v61  ;;  %1710 = vmatprep.mubr.bf16.mxu0 %v3061_v9  ;;  %v1763_v9 = vld [vmem:[#allocation13 + $0xa8] sm:$0xff] }
 0x281   : > { %1680 = vmatprep.subr.bf16.mxu0 %v2612_v62 }
 0x284   : > { %1681 = vmatpush1.bf16.msra.mxu0 %v2610_v63  ;;  %v1758_v63 = vld [vmem:[#allocation13 + $0x80] sm:$0xff] }
 0x285   : > { %1682 = vmatprep.subr.bf16.mxu0 %v2615_v0  ;;  %v1742_v0 = vld [vmem:[#allocation13] sm:$0xff]  ;;  %v2238_v21 = vpack.c.bf16 %v1759_v19, %v1758_v63 }
 0x287   : > { %2239 = vmatprep.subr.bf16.mxu1 %v2238_v21 }
 0x288   : > { %1683 = vmatpush1.bf16.msra.mxu0 %v2613_v1  ;;  %v1743_v1 = vld [vmem:[#allocation13 + $0x8] sm:$0xff] }
 0x289   : > { %1684 = vmatprep.subr.bf16.mxu0 %v2618_v2  ;;  %v1760_v2 = vld [vmem:[#allocation13 + $0x90] sm:$0xff] }
 0x28c   : > { %1685 = vmatpush1.bf16.msra.mxu0 %v2616_v3  ;;  %v1761_v3 = vld [vmem:[#allocation13 + $0x98] sm:$0xff] }
 0x28d   : > { %1686 = vmatprep.subr.bf16.mxu0 %v2621_v4  ;;  %v2240_v4 = vpack.c.bf16 %v1743_v1, %v1742_v0 }
 0x28f   : > { %2241 = vmatpush3.bf16.msra.mxu1 %v2240_v4 }
 0x290   : > { %1687 = vmatpush1.bf16.msra.mxu0 %v2619_v5  ;;  %v2242_v5 = vpack.c.bf16 %v1761_v3, %v1760_v2 }
 0x291   : > { %1688 = vmatprep.subr.bf16.mxu0 %v2624_v6  ;;  %v1744_v6 = vld [vmem:[#allocation13 + $0x10] sm:$0xff] }
 0x292   : > { %2243 = vmatprep.subr.bf16.mxu1 %v2242_v5 }
 0x294   : > { %1689 = vmatpush1.bf16.msra.mxu0 %v2622_v7  ;;  %v1745_v7 = vld [vmem:[#allocation13 + $0x18] sm:$0xff] }
 0x295   : > { %1690 = vmatprep.subr.bf16.mxu0 %v2627_v8  ;;  %v1762_v8 = vld [vmem:[#allocation13 + $0xa0] sm:$0xff] }
 0x298   : > { %1691 = vmatpush1.bf16.msra.mxu0 %v2625_v10  ;;  %v2244_v10 = vpack.c.bf16 %v1745_v7, %v1744_v6 }
 0x299   : > { %1692 = vmatprep.subr.bf16.mxu0 %v2630_v11  ;;  %v2246_v11 = vpack.c.bf16 %v1763_v9, %v1762_v8 }
 0x29a   : > { %2245 = vmatpush3.bf16.msra.mxu1 %v2244_v10 }
 0x29b   : > { %2247 = vmatprep.subr.bf16.mxu1 %v2246_v11 }
 0x29c   : > { %1693 = vmatpush1.bf16.msra.mxu0 %v2628_v12  ;;  %v1746_v12 = vld [vmem:[#allocation13 + $0x20] sm:$0xff] }
 0x352   : > { %v1495_v16 = vpop.f32.mrb[4].mxu0  ;;  %v1536_v20 = vpop.f32.mrb[4].mxu1 }
 0x353   : > { %v1496_v22 = vadd.f32 %v1495_v16, %v1124_v14  ;;  %v1497_v23 = vpop.f32.mrb[5].mxu0  ;;  %v1538_v25 = vpop.f32.mrb[5].mxu1  ;;  %v1537_v38 = vadd.f32 %v1536_v20, %v1132_v36  ;;  %v1764_v14 = vld [vmem:[#allocation13 + $0xb0] sm:$0xff]  ;;  %v2248_v16 = vpack.c.bf16 %v1747_v13, %v1746_v12 }
 0x354   : > { %v1498_v26 = vadd.f32 %v1497_v23, %v1128_v15  ;;  %v1499_v27 = vpop.f32.mrb[6].mxu0  ;;  %v1540_v28 = vpop.f32.mrb[6].mxu1  ;;  %v1539_v35 = vadd.f32 %v1538_v25, %v1136_v33  ;;  %v1765_v15 = vld [vmem:[#allocation13 + $0xb8] sm:$0xff]  ;;  %v1766_v25 = vld [vmem:[#allocation13 + $0xc0] sm:$0xff]  ;;  %v1752_v36 = vld [vmem:[#allocation13 + $0x50] sm:$0xff] }
 0x355   : > { %v2174_v29 = vmul.f32 -1.442695, %v1496_v22  ;;  %v1500_v30 = vpop.f32.mrb[7].mxu0  ;;  %v1541_v31 = vpop.f32.mrb[7].mxu1  ;;  %v2250_v20 = vpack.c.bf16 %v1765_v15, %v1764_v14  ;;  %v1748_v22 = vld [vmem:[#allocation13 + $0x30] sm:$0xff]  ;;  %v1749_v23 = vld [vmem:[#allocation13 + $0x38] sm:$0xff]  ;;  %2249 = vmatpush3.bf16.msra.mxu1 %v2248_v16 }
 0x356   : > { %v2175_v32 = vmul.f32 -1.442695, %v1498_v26  ;;  %v2176_v37 = vmul.f32 -1.442695, %v1539_v35  ;;  %v1767_v26 = vld [vmem:[#allocation13 + $0xc8] sm:$0xff]  ;;  %v2252_v27 = vpack.c.bf16 %v1749_v23, %v1748_v22  ;;  %v1768_v31 = vld [vmem:[#allocation13 + $0xd0] sm:$0xff] }
 0x357   : > { %2647 = vpow2.f32 %v2174_v29  ;;  %2251 = vmatprep.subr.bf16.mxu1 %v2250_v20  ;;  %v2254_v28 = vpack.c.bf16 %v1767_v26, %v1766_v25  ;;  %v1750_v29 = vld [vmem:[#allocation13 + $0x40] sm:$0xff]  ;;  %v1751_v30 = vld [vmem:[#allocation13 + $0x48] sm:$0xff] }
 0x358   : > { %2649 = vpow2.f32 %v2175_v32  ;;  %v1769_v32 = vld [vmem:[#allocation13 + $0xd8] sm:$0xff]  ;;  %v2256_v33 = vpack.c.bf16 %v1751_v30, %v1750_v29 }
 0x359   : > { %2651 = vpow2.f32 %v2176_v37  ;;  %2253 = vmatpush3.bf16.msra.mxu1 %v2252_v27  ;;  %v2258_v35 = vpack.c.bf16 %v1769_v32, %v1768_v31  ;;  %v1753_v37 = vld [vmem:[#allocation13 + $0x58] sm:$0xff] }
 0x35a   : > { %2653 = vtanh.f32 %v1537_v38  ;;  %2255 = vmatprep.subr.bf16.mxu1 %v2254_v28  ;;  %v1770_v38 = vld [vmem:[#allocation13 + $0xe0] sm:$0xff] }
 0x35d   : > { %2257 = vmatpush3.bf16.msra.mxu1 %v2256_v33 }
 0x35e   : > { %2259 = vmatprep.subr.bf16.mxu1 %v2258_v35 }
 0x361   : > { %v2648_v39 = vpop.eup %2647 }
 0x362   : > { %v2650_v40 = vpop.eup %2649  ;;  %v1546_v41 = vadd.f32 1.0, %v2648_v39  ;;  %v1771_v39 = vld [vmem:[#allocation13 + $0xe8] sm:$0xff] }
 0x363   : > { %v1552_v42 = vadd.f32 1.0, %v2650_v40  ;;  %v2652_v43 = vpop.eup %2651  ;;  %v2260_v40 = vpack.c.bf16 %v1753_v37, %v1752_v36 }
 0x364   : > { %2655 = vrcp.f32 %v1546_v41  ;;  %v2654_v44 = vpop.eup %2653  ;;  %v1559_v48 = vadd.f32 1.0, %v2652_v43  ;;  %v2262_v41 = vpack.c.bf16 %v1771_v39, %v1770_v38  ;;  %v1755_v43 = vld [vmem:[#allocation13 + $0x68] sm:$0xff] }
 0x365   : > { %2657 = vrcp.f32 %v1552_v42  ;;  %v1754_v42 = vld [vmem:[#allocation13 + $0x60] sm:$0xff]  ;;  %2261 = vmatpush3.bf16.msra.mxu1 %v2260_v40 }
 0x366   : > { %2659 = vrcp.f32 %v1559_v48  ;;  %2263 = vmatprep.subr.bf16.mxu1 %v2262_v41  ;;  %v1757_v48 = vld [vmem:[#allocation13 + $0x78] sm:$0xff] }
 0x36e   : > { %v2656_v24 = vpop.eup %2655 }
 0x36f   : > { %v2658_v46 = vpop.eup %2657  ;;  %v1563_v47 = vmul.f32 %v2656_v24, %v2654_v44  ;;  %v1772_v44 = vld [vmem:[#allocation13 + $0xf0] sm:$0xff]  ;;  %v2264_v24 = vpack.c.bf16 %v1755_v43, %v1754_v42 }
 0x370   : > { %v1562_v49 = vmul.f32 %v2658_v46, %v1117_v45  ;;  %v2660_v34 = vpop.eup %2659  ;;  %v1773_v45 = vld [vmem:[#allocation13 + $0xf8] sm:$0xff] }
 0x371   : > { %v2266_v46 = vpack.c.bf16 %v1773_v45, %v1772_v44  ;;  %2265 = vmatpush3.bf16.msra.mxu1 %v2264_v24 }
 0x372   : > { %v1564_v18 = vadd.f32 %v1563_v47, %v1562_v49  ;;  %v1756_v47 = vld [vmem:[#allocation13 + $0x70] sm:$0xff] }
 0x373   : > { %v2268_v49 = vpack.c.bf16 %v1757_v48, %v1756_v47  ;;  %2267 = vmatprep.subr.bf16.mxu1 %v2266_v46 }
 0x374   : > { %2661 = vtanh.f32 %v1564_v18  ;;  %1568 = vst [vmem:[#allocation3 + $0x8] sm:$0xff] %v1564_v18  ;;  %v1722_v18 = vand.u32 127, %v601_v17  ;;  %v3062_v17 = vmov 1.0  }
 0x375   : > { %2269 = vmatpush3.bf16.msra.mxu1 %v2268_v49 }
 0x37e   : > { %v2662_v50 = vpop.eup %2661 }
 0x37f   : > { %v1566_v51 = vmul.f32 %v2662_v50, %v2660_v34  ;;  %v1723_v34 = vadd.s32 128, %v1722_v18  ;;  %v1724_v50 = vcvt.s32.f32 %v1722_v18 }
 0x381   : > { %1567 = vst [vmem:[#allocation2 + $0x8] sm:$0xff] %v1566_v51  ;;  %v1569_v52 = vpack.c.bf16 %v1566_v51, %v1566_v51  ;;  %v1725_v51 = vcvt.s32.f32 %v1723_v34 }
 0x383   : > { %1711 = vmatmul.mubr.bf16.vlgmr.msra.gmra.mrb[8].mxu0 %v1569_v52 }
 0x456   : > { %v1712_v56 = vpop.f32.mrb[8].mxu0 }
 0x457   : > { %v3513_v57 = vadd.f32 %v1712_v56, %v1591_v54  ;;  %v1714_v58 = vpop.f32.mrb[9].mxu0 }
 0x458   : > { %v3515_v59 = vadd.f32 %v1714_v58, %v1595_v55  ;;  %v1716_v60 = vpop.f32.mrb[10].mxu0 }
 0x459   : > { %1719 = vst [vmem:[%s3479_s15] sm:$0xff] %v3513_v57  ;;  %v1717_v61 = vpop.f32.mrb[11].mxu0 }
 0x45a   : > { %1720 = vst [vmem:[%s3479_s15 + $0x8] sm:$0xff] %v3515_v59  ;;  %v1726_v62 = vmax.f32 %v3513_v57, %v3515_v59 }
 0x45c   : > { %1727 = vmax.xlane.f32.xlu0 %v1726_v62 }
 0x4e9   : > { %v1728_v52 = vpop.xlane.xlu0 %1727 }
 0x4ea   : > { %vm1729_vm0 = vcmp.ge.f32.partialorder %v3513_v57, %v1728_v52  ;;  %vm1730_vm1 = vcmp.ge.f32.partialorder %v3515_v59, %v1728_v52 }
 0x4eb   : > { %v1731_v53 = vsel %vm1729_vm0, %v1724_v50, 256.0  ;;  %v1732_v54 = vsel %vm1730_vm1, %v1725_v51, 256.0 }
 0x4ec   : > { %v1733_v55 = vmin.f32 %v1731_v53, %v1732_v54 }
 0x4ee   : > { %1734 = vmin.xlane.f32.xlu0 %v1733_v55 }
 0x57b   : > { %v1735_v56 = vpop.xlane.xlu0 %1734 }
 0x57c   : > { %vm1736_vm2 = vcmp.eq.f32.partialorder %v1724_v50, %v1735_v56  ;;  %vm1737_vm3 = vcmp.eq.f32.partialorder %v1725_v51, %v1735_v56 }
 0x57d   : > { %2195 = vmatprep.mubr.msk.f32.mxu1 %vm1737_vm3, %v3062_v17 }
 0x57e   : > { %2196 = vmatmul.mubr.msk.f32.vlgmr.msra.gmra.mrb[8].mxu1 %vm1736_vm2, %v3062_v17 }
 0x57f   : > { %2968 = shalt.err (!%p2965_p12)
}
 0x580   : > { %s2969_s13 = scalar_lea.hbm %s3531_s14, 256  ;;  %s2973_s23 = scalar_lea.hbm %s3615_s2, 1792 }
 0x581   : > { %p2970_p10 = scmp.ne.s32.totalorder %s3531_s14, %s2969_s13  ;;  %p2974_p2 = scmp.lt.u32.totalorder %s3531_s14, %s3615_s2 }
 0x582   : > { %p2975_p4 = scmp.lt.u32.totalorder %s2973_s23, %s2969_s13  ;;  %p2977_p5 = scmp.lt.u32.totalorder %s2969_s13, %s3531_s14 }
 0x583   : > { %p2971_p6 = pnand %p2970_p10, %p3616_p3 }
 0x584   : > { %p2976_p7 = por %p2975_p4, %p2974_p2 }
 0x585   : > { %p2972_p1 = pneg %p2971_p6 }
 0x586   : > { %p2978_p9 = por %p2977_p5, %p2976_p7 }
 0x588   : > { %p2979_p13 = pnand %p2978_p9, %p2972_p1 }
 0x58a   : > { %2982 = shalt.err (!%p2979_p13)
}
 0x58b   : > { %2308 = dma.vmem_to_hbm [thread:$0]  (%p3616_p3), %s1861_s16, 256, %s3531_s14, %s1846_s26  }
 0x651   : > { %v2235_v57 = vpop.f32.mrb[8].mxu1 }
 0x652   : > { %v2236_v58 = vpop.f32.mrb[9].mxu1 }
 0x653   : > { %v2237_v59 = vadd.f32 %v2236_v58, %v2235_v57 }
 0x655   : > { %1844 = vst [vmem:[#allocation4] sm:$0xff] %v2237_v59 }
 0x656 PF: > { %p2365_p0 = scmp.ge.s32.totalorder %s3043_s30, 2  ;;  %s1872_s25 = sand.u32 1, %s3031_s27  }
 0x657   : > { %p3617_p11 = scmp.ne.s32.totalorder %s3600_s3, 0  ;;  %s1873_s18 = scalar_lea.sflag [#allocation9], %s1872_s25 }
 0x659   : > { %p2343_p8 = pnand %p2365_p0, %p3617_p11 }
 0x65b   : > { %3026 = dma.done.wait (!%p2343_p8), %s1873_s18, 256  }
 0x65c   : > { %3028 = vsyncadd (!%p2343_p8), %s1873_s18, 4294967040  ;;  %p33_p3 = scmp.ge.s32.totalorder %s3378_s17, 9   ;;  %s3618_s27 = smov %s3035_s28 }
 0x65d   : > { %s3619_s28 = smov %s3039_s29  ;;  %s3620_s29 = smov %s3390_s24 }
 0x65e   : > { %s3621_s30 = smov %s3378_s17  ;;  %35 = sbr.rel (!%p33_p3) target bundleno = 23 (0x17), region = 147 }
 0x665   :  { %1878 = vsyncpa [#allocation8], 1 }
 0x666   :  { %1880 = vsyncpa [#allocation8 + $0x1], 1 }
 0x667   :  { %1881 = vsyncpa [#allocation11], 1 }
 0x668   :  { %1882 = vsyncpa [#allocation14], 1 }
 0x669   :  { %1883 = vsyncpa [#allocation17], 1 }
 0x66a   :  { %1884 = vsyncpa [#allocation20], 1 }
 0x66b   :  { %1885 = vsyncpa [#allocation23], 1 }
 0x66c   :  { %1886 = vsyncpa [#allocation9], 1 }
 0x66d   :  { %1888 = vsyncpa [#allocation9 + $0x1], 1 }

</bundles_post_ra>
